<compile_context>
chip_gen: v5e
topology: v5e:2x2
jax: 0.10.0
libtpu: 0.0.40
codegen_flags: <defaults>
</compile_context>

<pallas_src>
import functools

import jax
import jax.numpy as jnp
from jax.experimental import pallas as pl
from jax.experimental.pallas import tpu as pltpu


# MXU operand dtype. jnp.bfloat16 is recommended for v6e/v7x production use
# (~2x MXU throughput, half the activation/weight DMA bytes; accumulation
# stays f32). Kept at f32 here so the 1e-3 self-check against the f32 XLA
# reference passes with margin.
MXU_DTYPE = jnp.float32


# ----------------------------- Pallas kernels -----------------------------

def _fused_conv_kernel(x_ref, sc_ref, sh_ref, w_ref, b_ref,
                       y_ref, sum_ref, sq_ref, xp_scr,
                       *, apply_in_bn_relu):
    """One batch image per grid step: (optional fused BN+ReLU) -> 3x3 conv
    -> conv output + per-image BN statistics of that output.

    x_ref  : (1, H, W, Cin)     raw input (stage 1) or raw conv1 output (stage 2)
    sc_ref : (1, Cin)           previous-stage BN scale  (used iff apply_in_bn_relu)
    sh_ref : (1, Cin)           previous-stage BN shift  (used iff apply_in_bn_relu)
    w_ref  : (3, 3, Cin, Cout)  HWIO weights
    b_ref  : (1, Cout)          bias
    y_ref  : (1, H, W, Cout)    conv output (pre-BN)
    sum_ref: (1, 1, Cout)       per-image channel sum of y
    sq_ref : (1, 1, Cout)       per-image channel sum of y*y
    xp_scr : (H+2, W+2, Cin)    VMEM scratch: zero halo + activation interior
    """
    _, H, W, Cin = x_ref.shape
    Cout = w_ref.shape[-1]

    x = x_ref[0].astype(jnp.float32)                        # (H, W, Cin)
    if apply_in_bn_relu:
        # Fused BatchNorm (affine folded into scale/shift) + ReLU of the
        # previous stage, applied on the load path.
        x = jnp.maximum(x * sc_ref[0] + sh_ref[0], 0.0)

    # 1-pixel zero halo handled entirely in VMEM (no jnp.pad / extra HBM pass).
    xp_scr[...] = jnp.zeros_like(xp_scr)
    xp_scr[1:H + 1, 1:W + 1, :] = x.astype(xp_scr.dtype)

    # 3x3 conv as 9 (H*W, Cin) x (Cin, Cout) MXU matmuls; accumulator is
    # initialized with the broadcast bias (hoisted out of the tap loop).
    bias = b_ref[0].astype(jnp.float32)                     # (Cout,)
    acc = jnp.broadcast_to(bias[None, :], (H * W, Cout))
    for kh in range(3):                                     # 9 static taps
        for kw in range(3):
            slab = xp_scr[kh:kh + H, kw:kw + W, :].reshape(H * W, Cin)
            acc = acc + jnp.dot(
                slab.astype(MXU_DTYPE),
                w_ref[kh, kw].astype(MXU_DTYPE),
                preferred_element_type=jnp.float32,
            )

    y_ref[...] = acc.reshape(1, H, W, Cout).astype(y_ref.dtype)

    # Fused per-image BN statistics of the conv output (reduced over N in JAX,
    # which keeps the batch grid axis "parallel").
    sum_ref[...] = jnp.sum(acc, axis=0).reshape(1, 1, Cout)
    sq_ref[...] = jnp.sum(acc * acc, axis=0).reshape(1, 1, Cout)


def _bn_relu_kernel(y_ref, sc_ref, sh_ref, o_ref):
    """Final stage only: o = relu(y * scale + shift), scale/shift per channel."""
    y = y_ref[0].astype(jnp.float32)                        # (H, W, C)
    o_ref[0] = jnp.maximum(y * sc_ref[0] + sh_ref[0], 0.0).astype(o_ref.dtype)


# ------------------------------ JAX wrappers -------------------------------

def fused_conv3x3_bn_stats(x, w, b, scale_in=None, shift_in=None):
    """3x3 SAME conv (optionally with the previous stage's BN+ReLU fused into
    the input path) plus fused batch-norm statistics of the conv output.

    x: (N, H, W, Cin) NHWC.  Returns (y, mean, var) with y the raw (pre-BN)
    conv output and mean/var the per-channel batch statistics of y.
    """
    N, H, W, Cin = x.shape
    Cout = w.shape[-1]

    apply_in = scale_in is not None
    if scale_in is None:
        scale_in = jnp.ones((Cin,), jnp.float32)
        shift_in = jnp.zeros((Cin,), jnp.float32)

    kernel = functools.partial(_fused_conv_kernel, apply_in_bn_relu=apply_in)

    y, psum, psq = pl.pallas_call(
        kernel,
        out_shape=(
            jax.ShapeDtypeStruct((N, H, W, Cout), x.dtype),
            jax.ShapeDtypeStruct((N, 1, Cout), jnp.float32),
            jax.ShapeDtypeStruct((N, 1, Cout), jnp.float32),
        ),
        grid=(N,),
        in_specs=[
            pl.BlockSpec((1, H, W, Cin), lambda n: (n, 0, 0, 0)),
            pl.BlockSpec((1, Cin), lambda n: (0, 0)),
            pl.BlockSpec((1, Cin), lambda n: (0, 0)),
            pl.BlockSpec((3, 3, Cin, Cout), lambda n: (0, 0, 0, 0)),
            pl.BlockSpec((1, Cout), lambda n: (0, 0)),
        ],
        out_specs=(
            pl.BlockSpec((1, H, W, Cout), lambda n: (n, 0, 0, 0)),
            pl.BlockSpec((1, 1, Cout), lambda n: (n, 0, 0)),
            pl.BlockSpec((1, 1, Cout), lambda n: (n, 0, 0)),
        ),
        scratch_shapes=[pltpu.VMEM((H + 2, W + 2, Cin), jnp.float32)],
        compiler_params=pltpu.CompilerParams(
            dimension_semantics=("parallel",)),
    )(x, scale_in.reshape(1, Cin), shift_in.reshape(1, Cin), w,
      b.reshape(1, Cout))

    cnt = jnp.float32(N * H * W)
    mean = jnp.sum(psum[:, 0, :], axis=0) / cnt
    # biased variance (training-mode BN); clamp guards against tiny negative
    # values from E[x^2] - mean^2 cancellation in f32.
    var = jnp.maximum(jnp.sum(psq[:, 0, :], axis=0) / cnt - mean * mean, 0.0)
    return y, mean, var


def bn_relu(y, scale, shift):
    """y = relu(y * scale + shift), per-channel scale/shift, NHWC."""
    N, H, W, C = y.shape
    return pl.pallas_call(
        _bn_relu_kernel,
        out_shape=jax.ShapeDtypeStruct(y.shape, y.dtype),
        grid=(N,),
        in_specs=[
            pl.BlockSpec((1, H, W, C), lambda n: (n, 0, 0, 0)),
            pl.BlockSpec((1, C), lambda n: (0, 0)),
            pl.BlockSpec((1, C), lambda n: (0, 0)),
        ],
        out_specs=pl.BlockSpec((1, H, W, C), lambda n: (n, 0, 0, 0)),
        compiler_params=pltpu.CompilerParams(
            dimension_semantics=("parallel",)),
    )(y, scale.reshape(1, C), shift.reshape(1, C))


@jax.jit
def conv_block_forward(x_nchw, params, eps=1e-5):
    """PyTorch conv_block.forward: conv->bn->relu->conv->bn->relu.

    x_nchw: (N, Cin, H, W) float32 (PyTorch layout); returns (N, Cout, H, W).
    """
    x = jnp.transpose(x_nchw, (0, 2, 3, 1))                 # NCHW -> NHWC

    # Stage 1: conv1 + fused BN1 batch statistics.
    y1, m1, v1 = fused_conv3x3_bn_stats(x, params["w1"], params["b1"])
    scale1 = params["g1"] / jnp.sqrt(v1 + eps)
    shift1 = params["beta1"] - m1 * scale1

    # Stage 2: BN1 + ReLU fused into conv2's load path, + fused BN2 statistics.
    y2, m2, v2 = fused_conv3x3_bn_stats(
        y1, params["w2"], params["b2"], scale_in=scale1, shift_in=shift1)
    scale2 = params["g2"] / jnp.sqrt(v2 + eps)
    shift2 = params["beta2"] - m2 * scale2

    out = bn_relu(y2, scale2, shift2)
    return jnp.transpose(out, (0, 3, 1, 2))                 # NHWC -> NCHW


# ------------------------------ reference ---------------------------------

def conv_block_reference(x_nchw, params, eps=1e-5):
    x = jnp.transpose(x_nchw, (0, 2, 3, 1))

    def conv(x, w, b):
        y = jax.lax.conv_general_dilated(
            x, w, window_strides=(1, 1), padding="SAME",
            dimension_numbers=("NHWC", "HWIO", "NHWC"))
        return y + b

    def bn_relu_ref(x, g, bta):
        m = jnp.mean(x, axis=(0, 1, 2))
        v = jnp.var(x, axis=(0, 1, 2))                      # biased, training-mode
        return jnp.maximum((x - m) / jnp.sqrt(v + eps) * g + bta, 0.0)

    y = bn_relu_ref(conv(x, params["w1"], params["b1"]), params["g1"], params["beta1"])
    y = bn_relu_ref(conv(y, params["w2"], params["b2"]), params["g2"], params["beta2"])
    return jnp.transpose(y, (0, 3, 1, 2))


# --------------------------------- main ------------------------------------

if __name__ == "__main__":
    key = jax.random.PRNGKey(0)
    k_x, k_w1, k_b1, k_w2, k_b2 = jax.random.split(key, 5)

    N, Cin, Cout, H, W = 2, 4, 8, 16, 16

    x = jax.random.normal(k_x, (N, Cin, H, W), dtype=jnp.float32)

    params = {
        # HWIO weights (PyTorch OIHW (Cout, Cin, 3, 3) transposed to (3, 3, Cin, Cout))
        "w1": 0.1 * jax.random.normal(k_w1, (3, 3, Cin, Cout), dtype=jnp.float32),
        "b1": 0.1 * jax.random.normal(k_b1, (Cout,), dtype=jnp.float32),
        "g1": jnp.ones((Cout,), jnp.float32),
        "beta1": jnp.zeros((Cout,), jnp.float32),
        "w2": 0.1 * jax.random.normal(k_w2, (3, 3, Cout, Cout), dtype=jnp.float32),
        "b2": 0.1 * jax.random.normal(k_b2, (Cout,), dtype=jnp.float32),
        "g2": jnp.ones((Cout,), jnp.float32),
        "beta2": jnp.zeros((Cout,), jnp.float32),
    }

    out = conv_block_forward(x, params)
    out = jax.block_until_ready(out)

    ref = conv_block_reference(x, params)
    assert out.shape == (N, Cout, H, W), out.shape
    assert jnp.allclose(out, ref, rtol=1e-3, atol=1e-3), (
        float(jnp.max(jnp.abs(out - ref))))

    print("KERNEL_OK")
</pallas_src>

<mosaic_0001>
module attributes {stable_mosaic.version = 11 : i64} {
  func.func @_fused_conv_kernel(%arg0: i32, %arg1: memref<1x16x16x4xf32, #tpu.memory_space<vmem>>, %arg2: memref<1x4xf32, #tpu.memory_space<vmem>>, %arg3: memref<1x4xf32, #tpu.memory_space<vmem>>, %arg4: memref<3x3x4x8xf32, #tpu.memory_space<vmem>>, %arg5: memref<1x8xf32, #tpu.memory_space<vmem>>, %arg6: memref<1x16x16x8xf32, #tpu.memory_space<vmem>>, %arg7: memref<1x1x8xf32, #tpu.memory_space<vmem>>, %arg8: memref<1x1x8xf32, #tpu.memory_space<vmem>>, %arg9: memref<18x18x4xf32, #tpu.memory_space<vmem>>) attributes {dimension_semantics = [#tpu.dimension_semantics<parallel>], iteration_bounds = array<i64: 2>, scalar_prefetch = 0 : i64, scratch_operands = 1 : i64, tpu.core_type = #tpu.core_type<tc>, window_params = [{transform_indices = @transform_0, window_bounds = array<i64: 1, 16, 16, 4>}, {pipeline_mode = #tpu.pipeline_mode<synchronous>, transform_indices = @transform_1, window_bounds = array<i64: 1, 4>}, {pipeline_mode = #tpu.pipeline_mode<synchronous>, transform_indices = @transform_2, window_bounds = array<i64: 1, 4>}, {pipeline_mode = #tpu.pipeline_mode<synchronous>, transform_indices = @transform_3, window_bounds = array<i64: 3, 3, 4, 8>}, {pipeline_mode = #tpu.pipeline_mode<synchronous>, transform_indices = @transform_4, window_bounds = array<i64: 1, 8>}, {transform_indices = @transform_5, window_bounds = array<i64: 1, 16, 16, 8>}, {transform_indices = @transform_6, window_bounds = array<i64: 1, 1, 8>}, {transform_indices = @transform_7, window_bounds = array<i64: 1, 1, 8>}]} {
    %c0 = arith.constant 0 : index
    %c0_0 = arith.constant 0 : index
    %c0_1 = arith.constant 0 : index
    %c0_2 = arith.constant 0 : index
    %0 = vector.load %arg1[%c0, %c0_0, %c0_1, %c0_2] : memref<1x16x16x4xf32, #tpu.memory_space<vmem>>, vector<1x16x16x4xf32>
    %1 = vector.shape_cast %0 : vector<1x16x16x4xf32> to vector<16x16x4xf32>
    %cst = arith.constant 0.000000e+00 : f32
    %2 = vector.broadcast %cst : f32 to vector<18x18x4xf32>
    %c0_3 = arith.constant 0 : index
    %c0_4 = arith.constant 0 : index
    %c0_5 = arith.constant 0 : index
    %3 = vector.load %arg9[%c0_3, %c0_4, %c0_5] : memref<18x18x4xf32, #tpu.memory_space<vmem>>, vector<18x18x4xf32>
    tpu.vector_store %arg9[%c0_3, %c0_4, %c0_5], %2 {strides = array<i32>} : memref<18x18x4xf32, #tpu.memory_space<vmem>>, vector<18x18x4xf32>,
    %c1 = arith.constant 1 : index
    %c1_6 = arith.constant 1 : index
    %c0_7 = arith.constant 0 : index
    %4 = vector.load %arg9[%c1, %c1_6, %c0_7] : memref<18x18x4xf32, #tpu.memory_space<vmem>>, vector<16x16x4xf32>
    tpu.vector_store %arg9[%c1, %c1_6, %c0_7], %1 {strides = array<i32>} : memref<18x18x4xf32, #tpu.memory_space<vmem>>, vector<16x16x4xf32>,
    %c0_8 = arith.constant 0 : index
    %c0_9 = arith.constant 0 : index
    %5 = vector.load %arg5[%c0_8, %c0_9] : memref<1x8xf32, #tpu.memory_space<vmem>>, vector<1x8xf32>
    %6 = vector.shape_cast %5 : vector<1x8xf32> to vector<8xf32>
    %7 = vector.shape_cast %6 : vector<8xf32> to vector<1x8xf32>
    %8 = vector.shape_cast %7 : vector<1x8xf32> to vector<1x8xf32>
    %9 = vector.broadcast %8 : vector<1x8xf32> to vector<256x8xf32>
    %c0_10 = arith.constant 0 : index
    %c0_11 = arith.constant 0 : index
    %c0_12 = arith.constant 0 : index
    %10 = vector.load %arg9[%c0_10, %c0_11, %c0_12] : memref<18x18x4xf32, #tpu.memory_space<vmem>>, vector<16x16x4xf32>
    %11 = vector.shape_cast %10 : vector<16x16x4xf32> to vector<256x4xf32>
    %c0_13 = arith.constant 0 : index
    %c0_14 = arith.constant 0 : index
    %c0_15 = arith.constant 0 : index
    %c0_16 = arith.constant 0 : index
    %12 = vector.load %arg4[%c0_13, %c0_14, %c0_15, %c0_16] : memref<3x3x4x8xf32, #tpu.memory_space<vmem>>, vector<1x1x4x8xf32>
    %13 = vector.shape_cast %12 : vector<1x1x4x8xf32> to vector<4x8xf32>
    %cst_17 = arith.constant dense<0.000000e+00> : vector<256x8xf32>
    %14 = tpu.matmul %11, %13, %cst_17 {dimension_numbers = #tpu.dot_dimension_numbers<[1], [0], [0], [1], [0, 0, 1, 1], [], []>} : vector<256x4xf32>, vector<4x8xf32>, vector<256x8xf32> -> vector<256x8xf32>
    %15 = arith.addf %9, %14 : vector<256x8xf32>
    %c0_18 = arith.constant 0 : index
    %c1_19 = arith.constant 1 : index
    %c0_20 = arith.constant 0 : index
    %16 = vector.load %arg9[%c0_18, %c1_19, %c0_20] : memref<18x18x4xf32, #tpu.memory_space<vmem>>, vector<16x16x4xf32>
    %17 = vector.shape_cast %16 : vector<16x16x4xf32> to vector<256x4xf32>
    %c0_21 = arith.constant 0 : index
    %c1_22 = arith.constant 1 : index
    %c0_23 = arith.constant 0 : index
    %c0_24 = arith.constant 0 : index
    %18 = vector.load %arg4[%c0_21, %c1_22, %c0_23, %c0_24] : memref<3x3x4x8xf32, #tpu.memory_space<vmem>>, vector<1x1x4x8xf32>
    %19 = vector.shape_cast %18 : vector<1x1x4x8xf32> to vector<4x8xf32>
    %cst_25 = arith.constant dense<0.000000e+00> : vector<256x8xf32>
    %20 = tpu.matmul %17, %19, %cst_25 {dimension_numbers = #tpu.dot_dimension_numbers<[1], [0], [0], [1], [0, 0, 1, 1], [], []>} : vector<256x4xf32>, vector<4x8xf32>, vector<256x8xf32> -> vector<256x8xf32>
    %21 = arith.addf %15, %20 : vector<256x8xf32>
    %c0_26 = arith.constant 0 : index
    %c2 = arith.constant 2 : index
    %c0_27 = arith.constant 0 : index
    %22 = vector.load %arg9[%c0_26, %c2, %c0_27] : memref<18x18x4xf32, #tpu.memory_space<vmem>>, vector<16x16x4xf32>
    %23 = vector.shape_cast %22 : vector<16x16x4xf32> to vector<256x4xf32>
    %c0_28 = arith.constant 0 : index
    %c2_29 = arith.constant 2 : index
    %c0_30 = arith.constant 0 : index
    %c0_31 = arith.constant 0 : index
    %24 = vector.load %arg4[%c0_28, %c2_29, %c0_30, %c0_31] : memref<3x3x4x8xf32, #tpu.memory_space<vmem>>, vector<1x1x4x8xf32>
    %25 = vector.shape_cast %24 : vector<1x1x4x8xf32> to vector<4x8xf32>
    %cst_32 = arith.constant dense<0.000000e+00> : vector<256x8xf32>
    %26 = tpu.matmul %23, %25, %cst_32 {dimension_numbers = #tpu.dot_dimension_numbers<[1], [0], [0], [1], [0, 0, 1, 1], [], []>} : vector<256x4xf32>, vector<4x8xf32>, vector<256x8xf32> -> vector<256x8xf32>
    %27 = arith.addf %21, %26 : vector<256x8xf32>
    %c1_33 = arith.constant 1 : index
    %c0_34 = arith.constant 0 : index
    %c0_35 = arith.constant 0 : index
    %28 = vector.load %arg9[%c1_33, %c0_34, %c0_35] : memref<18x18x4xf32, #tpu.memory_space<vmem>>, vector<16x16x4xf32>
    %29 = vector.shape_cast %28 : vector<16x16x4xf32> to vector<256x4xf32>
    %c1_36 = arith.constant 1 : index
    %c0_37 = arith.constant 0 : index
    %c0_38 = arith.constant 0 : index
    %c0_39 = arith.constant 0 : index
    %30 = vector.load %arg4[%c1_36, %c0_37, %c0_38, %c0_39] : memref<3x3x4x8xf32, #tpu.memory_space<vmem>>, vector<1x1x4x8xf32>
    %31 = vector.shape_cast %30 : vector<1x1x4x8xf32> to vector<4x8xf32>
    %cst_40 = arith.constant dense<0.000000e+00> : vector<256x8xf32>
    %32 = tpu.matmul %29, %31, %cst_40 {dimension_numbers = #tpu.dot_dimension_numbers<[1], [0], [0], [1], [0, 0, 1, 1], [], []>} : vector<256x4xf32>, vector<4x8xf32>, vector<256x8xf32> -> vector<256x8xf32>
    %33 = arith.addf %27, %32 : vector<256x8xf32>
    %c1_41 = arith.constant 1 : index
    %c1_42 = arith.constant 1 : index
    %c0_43 = arith.constant 0 : index
    %34 = vector.load %arg9[%c1_41, %c1_42, %c0_43] : memref<18x18x4xf32, #tpu.memory_space<vmem>>, vector<16x16x4xf32>
    %35 = vector.shape_cast %34 : vector<16x16x4xf32> to vector<256x4xf32>
    %c1_44 = arith.constant 1 : index
    %c1_45 = arith.constant 1 : index
    %c0_46 = arith.constant 0 : index
    %c0_47 = arith.constant 0 : index
    %36 = vector.load %arg4[%c1_44, %c1_45, %c0_46, %c0_47] : memref<3x3x4x8xf32, #tpu.memory_space<vmem>>, vector<1x1x4x8xf32>
    %37 = vector.shape_cast %36 : vector<1x1x4x8xf32> to vector<4x8xf32>
    %cst_48 = arith.constant dense<0.000000e+00> : vector<256x8xf32>
    %38 = tpu.matmul %35, %37, %cst_48 {dimension_numbers = #tpu.dot_dimension_numbers<[1], [0], [0], [1], [0, 0, 1, 1], [], []>} : vector<256x4xf32>, vector<4x8xf32>, vector<256x8xf32> -> vector<256x8xf32>
    %39 = arith.addf %33, %38 : vector<256x8xf32>
    %c1_49 = arith.constant 1 : index
    %c2_50 = arith.constant 2 : index
    %c0_51 = arith.constant 0 : index
    %40 = vector.load %arg9[%c1_49, %c2_50, %c0_51] : memref<18x18x4xf32, #tpu.memory_space<vmem>>, vector<16x16x4xf32>
    %41 = vector.shape_cast %40 : vector<16x16x4xf32> to vector<256x4xf32>
    %c1_52 = arith.constant 1 : index
    %c2_53 = arith.constant 2 : index
    %c0_54 = arith.constant 0 : index
    %c0_55 = arith.constant 0 : index
    %42 = vector.load %arg4[%c1_52, %c2_53, %c0_54, %c0_55] : memref<3x3x4x8xf32, #tpu.memory_space<vmem>>, vector<1x1x4x8xf32>
    %43 = vector.shape_cast %42 : vector<1x1x4x8xf32> to vector<4x8xf32>
    %cst_56 = arith.constant dense<0.000000e+00> : vector<256x8xf32>
    %44 = tpu.matmul %41, %43, %cst_56 {dimension_numbers = #tpu.dot_dimension_numbers<[1], [0], [0], [1], [0, 0, 1, 1], [], []>} : vector<256x4xf32>, vector<4x8xf32>, vector<256x8xf32> -> vector<256x8xf32>
    %45 = arith.addf %39, %44 : vector<256x8xf32>
    %c2_57 = arith.constant 2 : index
    %c0_58 = arith.constant 0 : index
    %c0_59 = arith.constant 0 : index
    %46 = vector.load %arg9[%c2_57, %c0_58, %c0_59] : memref<18x18x4xf32, #tpu.memory_space<vmem>>, vector<16x16x4xf32>
    %47 = vector.shape_cast %46 : vector<16x16x4xf32> to vector<256x4xf32>
    %c2_60 = arith.constant 2 : index
    %c0_61 = arith.constant 0 : index
    %c0_62 = arith.constant 0 : index
    %c0_63 = arith.constant 0 : index
    %48 = vector.load %arg4[%c2_60, %c0_61, %c0_62, %c0_63] : memref<3x3x4x8xf32, #tpu.memory_space<vmem>>, vector<1x1x4x8xf32>
    %49 = vector.shape_cast %48 : vector<1x1x4x8xf32> to vector<4x8xf32>
    %cst_64 = arith.constant dense<0.000000e+00> : vector<256x8xf32>
    %50 = tpu.matmul %47, %49, %cst_64 {dimension_numbers = #tpu.dot_dimension_numbers<[1], [0], [0], [1], [0, 0, 1, 1], [], []>} : vector<256x4xf32>, vector<4x8xf32>, vector<256x8xf32> -> vector<256x8xf32>
    %51 = arith.addf %45, %50 : vector<256x8xf32>
    %c2_65 = arith.constant 2 : index
    %c1_66 = arith.constant 1 : index
    %c0_67 = arith.constant 0 : index
    %52 = vector.load %arg9[%c2_65, %c1_66, %c0_67] : memref<18x18x4xf32, #tpu.memory_space<vmem>>, vector<16x16x4xf32>
    %53 = vector.shape_cast %52 : vector<16x16x4xf32> to vector<256x4xf32>
    %c2_68 = arith.constant 2 : index
    %c1_69 = arith.constant 1 : index
    %c0_70 = arith.constant 0 : index
    %c0_71 = arith.constant 0 : index
    %54 = vector.load %arg4[%c2_68, %c1_69, %c0_70, %c0_71] : memref<3x3x4x8xf32, #tpu.memory_space<vmem>>, vector<1x1x4x8xf32>
    %55 = vector.shape_cast %54 : vector<1x1x4x8xf32> to vector<4x8xf32>
    %cst_72 = arith.constant dense<0.000000e+00> : vector<256x8xf32>
    %56 = tpu.matmul %53, %55, %cst_72 {dimension_numbers = #tpu.dot_dimension_numbers<[1], [0], [0], [1], [0, 0, 1, 1], [], []>} : vector<256x4xf32>, vector<4x8xf32>, vector<256x8xf32> -> vector<256x8xf32>
    %57 = arith.addf %51, %56 : vector<256x8xf32>
    %c2_73 = arith.constant 2 : index
    %c2_74 = arith.constant 2 : index
    %c0_75 = arith.constant 0 : index
    %58 = vector.load %arg9[%c2_73, %c2_74, %c0_75] : memref<18x18x4xf32, #tpu.memory_space<vmem>>, vector<16x16x4xf32>
    %59 = vector.shape_cast %58 : vector<16x16x4xf32> to vector<256x4xf32>
    %c2_76 = arith.constant 2 : index
    %c2_77 = arith.constant 2 : index
    %c0_78 = arith.constant 0 : index
    %c0_79 = arith.constant 0 : index
    %60 = vector.load %arg4[%c2_76, %c2_77, %c0_78, %c0_79] : memref<3x3x4x8xf32, #tpu.memory_space<vmem>>, vector<1x1x4x8xf32>
    %61 = vector.shape_cast %60 : vector<1x1x4x8xf32> to vector<4x8xf32>
    %cst_80 = arith.constant dense<0.000000e+00> : vector<256x8xf32>
    %62 = tpu.matmul %59, %61, %cst_80 {dimension_numbers = #tpu.dot_dimension_numbers<[1], [0], [0], [1], [0, 0, 1, 1], [], []>} : vector<256x4xf32>, vector<4x8xf32>, vector<256x8xf32> -> vector<256x8xf32>
    %63 = arith.addf %57, %62 : vector<256x8xf32>
    %64 = vector.shape_cast %63 : vector<256x8xf32> to vector<1x16x16x8xf32>
    %c0_81 = arith.constant 0 : index
    %c0_82 = arith.constant 0 : index
    %c0_83 = arith.constant 0 : index
    %c0_84 = arith.constant 0 : index
    %65 = vector.load %arg6[%c0_81, %c0_82, %c0_83, %c0_84] : memref<1x16x16x8xf32, #tpu.memory_space<vmem>>, vector<1x16x16x8xf32>
    tpu.vector_store %arg6[%c0_81, %c0_82, %c0_83, %c0_84], %64 {strides = array<i32>} : memref<1x16x16x8xf32, #tpu.memory_space<vmem>>, vector<1x16x16x8xf32>,
    %cst_85 = arith.constant dense<0.000000e+00> : vector<8xf32>
    %66 = vector.multi_reduction <add>, %63, %cst_85 [0] : vector<256x8xf32> to vector<8xf32>
    %67 = vector.shape_cast %66 : vector<8xf32> to vector<1x1x8xf32>
    %c0_86 = arith.constant 0 : index
    %c0_87 = arith.constant 0 : index
    %c0_88 = arith.constant 0 : index
    %68 = vector.load %arg7[%c0_86, %c0_87, %c0_88] : memref<1x1x8xf32, #tpu.memory_space<vmem>>, vector<1x1x8xf32>
    tpu.vector_store %arg7[%c0_86, %c0_87, %c0_88], %67 {strides = array<i32>} : memref<1x1x8xf32, #tpu.memory_space<vmem>>, vector<1x1x8xf32>,
    %69 = arith.mulf %63, %63 : vector<256x8xf32>
    %cst_89 = arith.constant dense<0.000000e+00> : vector<8xf32>
    %70 = vector.multi_reduction <add>, %69, %cst_89 [0] : vector<256x8xf32> to vector<8xf32>
    %71 = vector.shape_cast %70 : vector<8xf32> to vector<1x1x8xf32>
    %c0_90 = arith.constant 0 : index
    %c0_91 = arith.constant 0 : index
    %c0_92 = arith.constant 0 : index
    %72 = vector.load %arg8[%c0_90, %c0_91, %c0_92] : memref<1x1x8xf32, #tpu.memory_space<vmem>>, vector<1x1x8xf32>
    tpu.vector_store %arg8[%c0_90, %c0_91, %c0_92], %71 {strides = array<i32>} : memref<1x1x8xf32, #tpu.memory_space<vmem>>, vector<1x1x8xf32>,
    return
  }
  func.func @transform_0(%arg0: i32) -> (i32, i32, i32, i32) {
    %c0_i32 = arith.constant 0 : i32
    %c0_i32_0 = arith.constant 0 : i32
    %c0_i32_1 = arith.constant 0 : i32
    %c0_i32_2 = arith.constant 0 : i32
    return %arg0, %c0_i32, %c0_i32_0, %c0_i32_1 : i32, i32, i32, i32
  }
  func.func @transform_1(%arg0: i32) -> (i32, i32) {
    %c0_i32 = arith.constant 0 : i32
    %c0_i32_0 = arith.constant 0 : i32
    %c0_i32_1 = arith.constant 0 : i32
    return %c0_i32, %c0_i32_0 : i32, i32
  }
  func.func @transform_2(%arg0: i32) -> (i32, i32) {
    %c0_i32 = arith.constant 0 : i32
    %c0_i32_0 = arith.constant 0 : i32
    %c0_i32_1 = arith.constant 0 : i32
    return %c0_i32, %c0_i32_0 : i32, i32
  }
  func.func @transform_3(%arg0: i32) -> (i32, i32, i32, i32) {
    %c0_i32 = arith.constant 0 : i32
    %c0_i32_0 = arith.constant 0 : i32
    %c0_i32_1 = arith.constant 0 : i32
    %c0_i32_2 = arith.constant 0 : i32
    %c0_i32_3 = arith.constant 0 : i32
    return %c0_i32, %c0_i32_0, %c0_i32_1, %c0_i32_2 : i32, i32, i32, i32
  }
  func.func @transform_4(%arg0: i32) -> (i32, i32) {
    %c0_i32 = arith.constant 0 : i32
    %c0_i32_0 = arith.constant 0 : i32
    %c0_i32_1 = arith.constant 0 : i32
    return %c0_i32, %c0_i32_0 : i32, i32
  }
  func.func @transform_5(%arg0: i32) -> (i32, i32, i32, i32) {
    %c0_i32 = arith.constant 0 : i32
    %c0_i32_0 = arith.constant 0 : i32
    %c0_i32_1 = arith.constant 0 : i32
    %c0_i32_2 = arith.constant 0 : i32
    return %arg0, %c0_i32, %c0_i32_0, %c0_i32_1 : i32, i32, i32, i32
  }
  func.func @transform_6(%arg0: i32) -> (i32, i32, i32) {
    %c0_i32 = arith.constant 0 : i32
    %c0_i32_0 = arith.constant 0 : i32
    %c0_i32_1 = arith.constant 0 : i32
    return %arg0, %c0_i32, %c0_i32_0 : i32, i32, i32
  }
  func.func @transform_7(%arg0: i32) -> (i32, i32, i32) {
    %c0_i32 = arith.constant 0 : i32
    %c0_i32_0 = arith.constant 0 : i32
    %c0_i32_1 = arith.constant 0 : i32
    return %arg0, %c0_i32, %c0_i32_0 : i32, i32, i32
  }
}

module attributes {stable_mosaic.version = 11 : i64} {
  func.func @_bn_relu_kernel(%arg0: i32, %arg1: memref<1x16x16x8xf32, #tpu.memory_space<vmem>>, %arg2: memref<1x8xf32, #tpu.memory_space<vmem>>, %arg3: memref<1x8xf32, #tpu.memory_space<vmem>>, %arg4: memref<1x16x16x8xf32, #tpu.memory_space<vmem>>) attributes {dimension_semantics = [#tpu.dimension_semantics<parallel>], iteration_bounds = array<i64: 2>, scalar_prefetch = 0 : i64, scratch_operands = 0 : i64, tpu.core_type = #tpu.core_type<tc>, window_params = [{transform_indices = @transform_0, window_bounds = array<i64: 1, 16, 16, 8>}, {pipeline_mode = #tpu.pipeline_mode<synchronous>, transform_indices = @transform_1, window_bounds = array<i64: 1, 8>}, {pipeline_mode = #tpu.pipeline_mode<synchronous>, transform_indices = @transform_2, window_bounds = array<i64: 1, 8>}, {transform_indices = @transform_3, window_bounds = array<i64: 1, 16, 16, 8>}]} {
    %c0 = arith.constant 0 : index
    %c0_0 = arith.constant 0 : index
    %c0_1 = arith.constant 0 : index
    %c0_2 = arith.constant 0 : index
    %0 = vector.load %arg1[%c0, %c0_0, %c0_1, %c0_2] : memref<1x16x16x8xf32, #tpu.memory_space<vmem>>, vector<1x16x16x8xf32>
    %1 = vector.shape_cast %0 : vector<1x16x16x8xf32> to vector<16x16x8xf32>
    %c0_3 = arith.constant 0 : index
    %c0_4 = arith.constant 0 : index
    %2 = vector.load %arg2[%c0_3, %c0_4] : memref<1x8xf32, #tpu.memory_space<vmem>>, vector<1x8xf32>
    %3 = vector.shape_cast %2 : vector<1x8xf32> to vector<8xf32>
    %4 = vector.shape_cast %3 : vector<8xf32> to vector<1x1x8xf32>
    %5 = vector.broadcast %4 : vector<1x1x8xf32> to vector<16x16x8xf32>
    %6 = arith.mulf %1, %5 : vector<16x16x8xf32>
    %c0_5 = arith.constant 0 : index
    %c0_6 = arith.constant 0 : index
    %7 = vector.load %arg3[%c0_5, %c0_6] : memref<1x8xf32, #tpu.memory_space<vmem>>, vector<1x8xf32>
    %8 = vector.shape_cast %7 : vector<1x8xf32> to vector<8xf32>
    %9 = vector.shape_cast %8 : vector<8xf32> to vector<1x1x8xf32>
    %10 = vector.broadcast %9 : vector<1x1x8xf32> to vector<16x16x8xf32>
    %11 = arith.addf %6, %10 : vector<16x16x8xf32>
    %cst = arith.constant 0.000000e+00 : f32
    %12 = vector.broadcast %cst : f32 to vector<16x16x8xf32>
    %13 = arith.maximumf %11, %12 : vector<16x16x8xf32>
    %c0_7 = arith.constant 0 : index
    %c0_8 = arith.constant 0 : index
    %c0_9 = arith.constant 0 : index
    %c0_10 = arith.constant 0 : index
    %14 = vector.load %arg4[%c0_7, %c0_8, %c0_9, %c0_10] : memref<1x16x16x8xf32, #tpu.memory_space<vmem>>, vector<1x16x16x8xf32>
    %15 = vector.shape_cast %14 : vector<1x16x16x8xf32> to vector<16x16x8xf32>
    %16 = vector.shape_cast %13 : vector<16x16x8xf32> to vector<1x16x16x8xf32>
    tpu.vector_store %arg4[%c0_7, %c0_8, %c0_9, %c0_10], %16 {strides = array<i32>} : memref<1x16x16x8xf32, #tpu.memory_space<vmem>>, vector<1x16x16x8xf32>,
    return
  }
  func.func @transform_0(%arg0: i32) -> (i32, i32, i32, i32) {
    %c0_i32 = arith.constant 0 : i32
    %c0_i32_0 = arith.constant 0 : i32
    %c0_i32_1 = arith.constant 0 : i32
    %c0_i32_2 = arith.constant 0 : i32
    return %arg0, %c0_i32, %c0_i32_0, %c0_i32_1 : i32, i32, i32, i32
  }
  func.func @transform_1(%arg0: i32) -> (i32, i32) {
    %c0_i32 = arith.constant 0 : i32
    %c0_i32_0 = arith.constant 0 : i32
    %c0_i32_1 = arith.constant 0 : i32
    return %c0_i32, %c0_i32_0 : i32, i32
  }
  func.func @transform_2(%arg0: i32) -> (i32, i32) {
    %c0_i32 = arith.constant 0 : i32
    %c0_i32_0 = arith.constant 0 : i32
    %c0_i32_1 = arith.constant 0 : i32
    return %c0_i32, %c0_i32_0 : i32, i32
  }
  func.func @transform_3(%arg0: i32) -> (i32, i32, i32, i32) {
    %c0_i32 = arith.constant 0 : i32
    %c0_i32_0 = arith.constant 0 : i32
    %c0_i32_1 = arith.constant 0 : i32
    %c0_i32_2 = arith.constant 0 : i32
    return %arg0, %c0_i32, %c0_i32_0, %c0_i32_1 : i32, i32, i32, i32
  }
}

module attributes {stable_mosaic.version = 11 : i64} {
  func.func @_fused_conv_kernel(%arg0: i32, %arg1: memref<1x16x16x8xf32, #tpu.memory_space<vmem>>, %arg2: memref<1x8xf32, #tpu.memory_space<vmem>>, %arg3: memref<1x8xf32, #tpu.memory_space<vmem>>, %arg4: memref<3x3x8x8xf32, #tpu.memory_space<vmem>>, %arg5: memref<1x8xf32, #tpu.memory_space<vmem>>, %arg6: memref<1x16x16x8xf32, #tpu.memory_space<vmem>>, %arg7: memref<1x1x8xf32, #tpu.memory_space<vmem>>, %arg8: memref<1x1x8xf32, #tpu.memory_space<vmem>>, %arg9: memref<18x18x8xf32, #tpu.memory_space<vmem>>) attributes {dimension_semantics = [#tpu.dimension_semantics<parallel>], iteration_bounds = array<i64: 2>, scalar_prefetch = 0 : i64, scratch_operands = 1 : i64, tpu.core_type = #tpu.core_type<tc>, window_params = [{transform_indices = @transform_0, window_bounds = array<i64: 1, 16, 16, 8>}, {pipeline_mode = #tpu.pipeline_mode<synchronous>, transform_indices = @transform_1, window_bounds = array<i64: 1, 8>}, {pipeline_mode = #tpu.pipeline_mode<synchronous>, transform_indices = @transform_2, window_bounds = array<i64: 1, 8>}, {pipeline_mode = #tpu.pipeline_mode<synchronous>, transform_indices = @transform_3, window_bounds = array<i64: 3, 3, 8, 8>}, {pipeline_mode = #tpu.pipeline_mode<synchronous>, transform_indices = @transform_4, window_bounds = array<i64: 1, 8>}, {transform_indices = @transform_5, window_bounds = array<i64: 1, 16, 16, 8>}, {transform_indices = @transform_6, window_bounds = array<i64: 1, 1, 8>}, {transform_indices = @transform_7, window_bounds = array<i64: 1, 1, 8>}]} {
    %c0 = arith.constant 0 : index
    %c0_0 = arith.constant 0 : index
    %c0_1 = arith.constant 0 : index
    %c0_2 = arith.constant 0 : index
    %0 = vector.load %arg1[%c0, %c0_0, %c0_1, %c0_2] : memref<1x16x16x8xf32, #tpu.memory_space<vmem>>, vector<1x16x16x8xf32>
    %1 = vector.shape_cast %0 : vector<1x16x16x8xf32> to vector<16x16x8xf32>
    %c0_3 = arith.constant 0 : index
    %c0_4 = arith.constant 0 : index
    %2 = vector.load %arg2[%c0_3, %c0_4] : memref<1x8xf32, #tpu.memory_space<vmem>>, vector<1x8xf32>
    %3 = vector.shape_cast %2 : vector<1x8xf32> to vector<8xf32>
    %4 = vector.shape_cast %3 : vector<8xf32> to vector<1x1x8xf32>
    %5 = vector.broadcast %4 : vector<1x1x8xf32> to vector<16x16x8xf32>
    %6 = arith.mulf %1, %5 : vector<16x16x8xf32>
    %c0_5 = arith.constant 0 : index
    %c0_6 = arith.constant 0 : index
    %7 = vector.load %arg3[%c0_5, %c0_6] : memref<1x8xf32, #tpu.memory_space<vmem>>, vector<1x8xf32>
    %8 = vector.shape_cast %7 : vector<1x8xf32> to vector<8xf32>
    %9 = vector.shape_cast %8 : vector<8xf32> to vector<1x1x8xf32>
    %10 = vector.broadcast %9 : vector<1x1x8xf32> to vector<16x16x8xf32>
    %11 = arith.addf %6, %10 : vector<16x16x8xf32>
    %cst = arith.constant 0.000000e+00 : f32
    %12 = vector.broadcast %cst : f32 to vector<16x16x8xf32>
    %13 = arith.maximumf %11, %12 : vector<16x16x8xf32>
    %cst_7 = arith.constant 0.000000e+00 : f32
    %14 = vector.broadcast %cst_7 : f32 to vector<18x18x8xf32>
    %c0_8 = arith.constant 0 : index
    %c0_9 = arith.constant 0 : index
    %c0_10 = arith.constant 0 : index
    %15 = vector.load %arg9[%c0_8, %c0_9, %c0_10] : memref<18x18x8xf32, #tpu.memory_space<vmem>>, vector<18x18x8xf32>
    tpu.vector_store %arg9[%c0_8, %c0_9, %c0_10], %14 {strides = array<i32>} : memref<18x18x8xf32, #tpu.memory_space<vmem>>, vector<18x18x8xf32>,
    %c1 = arith.constant 1 : index
    %c1_11 = arith.constant 1 : index
    %c0_12 = arith.constant 0 : index
    %16 = vector.load %arg9[%c1, %c1_11, %c0_12] : memref<18x18x8xf32, #tpu.memory_space<vmem>>, vector<16x16x8xf32>
    tpu.vector_store %arg9[%c1, %c1_11, %c0_12], %13 {strides = array<i32>} : memref<18x18x8xf32, #tpu.memory_space<vmem>>, vector<16x16x8xf32>,
    %c0_13 = arith.constant 0 : index
    %c0_14 = arith.constant 0 : index
    %17 = vector.load %arg5[%c0_13, %c0_14] : memref<1x8xf32, #tpu.memory_space<vmem>>, vector<1x8xf32>
    %18 = vector.shape_cast %17 : vector<1x8xf32> to vector<8xf32>
    %19 = vector.shape_cast %18 : vector<8xf32> to vector<1x8xf32>
    %20 = vector.shape_cast %19 : vector<1x8xf32> to vector<1x8xf32>
    %21 = vector.broadcast %20 : vector<1x8xf32> to vector<256x8xf32>
    %c0_15 = arith.constant 0 : index
    %c0_16 = arith.constant 0 : index
    %c0_17 = arith.constant 0 : index
    %22 = vector.load %arg9[%c0_15, %c0_16, %c0_17] : memref<18x18x8xf32, #tpu.memory_space<vmem>>, vector<16x16x8xf32>
    %23 = vector.shape_cast %22 : vector<16x16x8xf32> to vector<256x8xf32>
    %c0_18 = arith.constant 0 : index
    %c0_19 = arith.constant 0 : index
    %c0_20 = arith.constant 0 : index
    %c0_21 = arith.constant 0 : index
    %24 = vector.load %arg4[%c0_18, %c0_19, %c0_20, %c0_21] : memref<3x3x8x8xf32, #tpu.memory_space<vmem>>, vector<1x1x8x8xf32>
    %25 = vector.shape_cast %24 : vector<1x1x8x8xf32> to vector<8x8xf32>
    %cst_22 = arith.constant dense<0.000000e+00> : vector<256x8xf32>
    %26 = tpu.matmul %23, %25, %cst_22 {dimension_numbers = #tpu.dot_dimension_numbers<[1], [0], [0], [1], [0, 0, 1, 1], [], []>} : vector<256x8xf32>, vector<8x8xf32>, vector<256x8xf32> -> vector<256x8xf32>
    %27 = arith.addf %21, %26 : vector<256x8xf32>
    %c0_23 = arith.constant 0 : index
    %c1_24 = arith.constant 1 : index
    %c0_25 = arith.constant 0 : index
    %28 = vector.load %arg9[%c0_23, %c1_24, %c0_25] : memref<18x18x8xf32, #tpu.memory_space<vmem>>, vector<16x16x8xf32>
    %29 = vector.shape_cast %28 : vector<16x16x8xf32> to vector<256x8xf32>
    %c0_26 = arith.constant 0 : index
    %c1_27 = arith.constant 1 : index
    %c0_28 = arith.constant 0 : index
    %c0_29 = arith.constant 0 : index
    %30 = vector.load %arg4[%c0_26, %c1_27, %c0_28, %c0_29] : memref<3x3x8x8xf32, #tpu.memory_space<vmem>>, vector<1x1x8x8xf32>
    %31 = vector.shape_cast %30 : vector<1x1x8x8xf32> to vector<8x8xf32>
    %cst_30 = arith.constant dense<0.000000e+00> : vector<256x8xf32>
    %32 = tpu.matmul %29, %31, %cst_30 {dimension_numbers = #tpu.dot_dimension_numbers<[1], [0], [0], [1], [0, 0, 1, 1], [], []>} : vector<256x8xf32>, vector<8x8xf32>, vector<256x8xf32> -> vector<256x8xf32>
    %33 = arith.addf %27, %32 : vector<256x8xf32>
    %c0_31 = arith.constant 0 : index
    %c2 = arith.constant 2 : index
    %c0_32 = arith.constant 0 : index
    %34 = vector.load %arg9[%c0_31, %c2, %c0_32] : memref<18x18x8xf32, #tpu.memory_space<vmem>>, vector<16x16x8xf32>
    %35 = vector.shape_cast %34 : vector<16x16x8xf32> to vector<256x8xf32>
    %c0_33 = arith.constant 0 : index
    %c2_34 = arith.constant 2 : index
    %c0_35 = arith.constant 0 : index
    %c0_36 = arith.constant 0 : index
    %36 = vector.load %arg4[%c0_33, %c2_34, %c0_35, %c0_36] : memref<3x3x8x8xf32, #tpu.memory_space<vmem>>, vector<1x1x8x8xf32>
    %37 = vector.shape_cast %36 : vector<1x1x8x8xf32> to vector<8x8xf32>
    %cst_37 = arith.constant dense<0.000000e+00> : vector<256x8xf32>
    %38 = tpu.matmul %35, %37, %cst_37 {dimension_numbers = #tpu.dot_dimension_numbers<[1], [0], [0], [1], [0, 0, 1, 1], [], []>} : vector<256x8xf32>, vector<8x8xf32>, vector<256x8xf32> -> vector<256x8xf32>
    %39 = arith.addf %33, %38 : vector<256x8xf32>
    %c1_38 = arith.constant 1 : index
    %c0_39 = arith.constant 0 : index
    %c0_40 = arith.constant 0 : index
    %40 = vector.load %arg9[%c1_38, %c0_39, %c0_40] : memref<18x18x8xf32, #tpu.memory_space<vmem>>, vector<16x16x8xf32>
    %41 = vector.shape_cast %40 : vector<16x16x8xf32> to vector<256x8xf32>
    %c1_41 = arith.constant 1 : index
    %c0_42 = arith.constant 0 : index
    %c0_43 = arith.constant 0 : index
    %c0_44 = arith.constant 0 : index
    %42 = vector.load %arg4[%c1_41, %c0_42, %c0_43, %c0_44] : memref<3x3x8x8xf32, #tpu.memory_space<vmem>>, vector<1x1x8x8xf32>
    %43 = vector.shape_cast %42 : vector<1x1x8x8xf32> to vector<8x8xf32>
    %cst_45 = arith.constant dense<0.000000e+00> : vector<256x8xf32>
    %44 = tpu.matmul %41, %43, %cst_45 {dimension_numbers = #tpu.dot_dimension_numbers<[1], [0], [0], [1], [0, 0, 1, 1], [], []>} : vector<256x8xf32>, vector<8x8xf32>, vector<256x8xf32> -> vector<256x8xf32>
    %45 = arith.addf %39, %44 : vector<256x8xf32>
    %c1_46 = arith.constant 1 : index
    %c1_47 = arith.constant 1 : index
    %c0_48 = arith.constant 0 : index
    %46 = vector.load %arg9[%c1_46, %c1_47, %c0_48] : memref<18x18x8xf32, #tpu.memory_space<vmem>>, vector<16x16x8xf32>
    %47 = vector.shape_cast %46 : vector<16x16x8xf32> to vector<256x8xf32>
    %c1_49 = arith.constant 1 : index
    %c1_50 = arith.constant 1 : index
    %c0_51 = arith.constant 0 : index
    %c0_52 = arith.constant 0 : index
    %48 = vector.load %arg4[%c1_49, %c1_50, %c0_51, %c0_52] : memref<3x3x8x8xf32, #tpu.memory_space<vmem>>, vector<1x1x8x8xf32>
    %49 = vector.shape_cast %48 : vector<1x1x8x8xf32> to vector<8x8xf32>
    %cst_53 = arith.constant dense<0.000000e+00> : vector<256x8xf32>
    %50 = tpu.matmul %47, %49, %cst_53 {dimension_numbers = #tpu.dot_dimension_numbers<[1], [0], [0], [1], [0, 0, 1, 1], [], []>} : vector<256x8xf32>, vector<8x8xf32>, vector<256x8xf32> -> vector<256x8xf32>
    %51 = arith.addf %45, %50 : vector<256x8xf32>
    %c1_54 = arith.constant 1 : index
    %c2_55 = arith.constant 2 : index
    %c0_56 = arith.constant 0 : index
    %52 = vector.load %arg9[%c1_54, %c2_55, %c0_56] : memref<18x18x8xf32, #tpu.memory_space<vmem>>, vector<16x16x8xf32>
    %53 = vector.shape_cast %52 : vector<16x16x8xf32> to vector<256x8xf32>
    %c1_57 = arith.constant 1 : index
    %c2_58 = arith.constant 2 : index
    %c0_59 = arith.constant 0 : index
    %c0_60 = arith.constant 0 : index
    %54 = vector.load %arg4[%c1_57, %c2_58, %c0_59, %c0_60] : memref<3x3x8x8xf32, #tpu.memory_space<vmem>>, vector<1x1x8x8xf32>
    %55 = vector.shape_cast %54 : vector<1x1x8x8xf32> to vector<8x8xf32>
    %cst_61 = arith.constant dense<0.000000e+00> : vector<256x8xf32>
    %56 = tpu.matmul %53, %55, %cst_61 {dimension_numbers = #tpu.dot_dimension_numbers<[1], [0], [0], [1], [0, 0, 1, 1], [], []>} : vector<256x8xf32>, vector<8x8xf32>, vector<256x8xf32> -> vector<256x8xf32>
    %57 = arith.addf %51, %56 : vector<256x8xf32>
    %c2_62 = arith.constant 2 : index
    %c0_63 = arith.constant 0 : index
    %c0_64 = arith.constant 0 : index
    %58 = vector.load %arg9[%c2_62, %c0_63, %c0_64] : memref<18x18x8xf32, #tpu.memory_space<vmem>>, vector<16x16x8xf32>
    %59 = vector.shape_cast %58 : vector<16x16x8xf32> to vector<256x8xf32>
    %c2_65 = arith.constant 2 : index
    %c0_66 = arith.constant 0 : index
    %c0_67 = arith.constant 0 : index
    %c0_68 = arith.constant 0 : index
    %60 = vector.load %arg4[%c2_65, %c0_66, %c0_67, %c0_68] : memref<3x3x8x8xf32, #tpu.memory_space<vmem>>, vector<1x1x8x8xf32>
    %61 = vector.shape_cast %60 : vector<1x1x8x8xf32> to vector<8x8xf32>
    %cst_69 = arith.constant dense<0.000000e+00> : vector<256x8xf32>
    %62 = tpu.matmul %59, %61, %cst_69 {dimension_numbers = #tpu.dot_dimension_numbers<[1], [0], [0], [1], [0, 0, 1, 1], [], []>} : vector<256x8xf32>, vector<8x8xf32>, vector<256x8xf32> -> vector<256x8xf32>
    %63 = arith.addf %57, %62 : vector<256x8xf32>
    %c2_70 = arith.constant 2 : index
    %c1_71 = arith.constant 1 : index
    %c0_72 = arith.constant 0 : index
    %64 = vector.load %arg9[%c2_70, %c1_71, %c0_72] : memref<18x18x8xf32, #tpu.memory_space<vmem>>, vector<16x16x8xf32>
    %65 = vector.shape_cast %64 : vector<16x16x8xf32> to vector<256x8xf32>
    %c2_73 = arith.constant 2 : index
    %c1_74 = arith.constant 1 : index
    %c0_75 = arith.constant 0 : index
    %c0_76 = arith.constant 0 : index
    %66 = vector.load %arg4[%c2_73, %c1_74, %c0_75, %c0_76] : memref<3x3x8x8xf32, #tpu.memory_space<vmem>>, vector<1x1x8x8xf32>
    %67 = vector.shape_cast %66 : vector<1x1x8x8xf32> to vector<8x8xf32>
    %cst_77 = arith.constant dense<0.000000e+00> : vector<256x8xf32>
    %68 = tpu.matmul %65, %67, %cst_77 {dimension_numbers = #tpu.dot_dimension_numbers<[1], [0], [0], [1], [0, 0, 1, 1], [], []>} : vector<256x8xf32>, vector<8x8xf32>, vector<256x8xf32> -> vector<256x8xf32>
    %69 = arith.addf %63, %68 : vector<256x8xf32>
    %c2_78 = arith.constant 2 : index
    %c2_79 = arith.constant 2 : index
    %c0_80 = arith.constant 0 : index
    %70 = vector.load %arg9[%c2_78, %c2_79, %c0_80] : memref<18x18x8xf32, #tpu.memory_space<vmem>>, vector<16x16x8xf32>
    %71 = vector.shape_cast %70 : vector<16x16x8xf32> to vector<256x8xf32>
    %c2_81 = arith.constant 2 : index
    %c2_82 = arith.constant 2 : index
    %c0_83 = arith.constant 0 : index
    %c0_84 = arith.constant 0 : index
    %72 = vector.load %arg4[%c2_81, %c2_82, %c0_83, %c0_84] : memref<3x3x8x8xf32, #tpu.memory_space<vmem>>, vector<1x1x8x8xf32>
    %73 = vector.shape_cast %72 : vector<1x1x8x8xf32> to vector<8x8xf32>
    %cst_85 = arith.constant dense<0.000000e+00> : vector<256x8xf32>
    %74 = tpu.matmul %71, %73, %cst_85 {dimension_numbers = #tpu.dot_dimension_numbers<[1], [0], [0], [1], [0, 0, 1, 1], [], []>} : vector<256x8xf32>, vector<8x8xf32>, vector<256x8xf32> -> vector<256x8xf32>
    %75 = arith.addf %69, %74 : vector<256x8xf32>
    %76 = vector.shape_cast %75 : vector<256x8xf32> to vector<1x16x16x8xf32>
    %c0_86 = arith.constant 0 : index
    %c0_87 = arith.constant 0 : index
    %c0_88 = arith.constant 0 : index
    %c0_89 = arith.constant 0 : index
    %77 = vector.load %arg6[%c0_86, %c0_87, %c0_88, %c0_89] : memref<1x16x16x8xf32, #tpu.memory_space<vmem>>, vector<1x16x16x8xf32>
    tpu.vector_store %arg6[%c0_86, %c0_87, %c0_88, %c0_89], %76 {strides = array<i32>} : memref<1x16x16x8xf32, #tpu.memory_space<vmem>>, vector<1x16x16x8xf32>,
    %cst_90 = arith.constant dense<0.000000e+00> : vector<8xf32>
    %78 = vector.multi_reduction <add>, %75, %cst_90 [0] : vector<256x8xf32> to vector<8xf32>
    %79 = vector.shape_cast %78 : vector<8xf32> to vector<1x1x8xf32>
    %c0_91 = arith.constant 0 : index
    %c0_92 = arith.constant 0 : index
    %c0_93 = arith.constant 0 : index
    %80 = vector.load %arg7[%c0_91, %c0_92, %c0_93] : memref<1x1x8xf32, #tpu.memory_space<vmem>>, vector<1x1x8xf32>
    tpu.vector_store %arg7[%c0_91, %c0_92, %c0_93], %79 {strides = array<i32>} : memref<1x1x8xf32, #tpu.memory_space<vmem>>, vector<1x1x8xf32>,
    %81 = arith.mulf %75, %75 : vector<256x8xf32>
    %cst_94 = arith.constant dense<0.000000e+00> : vector<8xf32>
    %82 = vector.multi_reduction <add>, %81, %cst_94 [0] : vector<256x8xf32> to vector<8xf32>
    %83 = vector.shape_cast %82 : vector<8xf32> to vector<1x1x8xf32>
    %c0_95 = arith.constant 0 : index
    %c0_96 = arith.constant 0 : index
    %c0_97 = arith.constant 0 : index
    %84 = vector.load %arg8[%c0_95, %c0_96, %c0_97] : memref<1x1x8xf32, #tpu.memory_space<vmem>>, vector<1x1x8xf32>
    tpu.vector_store %arg8[%c0_95, %c0_96, %c0_97], %83 {strides = array<i32>} : memref<1x1x8xf32, #tpu.memory_space<vmem>>, vector<1x1x8xf32>,
    return
  }
  func.func @transform_0(%arg0: i32) -> (i32, i32, i32, i32) {
    %c0_i32 = arith.constant 0 : i32
    %c0_i32_0 = arith.constant 0 : i32
    %c0_i32_1 = arith.constant 0 : i32
    %c0_i32_2 = arith.constant 0 : i32
    return %arg0, %c0_i32, %c0_i32_0, %c0_i32_1 : i32, i32, i32, i32
  }
  func.func @transform_1(%arg0: i32) -> (i32, i32) {
    %c0_i32 = arith.constant 0 : i32
    %c0_i32_0 = arith.constant 0 : i32
    %c0_i32_1 = arith.constant 0 : i32
    return %c0_i32, %c0_i32_0 : i32, i32
  }
  func.func @transform_2(%arg0: i32) -> (i32, i32) {
    %c0_i32 = arith.constant 0 : i32
    %c0_i32_0 = arith.constant 0 : i32
    %c0_i32_1 = arith.constant 0 : i32
    return %c0_i32, %c0_i32_0 : i32, i32
  }
  func.func @transform_3(%arg0: i32) -> (i32, i32, i32, i32) {
    %c0_i32 = arith.constant 0 : i32
    %c0_i32_0 = arith.constant 0 : i32
    %c0_i32_1 = arith.constant 0 : i32
    %c0_i32_2 = arith.constant 0 : i32
    %c0_i32_3 = arith.constant 0 : i32
    return %c0_i32, %c0_i32_0, %c0_i32_1, %c0_i32_2 : i32, i32, i32, i32
  }
  func.func @transform_4(%arg0: i32) -> (i32, i32) {
    %c0_i32 = arith.constant 0 : i32
    %c0_i32_0 = arith.constant 0 : i32
    %c0_i32_1 = arith.constant 0 : i32
    return %c0_i32, %c0_i32_0 : i32, i32
  }
  func.func @transform_5(%arg0: i32) -> (i32, i32, i32, i32) {
    %c0_i32 = arith.constant 0 : i32
    %c0_i32_0 = arith.constant 0 : i32
    %c0_i32_1 = arith.constant 0 : i32
    %c0_i32_2 = arith.constant 0 : i32
    return %arg0, %c0_i32, %c0_i32_0, %c0_i32_1 : i32, i32, i32, i32
  }
  func.func @transform_6(%arg0: i32) -> (i32, i32, i32) {
    %c0_i32 = arith.constant 0 : i32
    %c0_i32_0 = arith.constant 0 : i32
    %c0_i32_1 = arith.constant 0 : i32
    return %arg0, %c0_i32, %c0_i32_0 : i32, i32, i32
  }
  func.func @transform_7(%arg0: i32) -> (i32, i32, i32) {
    %c0_i32 = arith.constant 0 : i32
    %c0_i32_0 = arith.constant 0 : i32
    %c0_i32_1 = arith.constant 0 : i32
    return %arg0, %c0_i32, %c0_i32_0 : i32, i32, i32
  }
}

</mosaic_0001>

<bundles_post_ra>
// kernel: conv_block_forward.5
= control target key start
LH: loop header
LB: loop body
LE: loop exit
PB: predicated region body
PF: predicated region fallthrough
CT: control target
= control target key end

     0   :  { %s446_s12 = smov 0   ;;  %s637_s0 = inlined_call_operand.vmem [shape: f32[2,16,16,8], index: 0, kind: input, shape index: {}]   ;;  %s638_s1 = inlined_call_operand.vmem [shape: f32[1,8], index: 1, kind: input, shape index: {}]   ;;  %s639_s2 = inlined_call_operand.vmem [shape: f32[1,8], index: 2, kind: input, shape index: {}]   ;;  %s640_s3 = inlined_call_operand.vmem [shape: f32[2,16,16,8], index: 3, kind: output, shape index: {}]  }
   0x1 LB: > { %s395_s13 = sadd.s32 4294967295, %s424_s12   ;;  %p399_p0 = scmp.ge.s32.totalorder %s424_s12, 1  ;;  %s424_s12 = sphi %s446_s12, %s13_s12  }
   0x2   : > { %p137_p1 = scmp.lt.s32.totalorder %s424_s12, 3 }
   0x4   : > { %p138_p2 = pnand %p399_p0, %p137_p1 }
   0x5   : > { %p161_p3 = scmp.lt.s32.totalorder (!%p138_p2), %s395_s13, 1 }
   0x6   : > { %141 = sbr.rel (%p138_p2) target bundleno = 53 (0x35), region = 32 }
   0xb   : > { %s642_s13 = smov (!%p161_p3, %s395_s13), 1  ;;  %v457_v0 = vld [vmem:[%s638_s1] ss:$0 sm:$0xff]  ;;  %vm307_vm0 = vcmask 64512  }
   0xc   : > { %s406_s16 = sshll.u32 %s642_s13, 8  ;;  %v467_v1 = vld [vmem:[%s639_s2] ss:$0 sm:$0xff] }
   0xd   : > { %s462_s19 = scalar_lea.vmem %s637_s0, %s406_s16  ;;  %s490_s24 = scalar_lea.vmem %s640_s3, %s406_s16 }
   0xe   : > { %v171_v2 = vld [vmem:[%s462_s19] sm:$0xff]  ;;  %v172_v3 = vld [vmem:[%s462_s19 + $0x8] sm:$0xff]  ;;  %v173_v4 = vld [vmem:[%s462_s19 + $0x10] sm:$0xff] }
   0xf   : > { %v207_v5 = vmul.f32 %v457_v0, %v171_v2  ;;  %v208_v6 = vmul.f32 %v457_v0, %v172_v3  ;;  %v209_v7 = vmul.f32 %v457_v0, %v173_v4  ;;  %v174_v8 = vld [vmem:[%s462_s19 + $0x18] sm:$0xff]  ;;  %v175_v9 = vld [vmem:[%s462_s19 + $0x20] sm:$0xff]  ;;  %v176_v10 = vld [vmem:[%s462_s19 + $0x28] sm:$0xff] }
  0x10   : > { %v210_v11 = vmul.f32 %v457_v0, %v174_v8  ;;  %v211_v12 = vmul.f32 %v457_v0, %v175_v9  ;;  %v212_v13 = vmul.f32 %v457_v0, %v176_v10  ;;  %v177_v14 = vld [vmem:[%s462_s19 + $0x30] sm:$0xff]  ;;  %v178_v15 = vld [vmem:[%s462_s19 + $0x38] sm:$0xff]  ;;  %v179_v24 = vld [vmem:[%s462_s19 + $0x40] sm:$0xff] }
  0x11   : > { %v243_v16 = vadd.f32 %v467_v1, %v207_v5  ;;  %v244_v17 = vadd.f32 %v467_v1, %v208_v6  ;;  %v245_v18 = vadd.f32 %v467_v1, %v209_v7  ;;  %v213_v19 = vmul.f32 %v457_v0, %v177_v14  ;;  %v180_v25 = vld [vmem:[%s462_s19 + $0x48] sm:$0xff]  ;;  %v181_v26 = vld [vmem:[%s462_s19 + $0x50] sm:$0xff]  ;;  %v182_v31 = vld [vmem:[%s462_s19 + $0x58] sm:$0xff] }
  0x12   : > { %v246_v20 = vadd.f32 %v467_v1, %v210_v11  ;;  %v247_v21 = vadd.f32 %v467_v1, %v211_v12  ;;  %v248_v22 = vadd.f32 %v467_v1, %v212_v13  ;;  %v214_v23 = vmul.f32 %v457_v0, %v178_v15  ;;  %v183_v32 = vld [vmem:[%s462_s19 + $0x60] sm:$0xff]  ;;  %v184_v33 = vld [vmem:[%s462_s19 + $0x68] sm:$0xff]  ;;  %v185_v37 = vld [vmem:[%s462_s19 + $0x70] sm:$0xff] }
  0x13   : > { %v275_v27 = vmax.f32 %v243_v16, 0.0  ;;  %v276_v28 = vmax.f32 %v244_v17, 0.0  ;;  %v277_v29 = vmax.f32 %v245_v18, 0.0  ;;  %v249_v30 = vadd.f32 %v467_v1, %v213_v19  ;;  %v186_v42 = vld [vmem:[%s462_s19 + $0x78] sm:$0xff]  ;;  %v187_v54 = vld [vmem:[%s462_s19 + $0x80] sm:$0xff]  ;;  %v188_v55 = vld [vmem:[%s462_s19 + $0x88] sm:$0xff] }
  0x14   : > { %v278_v34 = vmax.f32 %v246_v20, 0.0  ;;  %v279_v35 = vmax.f32 %v247_v21, 0.0  ;;  %v250_v36 = vadd.f32 %v467_v1, %v214_v23  ;;  %v280_v38 = vmax.f32 %v248_v22, 0.0  ;;  %v189_v56 = vld [vmem:[%s462_s19 + $0x90] sm:$0xff]  ;;  %v190_v59 = vld [vmem:[%s462_s19 + $0x98] sm:$0xff]  ;;  %v191_v63 = vld [vmem:[%s462_s19 + $0xa0] sm:$0xff] }
  0x15   : > { %308 = vst.msk [vmem:[%s490_s24] sm:$0xff] %vm307_vm0, %v275_v27  ;;  %v215_v39 = vmul.f32 %v457_v0, %v179_v24  ;;  %v216_v40 = vmul.f32 %v457_v0, %v180_v25  ;;  %v217_v41 = vmul.f32 %v457_v0, %v181_v26  ;;  %v281_v43 = vmax.f32 %v249_v30, 0.0  ;;  %v192_v6 = vld [vmem:[%s462_s19 + $0xa8] sm:$0xff]  ;;  %v193_v10 = vld [vmem:[%s462_s19 + $0xb0] sm:$0xff]  ;;  %v194_v14 = vld [vmem:[%s462_s19 + $0xb8] sm:$0xff] }
  0x16   : > { %309 = vst.msk [vmem:[%s490_s24 + $0x8] sm:$0xff] %vm307_vm0, %v276_v28  ;;  %v218_v44 = vmul.f32 %v457_v0, %v182_v31  ;;  %v219_v45 = vmul.f32 %v457_v0, %v183_v32  ;;  %v220_v46 = vmul.f32 %v457_v0, %v184_v33  ;;  %v221_v50 = vmul.f32 %v457_v0, %v185_v37  ;;  %v195_v18 = vld [vmem:[%s462_s19 + $0xc0] sm:$0xff]  ;;  %v196_v22 = vld [vmem:[%s462_s19 + $0xc8] sm:$0xff]  ;;  %v197_v26 = vld [vmem:[%s462_s19 + $0xd0] sm:$0xff] }
  0x17   : > { %310 = vst.msk [vmem:[%s490_s24 + $0x10] sm:$0xff] %vm307_vm0, %v277_v29  ;;  %v251_v47 = vadd.f32 %v467_v1, %v215_v39  ;;  %v252_v48 = vadd.f32 %v467_v1, %v216_v40  ;;  %v253_v49 = vadd.f32 %v467_v1, %v217_v41  ;;  %v282_v51 = vmax.f32 %v250_v36, 0.0  ;;  %v198_v30 = vld [vmem:[%s462_s19 + $0xd8] sm:$0xff] }
  0x18   : > { %311 = vst.msk [vmem:[%s490_s24 + $0x18] sm:$0xff] %vm307_vm0, %v278_v34  ;;  %v254_v52 = vadd.f32 %v467_v1, %v218_v44  ;;  %v222_v53 = vmul.f32 %v457_v0, %v186_v42  ;;  %v255_v58 = vadd.f32 %v467_v1, %v219_v45  ;;  %v256_v62 = vadd.f32 %v467_v1, %v220_v46  ;;  %v199_v34 = vld [vmem:[%s462_s19 + $0xe0] sm:$0xff]  ;;  %v201_v42 = vld [vmem:[%s462_s19 + $0xf0] sm:$0xff]  ;;  %v202_v46 = vld [vmem:[%s462_s19 + $0xf8] sm:$0xff] }
  0x19   : > { %312 = vst.msk [vmem:[%s490_s24 + $0x20] sm:$0xff] %vm307_vm0, %v279_v35  ;;  %v283_v57 = vmax.f32 %v251_v47, 0.0  ;;  %v284_v60 = vmax.f32 %v252_v48, 0.0  ;;  %v285_v61 = vmax.f32 %v253_v49, 0.0  ;;  %v257_v2 = vadd.f32 %v467_v1, %v221_v50 }
  0x1a   : > { %313 = vst.msk [vmem:[%s490_s24 + $0x28] sm:$0xff] %vm307_vm0, %v280_v38  ;;  %v223_v3 = vmul.f32 %v457_v0, %v187_v54  ;;  %v224_v4 = vmul.f32 %v457_v0, %v188_v55  ;;  %v225_v5 = vmul.f32 %v457_v0, %v189_v56  ;;  %v286_v7 = vmax.f32 %v254_v52, 0.0  ;;  %v200_v38 = vld [vmem:[%s462_s19 + $0xe8] sm:$0xff] }
  0x1b   : > { %314 = vst.msk [vmem:[%s490_s24 + $0x30] sm:$0xff] %vm307_vm0, %v281_v43  ;;  %v258_v8 = vadd.f32 %v467_v1, %v222_v53  ;;  %v226_v9 = vmul.f32 %v457_v0, %v190_v59  ;;  %v287_v11 = vmax.f32 %v255_v58, 0.0  ;;  %v227_v13 = vmul.f32 %v457_v0, %v191_v63 }
  0x1c   : > { %315 = vst.msk [vmem:[%s490_s24 + $0x38] sm:$0xff] %vm307_vm0, %v282_v51  ;;  %v259_v12 = vadd.f32 %v467_v1, %v223_v3  ;;  %v288_v15 = vmax.f32 %v256_v62, 0.0  ;;  %v260_v16 = vadd.f32 %v467_v1, %v224_v4  ;;  %v228_v17 = vmul.f32 %v457_v0, %v192_v6 }
  0x1d   : > { %316 = vst.msk [vmem:[%s490_s24 + $0x40] sm:$0xff] %vm307_vm0, %v283_v57  ;;  %v289_v19 = vmax.f32 %v257_v2, 0.0  ;;  %v261_v20 = vadd.f32 %v467_v1, %v225_v5  ;;  %v229_v21 = vmul.f32 %v457_v0, %v193_v10  ;;  %v290_v23 = vmax.f32 %v258_v8, 0.0 }
  0x1e   : > { %317 = vst.msk [vmem:[%s490_s24 + $0x48] sm:$0xff] %vm307_vm0, %v284_v60  ;;  %v262_v24 = vadd.f32 %v467_v1, %v226_v9  ;;  %v230_v25 = vmul.f32 %v457_v0, %v194_v14  ;;  %v291_v27 = vmax.f32 %v259_v12, 0.0  ;;  %v263_v28 = vadd.f32 %v467_v1, %v227_v13 }
  0x1f   : > { %318 = vst.msk [vmem:[%s490_s24 + $0x50] sm:$0xff] %vm307_vm0, %v285_v61  ;;  %v231_v29 = vmul.f32 %v457_v0, %v195_v18  ;;  %v292_v31 = vmax.f32 %v260_v16, 0.0  ;;  %v264_v32 = vadd.f32 %v467_v1, %v228_v17  ;;  %v232_v33 = vmul.f32 %v457_v0, %v196_v22 }
  0x20   : > { %319 = vst.msk [vmem:[%s490_s24 + $0x58] sm:$0xff] %vm307_vm0, %v286_v7  ;;  %v293_v35 = vmax.f32 %v261_v20, 0.0  ;;  %v265_v36 = vadd.f32 %v467_v1, %v229_v21  ;;  %v233_v37 = vmul.f32 %v457_v0, %v197_v26  ;;  %v294_v39 = vmax.f32 %v262_v24, 0.0 }
  0x21   : > { %320 = vst.msk [vmem:[%s490_s24 + $0x60] sm:$0xff] %vm307_vm0, %v287_v11  ;;  %v266_v40 = vadd.f32 %v467_v1, %v230_v25  ;;  %v234_v41 = vmul.f32 %v457_v0, %v198_v30  ;;  %v295_v43 = vmax.f32 %v263_v28, 0.0  ;;  %v267_v44 = vadd.f32 %v467_v1, %v231_v29 }
  0x22   : > { %321 = vst.msk [vmem:[%s490_s24 + $0x68] sm:$0xff] %vm307_vm0, %v288_v15  ;;  %v235_v45 = vmul.f32 %v457_v0, %v199_v34  ;;  %v296_v47 = vmax.f32 %v264_v32, 0.0  ;;  %v268_v48 = vadd.f32 %v467_v1, %v232_v33  ;;  %v236_v49 = vmul.f32 %v457_v0, %v200_v38 }
  0x23   : > { %322 = vst.msk [vmem:[%s490_s24 + $0x70] sm:$0xff] %vm307_vm0, %v289_v19  ;;  %v297_v50 = vmax.f32 %v265_v36, 0.0  ;;  %v269_v51 = vadd.f32 %v467_v1, %v233_v37  ;;  %v237_v52 = vmul.f32 %v457_v0, %v201_v42  ;;  %v298_v53 = vmax.f32 %v266_v40, 0.0 }
  0x24   : > { %323 = vst.msk [vmem:[%s490_s24 + $0x78] sm:$0xff] %vm307_vm0, %v290_v23  ;;  %v270_v54 = vadd.f32 %v467_v1, %v234_v41  ;;  %v238_v55 = vmul.f32 %v457_v0, %v202_v46  ;;  %v299_v56 = vmax.f32 %v267_v44, 0.0  ;;  %v271_v57 = vadd.f32 %v467_v1, %v235_v45 }
  0x25   : > { %324 = vst.msk [vmem:[%s490_s24 + $0x80] sm:$0xff] %vm307_vm0, %v291_v27  ;;  %v300_v58 = vmax.f32 %v268_v48, 0.0  ;;  %v272_v59 = vadd.f32 %v467_v1, %v236_v49  ;;  %v301_v60 = vmax.f32 %v269_v51, 0.0  ;;  %v273_v0 = vadd.f32 %v467_v1, %v237_v52 }
  0x26   : > { %325 = vst.msk [vmem:[%s490_s24 + $0x88] sm:$0xff] %vm307_vm0, %v292_v31  ;;  %v302_v61 = vmax.f32 %v270_v54, 0.0  ;;  %v274_v62 = vadd.f32 %v467_v1, %v238_v55  ;;  %v303_v63 = vmax.f32 %v271_v57, 0.0 }
  0x27   : > { %326 = vst.msk [vmem:[%s490_s24 + $0x90] sm:$0xff] %vm307_vm0, %v293_v35  ;;  %v304_v2 = vmax.f32 %v272_v59, 0.0  ;;  %v305_v3 = vmax.f32 %v273_v0, 0.0 }
  0x28   : > { %327 = vst.msk [vmem:[%s490_s24 + $0x98] sm:$0xff] %vm307_vm0, %v294_v39  ;;  %v306_v4 = vmax.f32 %v274_v62, 0.0 }
  0x29   : > { %328 = vst.msk [vmem:[%s490_s24 + $0xa0] sm:$0xff] %vm307_vm0, %v295_v43 }
  0x2a   : > { %329 = vst.msk [vmem:[%s490_s24 + $0xa8] sm:$0xff] %vm307_vm0, %v296_v47 }
  0x2b   : > { %330 = vst.msk [vmem:[%s490_s24 + $0xb0] sm:$0xff] %vm307_vm0, %v297_v50 }
  0x2c   : > { %331 = vst.msk [vmem:[%s490_s24 + $0xb8] sm:$0xff] %vm307_vm0, %v298_v53 }
  0x2d   : > { %332 = vst.msk [vmem:[%s490_s24 + $0xc0] sm:$0xff] %vm307_vm0, %v299_v56 }
  0x2e   : > { %333 = vst.msk [vmem:[%s490_s24 + $0xc8] sm:$0xff] %vm307_vm0, %v300_v58 }
  0x2f   : > { %334 = vst.msk [vmem:[%s490_s24 + $0xd0] sm:$0xff] %vm307_vm0, %v301_v60 }
  0x30   : > { %335 = vst.msk [vmem:[%s490_s24 + $0xd8] sm:$0xff] %vm307_vm0, %v302_v61 }
  0x31   : > { %336 = vst.msk [vmem:[%s490_s24 + $0xe0] sm:$0xff] %vm307_vm0, %v303_v63 }
  0x32   : > { %337 = vst.msk [vmem:[%s490_s24 + $0xe8] sm:$0xff] %vm307_vm0, %v304_v2 }
  0x33   : > { %338 = vst.msk [vmem:[%s490_s24 + $0xf0] sm:$0xff] %vm307_vm0, %v305_v3 }
  0x34   : > { %339 = vst.msk [vmem:[%s490_s24 + $0xf8] sm:$0xff] %vm307_vm0, %v306_v4 }
  0x35 PF: > { %s13_s12 = sadd.s32 1, %s424_s12  }
  0x36   : > { %p10_p4 = scmp.ge.s32.totalorder %s13_s12, 4  }
  0x38   :  { %12 = sbr.rel (!%p10_p4) target bundleno = 1 (0x1), region = 62 }

// kernel: conv_block_forward.3
= control target key start
LH: loop header
LB: loop body
LE: loop exit
PB: predicated region body
PF: predicated region fallthrough
CT: control target
= control target key end

     0   :  { %s3615_s24 = smov 0   ;;  %s4867_s0 = inlined_call_operand.vmem [shape: f32[2,16,16,4], index: 0, kind: input, shape index: {}]   ;;  %s4868_s1 = inlined_call_operand.vmem [shape: f32[1,4], index: 1, kind: input, shape index: {}]   ;;  %s4869_s2 = inlined_call_operand.vmem [shape: f32[1,4], index: 2, kind: input, shape index: {}]   ;;  %s4870_s3 = inlined_call_operand.vmem [shape: f32[3,3,4,8], index: 3, kind: input, shape index: {}]   ;;  %s4871_s4 = inlined_call_operand.vmem [shape: f32[1,8], index: 4, kind: input, shape index: {}]   ;;  %s4872_s5 = inlined_call_operand.vmem [shape: f32[2,16,16,8], index: 5, kind: output, shape index: {0}]   ;;  %s4873_s6 = inlined_call_operand.vmem [shape: f32[2,1,8], index: 6, kind: output, shape index: {1}]   ;;  %s4874_s7 = inlined_call_operand.vmem [shape: f32[2,1,8], index: 7, kind: output, shape index: {2}]  }
   0x1 LB: > { %s3235_s1 = sadd.s32 4294967295, %s3572_s24   ;;  %p3239_p0 = scmp.ge.s32.totalorder %s3572_s24, 1  ;;  %s3572_s24 = sphi %s3615_s24, %s18_s24  }
   0x2   : > { %p242_p1 = scmp.lt.s32.totalorder %s3572_s24, 3 }
   0x4   : > { %p243_p2 = pnand %p3239_p0, %p242_p1 }
   0x6   : > { %246 = sbr.rel (%p243_p2) target bundleno = 794 (0x31a), region = 40 }
   0xb   : > { %v453_v0 = vld [vmem:[%s4870_s3] sm:$0xf]  ;;  %vm550_vm0 = vcmask 1043456   ;;  %p280_p3 = scmp.lt.s32.totalorder %s3235_s1, 1  ;;  %vm328_vm1 = vcmask 31744   ;;  %v3574_v1 = vmov 0.0  }
   0xc   : > { %3553 = vmatpush.msk.msra.mxu1 %vm550_vm0, %v453_v0  ;;  %3554 = vmatpush.msk.msra.mxu2 %vm550_vm0, %v453_v0  ;;  %342 = vst.msk [vmem:[#allocation2 + $0x60] sm:$0xff] %vm328_vm1, %v3574_v1  ;;  %v3311_v4 = vld [vmem:[%s4870_s3 + $0x8] sm:$0xf]  ;;  %v3345_v5 = vld [vmem:[%s4870_s3 + $0xc] sm:$0xf]  ;;  %vm331_vm2 = vcmask 25600  }
   0xd   : > { %s4989_s1 = smov (!%p280_p3, %s3235_s1), 1  ;;  %343 = vst.msk [vmem:[#allocation2 + $0x68] sm:$0xff] %vm328_vm1, %v3574_v1  ;;  %3555 = vmatpush.msk.msra.mxu3 %vm550_vm0, %v453_v0  ;;  %3244 = vmatpush.msk.msra.mxu0 %vm550_vm0, %v453_v0  ;;  %v3277_v6 = vld [vmem:[%s4870_s3 + $0x4] sm:$0xf]  ;;  %v3379_v10 = vld [vmem:[%s4870_s3 + $0x10] sm:$0xf] }
   0xe   : > { %329 = vst.msk [vmem:[#allocation2] sm:$0xff] %vm328_vm1, %v3574_v1  ;;  %s3551_s26 = sshll.u32 %s4989_s1, 8  ;;  %3312 = vmatpush.msk.msrb.mxu2 %vm550_vm0, %v3311_v4  ;;  %3278 = vmatpush.msk.msrb.mxu1 %vm550_vm0, %v3277_v6  ;;  %v3447_v57 = vld [vmem:[%s4870_s3 + $0x18] sm:$0xf]  ;;  %v3481_v58 = vld [vmem:[%s4870_s3 + $0x1c] sm:$0xf]  ;;  %s292_s30 = scalar_lea.vmem %s4873_s6, %s4989_s1 }
   0xf   : > { %330 = vst.msk [vmem:[#allocation2 + $0x8] sm:$0xff] %vm328_vm1, %v3574_v1  ;;  %s3646_s29 = scalar_lea.vmem %s4867_s0, %s3551_s26  ;;  %3346 = vmatpush.msk.msrb.mxu3 %vm550_vm0, %v3345_v5  ;;  %3380 = vmatpush.msk.msrb.mxu0 %vm550_vm0, %v3379_v10  ;;  %v3413_v59 = vld [vmem:[%s4870_s3 + $0x14] sm:$0xf]  ;;  %v3515_v0 = vld [vmem:[%s4870_s3 + $0x20] sm:$0xf]  ;;  %s4620_s28 = scalar_lea.vmem %s4872_s5, %s3551_s26  ;;  %vm2924_vm3 = vcmask 64512  }
  0x10   : > { %333 = vst.msk [vmem:[#allocation2 + $0x18] sm:$0xff] %vm328_vm1, %v3574_v1  ;;  %v302_v2 = vld [vmem:[%s3646_s29 + $0x30] sm:$0xff]  ;;  %v303_v11 = vld [vmem:[%s3646_s29 + $0x38] sm:$0xff]  ;;  %v304_v18 = vld [vmem:[%s3646_s29 + $0x40] sm:$0xff]  ;;  %vm3026_vm4 = vcmask 57344   ;;  %s295_s10 = scalar_lea.vmem %s4874_s7, %s4989_s1 }
  0x11   : > { %334 = vst.msk [vmem:[#allocation2 + $0x20] sm:$0xff] %vm328_vm1, %v3574_v1  ;;  %v310_v7 = vld [vmem:[%s3646_s29 + $0x70] sm:$0xff]  ;;  %v311_v16 = vld [vmem:[%s3646_s29 + $0x78] sm:$0xff]  ;;  %v312_v19 = vld [vmem:[%s3646_s29 + $0x80] sm:$0xff] }
  0x12   : > { %391 = vst.msk [vmem:[#allocation2 + $0x61] sm:$0xff] %vm328_vm1, %v302_v2  ;;  %v318_v9 = vld [vmem:[%s3646_s29 + $0xb0] sm:$0xff]  ;;  %v319_v17 = vld [vmem:[%s3646_s29 + $0xb8] sm:$0xff]  ;;  %v320_v20 = vld [vmem:[%s3646_s29 + $0xc0] sm:$0xff] }
  0x13   : > { %336 = vst.msk [vmem:[#allocation2 + $0x30] sm:$0xff] %vm328_vm1, %v3574_v1  ;;  %v305_v21 = vld [vmem:[%s3646_s29 + $0x48] sm:$0xff]  ;;  %v296_v23 = vld [vmem:[%s3646_s29] sm:$0xff]  ;;  %v306_v25 = vld [vmem:[%s3646_s29 + $0x50] sm:$0xff] }
  0x14   : > { %337 = vst.msk [vmem:[#allocation2 + $0x38] sm:$0xff] %vm328_vm1, %v3574_v1  ;;  %v313_v22 = vld [vmem:[%s3646_s29 + $0x88] sm:$0xff]  ;;  %v314_v27 = vld [vmem:[%s3646_s29 + $0x90] sm:$0xff]  ;;  %v307_v32 = vld [vmem:[%s3646_s29 + $0x58] sm:$0xff] }
  0x15   : > { %339 = vst.msk [vmem:[#allocation2 + $0x48] sm:$0xff] %vm328_vm1, %v3574_v1  ;;  %v421_v8 = vld [vmem:[#allocation2] sm:$0xff]  ;;  %v321_v24 = vld [vmem:[%s3646_s29 + $0xc8] sm:$0xff]  ;;  %v322_v31 = vld [vmem:[%s3646_s29 + $0xd0] sm:$0xff] }
  0x16   : > { %340 = vst.msk [vmem:[#allocation2 + $0x50] sm:$0xff] %vm328_vm1, %v3574_v1  ;;  %3245 = vmatmul.msk.f32.vlgmr.msra.gmra.mxu0 %vm328_vm1, %v421_v8  ;;  %v422_v12 = vld [vmem:[#allocation2 + $0x8] sm:$0xff]  ;;  %v315_v33 = vld [vmem:[%s3646_s29 + $0x98] sm:$0xff]  ;;  %v298_v34 = vld [vmem:[%s3646_s29 + $0x10] sm:$0xff] }
  0x17   : > { %345 = vst.msk [vmem:[#allocation2 + $0x78] sm:$0xff] %vm328_vm1, %v3574_v1  ;;  %v297_v29 = vld [vmem:[%s3646_s29 + $0x8] sm:$0xff]  ;;  %v323_v36 = vld [vmem:[%s3646_s29 + $0xd8] sm:$0xff]  ;;  %v308_v39 = vld [vmem:[%s3646_s29 + $0x60] sm:$0xff]  ;;  %3516 = vmatpush.msk.msra.mxu0 %vm550_vm0, %v3515_v0 }
  0x18   : > { %346 = vst.msk [vmem:[#allocation2 + $0x80] sm:$0xff] %vm328_vm1, %v3574_v1  ;;  %v316_v41 = vld [vmem:[%s3646_s29 + $0xa0] sm:$0xff]  ;;  %v299_v42 = vld [vmem:[%s3646_s29 + $0x18] sm:$0xff]  ;;  %v309_v44 = vld [vmem:[%s3646_s29 + $0x68] sm:$0xff] }
  0x19   : > { %v3666_v3 = vld [vmem:[#allocation2 + $0x60] sm:$0xff]  ;;  %348 = vst.msk [vmem:[#allocation2 + $0x90] sm:$0xff] %vm328_vm1, %v3574_v1  ;;  %v317_v45 = vld [vmem:[%s3646_s29 + $0xa8] sm:$0xff] }
  0x1a   : > { %3253 = vmatmul.msk.f32.vlgmr.msra.gmra.mxu1 %vm328_vm1, %v3666_v3  ;;  %349 = vst.msk [vmem:[#allocation2 + $0x98] sm:$0xff] %vm328_vm1, %v3574_v1  ;;  %v324_v43 = vld [vmem:[%s3646_s29 + $0xe0] sm:$0xff]  ;;  %v325_v49 = vld [vmem:[%s3646_s29 + $0xe8] sm:$0xff] }
  0x1b   : > { %351 = vst.msk [vmem:[#allocation2 + $0xa8] sm:$0xff] %vm328_vm1, %v3574_v1  ;;  %v300_v47 = vld [vmem:[%s3646_s29 + $0x20] sm:$0xff]  ;;  %v301_v52 = vld [vmem:[%s3646_s29 + $0x28] sm:$0xff]  ;;  %3414 = vmatpush.msk.msra.mxu1 %vm550_vm0, %v3413_v59 }
  0x1c   : > { %352 = vst.msk [vmem:[#allocation2 + $0xb0] sm:$0xff] %vm328_vm1, %v3574_v1 }
  0x1d   : > { %354 = vst.msk [vmem:[#allocation2 + $0xc0] sm:$0xff] %vm328_vm1, %v3574_v1 }
  0x1e   : > { %355 = vst.msk [vmem:[#allocation2 + $0xc8] sm:$0xff] %vm328_vm1, %v3574_v1  ;;  %3246 = vmatmul.msk.f32.gmra.mxu0 %vm328_vm1, %v422_v12 }
  0x1f   : > { %357 = vst.msk [vmem:[#allocation2 + $0xd8] sm:$0xff] %vm328_vm1, %v3574_v1 }
  0x20   : > { %358 = vst.msk [vmem:[#allocation2 + $0xe0] sm:$0xff] %vm328_vm1, %v3574_v1 }
  0x21   : > { %360 = vst.msk [vmem:[#allocation2 + $0xf0] sm:$0xff] %vm328_vm1, %v3574_v1 }
  0x22   : > { %361 = vst.msk [vmem:[#allocation2 + $0xf8] sm:$0xff] %vm328_vm1, %v3574_v1 }
  0x23   : > { %363 = vst.msk [vmem:[#allocation2 + $0x108] sm:$0xff] %vm328_vm1, %v3574_v1 }
  0x24   : > { %364 = vst.msk [vmem:[#allocation2 + $0x110] sm:$0xff] %vm328_vm1, %v3574_v1 }
  0x25   : > { %366 = vst.msk [vmem:[#allocation2 + $0x120] sm:$0xff] %vm328_vm1, %v3574_v1 }
  0x26   : > { %367 = vst.msk [vmem:[#allocation2 + $0x128] sm:$0xff] %vm328_vm1, %v3574_v1 }
  0x27   : > { %369 = vst.msk [vmem:[#allocation2 + $0x138] sm:$0xff] %vm328_vm1, %v3574_v1 }
  0x28   : > { %370 = vst.msk [vmem:[#allocation2 + $0x140] sm:$0xff] %vm328_vm1, %v3574_v1 }
  0x29   : > { %372 = vst.msk [vmem:[#allocation2 + $0x150] sm:$0xff] %vm328_vm1, %v3574_v1 }
  0x2a   : > { %373 = vst.msk [vmem:[#allocation2 + $0x158] sm:$0xff] %vm328_vm1, %v3574_v1 }
  0x2b   : > { %375 = vst.msk [vmem:[#allocation2 + $0x168] sm:$0xff] %vm328_vm1, %v3574_v1 }
  0x2c   : > { %376 = vst.msk [vmem:[#allocation2 + $0x170] sm:$0xff] %vm328_vm1, %v3574_v1 }
  0x2d   : > { %378 = vst.msk [vmem:[#allocation2 + $0x180] sm:$0xff] %vm328_vm1, %v3574_v1 }
  0x2e   : > { %379 = vst.msk [vmem:[#allocation2 + $0x188] sm:$0xff] %vm328_vm1, %v3574_v1 }
  0x2f   : > { %381 = vst.msk [vmem:[#allocation2 + $0x198] sm:$0xff] %vm328_vm1, %v3574_v1 }
  0x30   : > { %382 = vst.msk [vmem:[#allocation2 + $0x1a0] sm:$0xff] %vm328_vm1, %v3574_v1 }
  0x31   : > { %399 = vst.msk [vmem:[#allocation2 + $0xc1] sm:$0xff] %vm328_vm1, %v310_v7 }
  0x32   : > { %407 = vst.msk [vmem:[#allocation2 + $0x121] sm:$0xff] %vm328_vm1, %v318_v9  ;;  %v699_v9 = vld [vmem:[#allocation2 + $0x1] sm:$0xff] }
  0x33   : > { %344 = vst.msk [vmem:[#allocation2 + $0x70] sm:$0x3] %vm331_vm2, %v3574_v1 }
  0x34   : > { %392 = vst.msk [vmem:[#allocation2 + $0x69] sm:$0xff] %vm328_vm1, %v303_v11  ;;  %v977_v11 = vld [vmem:[#allocation2 + $0x2] sm:$0xff] }
  0x35   : > { %332 = vst.msk [vmem:[#allocation2 + $0x10] sm:$0x3] %vm331_vm2, %v3574_v1 }
  0x36   : > { %335 = vst.msk [vmem:[#allocation2 + $0x28] sm:$0x3] %vm331_vm2, %v3574_v1 }
  0x37   : > { %338 = vst.msk [vmem:[#allocation2 + $0x40] sm:$0x3] %vm331_vm2, %v3574_v1 }
  0x38   : > { %v3750_v13 = vld [vmem:[#allocation2 + $0xc0] sm:$0xff]  ;;  %341 = vst.msk [vmem:[#allocation2 + $0x58] sm:$0x3] %vm331_vm2, %v3574_v1 }
  0x39   : > { %3261 = vmatmul.msk.f32.vlgmr.msra.gmra.mxu2 %vm328_vm1, %v3750_v13  ;;  %v3756_v14 = vld [vmem:[#allocation2 + $0x120] sm:$0xff]  ;;  %347 = vst.msk [vmem:[#allocation2 + $0x88] sm:$0x3] %vm331_vm2, %v3574_v1 }
  0x3a   : > { %3269 = vmatmul.msk.f32.vlgmr.msra.gmra.mxu3 %vm328_vm1, %v3756_v14  ;;  %350 = vst.msk [vmem:[#allocation2 + $0xa0] sm:$0x3] %vm331_vm2, %v3574_v1  ;;  %3448 = vmatpush.msk.msra.mxu2 %vm550_vm0, %v3447_v57 }
  0x3b   : > { %v3764_v15 = vld [vmem:[#allocation2 + $0x68] sm:$0xff]  ;;  %353 = vst.msk [vmem:[#allocation2 + $0xb8] sm:$0x3] %vm331_vm2, %v3574_v1  ;;  %3482 = vmatpush.msk.msra.mxu3 %vm550_vm0, %v3481_v58 }
  0x3c   : > { %3254 = vmatmul.msk.f32.gmra.mxu1 %vm328_vm1, %v3764_v15  ;;  %356 = vst.msk [vmem:[#allocation2 + $0xd0] sm:$0x3] %vm331_vm2, %v3574_v1  ;;  %v700_v12 = vld [vmem:[#allocation2 + $0x9] sm:$0xff] }
  0x3d   : > { %359 = vst.msk [vmem:[#allocation2 + $0xe8] sm:$0x3] %vm331_vm2, %v3574_v1 }
  0x3e   : > { %362 = vst.msk [vmem:[#allocation2 + $0x100] sm:$0x3] %vm331_vm2, %v3574_v1 }
  0x3f   : > { %365 = vst.msk [vmem:[#allocation2 + $0x118] sm:$0x3] %vm331_vm2, %v3574_v1 }
  0x40   : > { %368 = vst.msk [vmem:[#allocation2 + $0x130] sm:$0x3] %vm331_vm2, %v3574_v1 }
  0x41   : > { %371 = vst.msk [vmem:[#allocation2 + $0x148] sm:$0x3] %vm331_vm2, %v3574_v1 }
  0x42   : > { %374 = vst.msk [vmem:[#allocation2 + $0x160] sm:$0x3] %vm331_vm2, %v3574_v1 }
  0x43   : > { %377 = vst.msk [vmem:[#allocation2 + $0x178] sm:$0x3] %vm331_vm2, %v3574_v1 }
  0x44   : > { %380 = vst.msk [vmem:[#allocation2 + $0x190] sm:$0x3] %vm331_vm2, %v3574_v1 }
  0x45   : > { %383 = vst.msk [vmem:[#allocation2 + $0x1a8] sm:$0x3] %vm331_vm2, %v3574_v1 }
  0x46   : > { %400 = vst.msk [vmem:[#allocation2 + $0xc9] sm:$0xff] %vm328_vm1, %v311_v16 }
  0x47   : > { %408 = vst.msk [vmem:[#allocation2 + $0x129] sm:$0xff] %vm328_vm1, %v319_v17  ;;  %v978_v17 = vld [vmem:[#allocation2 + $0xa] sm:$0xff] }
  0x48   : > { %393 = vst.msk [vmem:[#allocation2 + $0x79] sm:$0xff] %vm328_vm1, %v304_v18 }
  0x49   : > { %401 = vst.msk [vmem:[#allocation2 + $0xd9] sm:$0xff] %vm328_vm1, %v312_v19 }
  0x4a   : > { %409 = vst.msk [vmem:[#allocation2 + $0x139] sm:$0xff] %vm328_vm1, %v320_v20 }
  0x4b   : > { %394 = vst.msk [vmem:[#allocation2 + $0x81] sm:$0xff] %vm328_vm1, %v305_v21 }
  0x4c   : > { %402 = vst.msk [vmem:[#allocation2 + $0xe1] sm:$0xff] %vm328_vm1, %v313_v22 }
  0x4d   : > { %v3807_v26 = vld [vmem:[#allocation2 + $0xc8] sm:$0xff]  ;;  %385 = vst.msk [vmem:[#allocation2 + $0x19] sm:$0xff] %vm328_vm1, %v296_v23 }
  0x4e   : > { %3262 = vmatmul.msk.f32.gmra.mxu2 %vm328_vm1, %v3807_v26  ;;  %v3813_v28 = vld [vmem:[#allocation2 + $0x128] sm:$0xff]  ;;  %410 = vst.msk [vmem:[#allocation2 + $0x141] sm:$0xff] %vm328_vm1, %v321_v24 }
  0x4f   : > { %3270 = vmatmul.msk.f32.gmra.mxu3 %vm328_vm1, %v3813_v28  ;;  %v3819_v30 = vld [vmem:[#allocation2 + $0x78] sm:$0xff]  ;;  %395 = vst.msk [vmem:[#allocation2 + $0x91] sm:$0xff] %vm328_vm1, %v306_v25 }
  0x50   : > { %3255 = vmatmul.msk.f32.gmra.mxu1 %vm328_vm1, %v3819_v30  ;;  %403 = vst.msk [vmem:[#allocation2 + $0xf1] sm:$0xff] %vm328_vm1, %v314_v27  ;;  %v3831_v35 = vld [vmem:[#allocation2 + $0xd8] sm:$0xff]  ;;  %v4020_v27 = vld [vmem:[#allocation2 + $0x61] sm:$0xff] }
  0x51   : > { %386 = vst.msk [vmem:[#allocation2 + $0x21] sm:$0xff] %vm328_vm1, %v297_v29  ;;  %v3835_v37 = vld [vmem:[#allocation2 + $0x138] sm:$0xff] }
  0x52   : > { %411 = vst.msk [vmem:[#allocation2 + $0x151] sm:$0xff] %vm328_vm1, %v322_v31  ;;  %v3841_v40 = vld [vmem:[#allocation2 + $0x80] sm:$0xff] }
  0x53   : > { %396 = vst.msk [vmem:[#allocation2 + $0x99] sm:$0xff] %vm328_vm1, %v307_v32  ;;  %v3865_v48 = vld [vmem:[#allocation2 + $0xe0] sm:$0xff]  ;;  %v4034_v32 = vld [vmem:[#allocation2 + $0x69] sm:$0xff] }
  0x54   : > { %v3837_v38 = vld [vmem:[#allocation2 + $0x18] sm:$0xff]  ;;  %404 = vst.msk [vmem:[#allocation2 + $0xf9] sm:$0xff] %vm328_vm1, %v315_v33  ;;  %v4110_v0 = vld [vmem:[#allocation2 + $0x82] sm:$0xff] }
  0x55   : > { %3247 = vmatmul.msk.f32.gmra.mxu0 %vm328_vm1, %v3837_v38  ;;  %387 = vst.msk [vmem:[#allocation2 + $0x31] sm:$0xff] %vm328_vm1, %v298_v34  ;;  %v3869_v50 = vld [vmem:[#allocation2 + $0x140] sm:$0xff] }
  0x56   : > { %3263 = vmatmul.msk.f32.gmra.mxu2 %vm328_vm1, %v3831_v35  ;;  %412 = vst.msk [vmem:[#allocation2 + $0x159] sm:$0xff] %vm328_vm1, %v323_v36  ;;  %v3872_v51 = vld [vmem:[#allocation2 + $0x90] sm:$0xff]  ;;  %v1533_v10 = vld [vmem:[#allocation2 + $0x19] sm:$0xff]  ;;  %v4050_v36 = vld [vmem:[#allocation2 + $0x62] sm:$0xff] }
  0x57   : > { %3271 = vmatmul.msk.f32.gmra.mxu3 %vm328_vm1, %v3835_v37  ;;  %397 = vst.msk [vmem:[#allocation2 + $0xa9] sm:$0xff] %vm328_vm1, %v308_v39  ;;  %v3888_v54 = vld [vmem:[#allocation2 + $0xf0] sm:$0xff] }
  0x58   : > { %3256 = vmatmul.msk.f32.gmra.mxu1 %vm328_vm1, %v3841_v40  ;;  %405 = vst.msk [vmem:[#allocation2 + $0x109] sm:$0xff] %vm328_vm1, %v316_v41  ;;  %v3861_v46 = vld [vmem:[#allocation2 + $0x20] sm:$0xff] }
  0x59   : > { %388 = vst.msk [vmem:[#allocation2 + $0x39] sm:$0xff] %vm328_vm1, %v299_v42  ;;  %v3890_v55 = vld [vmem:[#allocation2 + $0x150] sm:$0xff]  ;;  %v1534_v16 = vld [vmem:[#allocation2 + $0x21] sm:$0xff] }
  0x5a   : > { %413 = vst.msk [vmem:[#allocation2 + $0x169] sm:$0xff] %vm328_vm1, %v324_v43  ;;  %v3892_v56 = vld [vmem:[#allocation2 + $0x98] sm:$0xff]  ;;  %v3986_v21 = vld [vmem:[#allocation2 + $0x22] sm:$0xff]  ;;  %v4070_v43 = vld [vmem:[#allocation2 + $0x6a] sm:$0xff] }
  0x5b   : > { %398 = vst.msk [vmem:[#allocation2 + $0xb1] sm:$0xff] %vm328_vm1, %v309_v44  ;;  %v3916_v61 = vld [vmem:[#allocation2 + $0xf8] sm:$0xff]  ;;  %v4068_v42 = vld [vmem:[#allocation2 + $0x81] sm:$0xff] }
  0x5c   : > { %406 = vst.msk [vmem:[#allocation2 + $0x111] sm:$0xff] %vm328_vm1, %v317_v45  ;;  %v3886_v53 = vld [vmem:[#allocation2 + $0x30] sm:$0xff]  ;;  %v3975_v19 = vld [vmem:[#allocation2 + $0x1a] sm:$0xff] }
  0x5d   : > { %3248 = vmatmul.msk.f32.gmra.mxu0 %vm328_vm1, %v3861_v46  ;;  %389 = vst.msk [vmem:[#allocation2 + $0x49] sm:$0xff] %vm328_vm1, %v300_v47  ;;  %v3918_v62 = vld [vmem:[#allocation2 + $0x158] sm:$0xff] }
  0x5e   : > { %3264 = vmatmul.msk.f32.gmra.mxu2 %vm328_vm1, %v3865_v48  ;;  %414 = vst.msk [vmem:[#allocation2 + $0x171] sm:$0xff] %vm328_vm1, %v325_v49  ;;  %v3920_v63 = vld [vmem:[#allocation2 + $0xa8] sm:$0xff]  ;;  %v3973_v18 = vld [vmem:[#allocation2 + $0x31] sm:$0xff]  ;;  %v4090_v49 = vld [vmem:[#allocation2 + $0x7a] sm:$0xff] }
  0x5f   : > { %3272 = vmatmul.msk.f32.gmra.mxu3 %vm328_vm1, %v3869_v50  ;;  %390 = vst.msk [vmem:[#allocation2 + $0x51] sm:$0xff] %vm328_vm1, %v301_v52  ;;  %v3936_v2 = vld [vmem:[#allocation2 + $0x108] sm:$0xff]  ;;  %v4088_v47 = vld [vmem:[#allocation2 + $0x91] sm:$0xff]  ;;  %v4108_v59 = vld [vmem:[#allocation2 + $0x99] sm:$0xff] }
  0x60   : > { %3257 = vmatmul.msk.f32.gmra.mxu1 %vm328_vm1, %v3872_v51  ;;  %v3914_v60 = vld [vmem:[#allocation2 + $0x38] sm:$0xff]  ;;  %4904 = vst [vmem:[#allocation3_spill] sm:$0xff] %v4020_v27 }
  0x61   : > { %v3938_v4 = vld [vmem:[#allocation2 + $0x168] sm:$0xff]  ;;  %v3984_v20 = vld [vmem:[#allocation2 + $0x39] sm:$0xff]  ;;  %4905 = vst [vmem:[#allocation4_spill] sm:$0xff] %v4034_v32 }
  0x62   : > { %v3940_v5 = vld [vmem:[#allocation2 + $0xb0] sm:$0xff]  ;;  %v4010_v25 = vld [vmem:[#allocation2 + $0x3a] sm:$0xff]  ;;  %4907 = vst [vmem:[#allocation6_spill] sm:$0xff] %v4050_v36 }
  0x63   : > { %v3952_v7 = vld [vmem:[#allocation2 + $0x110] sm:$0xff]  ;;  %4909 = vst [vmem:[#allocation8_spill] sm:$0xff] %v4068_v42 }
  0x64   : > { %v3934_v1 = vld [vmem:[#allocation2 + $0x48] sm:$0xff]  ;;  %v3998_v23 = vld [vmem:[#allocation2 + $0x32] sm:$0xff]  ;;  %4910 = vst [vmem:[#allocation9_spill] sm:$0xff] %v4070_v43 }
  0x65   : > { %3249 = vmatmul.msk.f32.gmra.mxu0 %vm328_vm1, %v3886_v53  ;;  %v3954_v8 = vld [vmem:[#allocation2 + $0x170] sm:$0xff]  ;;  %4912 = vst [vmem:[#allocation11_spill] sm:$0xff] %v4088_v47 }
  0x66   : > { %3265 = vmatmul.msk.f32.gmra.mxu2 %vm328_vm1, %v3888_v54  ;;  %v3950_v6 = vld [vmem:[#allocation2 + $0x50] sm:$0xff]  ;;  %4913 = vst [vmem:[#allocation12_spill] sm:$0xff] %v4090_v49 }
  0x67   : > { %3273 = vmatmul.msk.f32.gmra.mxu3 %vm328_vm1, %v3890_v55  ;;  %v3996_v22 = vld [vmem:[#allocation2 + $0x49] sm:$0xff]  ;;  %v4008_v24 = vld [vmem:[#allocation2 + $0x51] sm:$0xff]  ;;  %4915 = vst [vmem:[#allocation14_spill] sm:$0xff] %v4108_v59 }
  0x68   : > { %3258 = vmatmul.msk.f32.gmra.mxu1 %vm328_vm1, %v3892_v56  ;;  %v4022_v29 = vld [vmem:[#allocation2 + $0x4a] sm:$0xff]  ;;  %v4036_v33 = vld [vmem:[#allocation2 + $0x52] sm:$0xff]  ;;  %4916 = vst [vmem:[#allocation15_spill] sm:$0xff] %v4110_v0 }
  0x6d   : > { %3250 = vmatmul.msk.f32.gmra.mxu0 %vm328_vm1, %v3914_v60 }
  0x6e   : > { %3266 = vmatmul.msk.f32.gmra.mxu2 %vm328_vm1, %v3916_v61 }
  0x6f   : > { %3274 = vmatmul.msk.f32.gmra.mxu3 %vm328_vm1, %v3918_v62 }
  0x70   : > { %3259 = vmatmul.msk.f32.gmra.mxu1 %vm328_vm1, %v3920_v63 }
  0x75   : > { %3251 = vmatmul.msk.f32.gmra.mxu0 %vm328_vm1, %v3934_v1 }
  0x76   : > { %3267 = vmatmul.msk.f32.gmra.mxu2 %vm328_vm1, %v3936_v2 }
  0x77   : > { %3275 = vmatmul.msk.f32.gmra.mxu3 %vm328_vm1, %v3938_v4 }
  0x78   : > { %3260 = vmatmul.msk.f32.gmra.mxu1 %vm328_vm1, %v3940_v5 }
  0x7d   : > { %3252 = vmatmul.msk.f32.gmra.mxu0 %vm328_vm1, %v3950_v6 }
  0x7e   : > { %3268 = vmatmul.msk.f32.gmra.mxu2 %vm328_vm1, %v3952_v7 }
  0x7f   : > { %3276 = vmatmul.msk.f32.gmra.mxu3 %vm328_vm1, %v3954_v8 }
  0x80   : > { %3279 = vmatmul.msk.f32.vlgmr.msrb.gmra.mxu1 %vm328_vm1, %v699_v9 }
  0x85   : > { %3381 = vmatmul.msk.f32.vlgmr.msrb.gmra.mxu0 %vm328_vm1, %v1533_v10 }
  0x86   : > { %3313 = vmatmul.msk.f32.vlgmr.msrb.gmra.mxu2 %vm328_vm1, %v977_v11 }
  0x87   : > { %3347 = vmatmul.msk.f32.vlgmr.msrb.gmra.mxu3 %vm328_vm1, %v3837_v38 }
  0x88   : > { %3280 = vmatmul.msk.f32.gmra.mxu1 %vm328_vm1, %v700_v12  ;;  %v4128_v12 = vld [vmem:[#allocation2 + $0xa9] sm:$0xff] }
  0x89   : > { %4918 = vst [vmem:[#allocation17_spill] sm:$0xff] %v4128_v12 }
  0x8d   : > { %3382 = vmatmul.msk.f32.gmra.mxu0 %vm328_vm1, %v1534_v16 }
  0x8e   : > { %3314 = vmatmul.msk.f32.gmra.mxu2 %vm328_vm1, %v978_v17 }
  0x8f   : > { %3348 = vmatmul.msk.f32.gmra.mxu3 %vm328_vm1, %v3861_v46 }
  0x90   : > { %3281 = vmatmul.msk.f32.gmra.mxu1 %vm328_vm1, %v1533_v10 }
  0x93   : > { %v4042_v34 = vpop.f32.mrf.mxu0 }
  0x95   : > { %3383 = vmatmul.msk.f32.gmra.mxu0 %vm328_vm1, %v3973_v18 }
  0x96   : > { %3315 = vmatmul.msk.f32.gmra.mxu2 %vm328_vm1, %v3975_v19 }
  0x97   : > { %3349 = vmatmul.msk.f32.gmra.mxu3 %vm328_vm1, %v3886_v53  ;;  %v4032_v31 = vpop.f32.mrf.mxu1 }
  0x98   : > { %3282 = vmatmul.msk.f32.gmra.mxu1 %vm328_vm1, %v1534_v16  ;;  %v4130_v16 = vld [vmem:[#allocation2 + $0x92] sm:$0xff] }
  0x99   : > { %4919 = vst [vmem:[#allocation18_spill] sm:$0xff] %v4130_v16 }
  0x9b   : > { %v4066_v41 = vpop.f32.mrf.mxu0 }
  0x9d   : > { %3384 = vmatmul.msk.f32.gmra.mxu0 %vm328_vm1, %v3984_v20 }
  0x9e   : > { %3316 = vmatmul.msk.f32.gmra.mxu2 %vm328_vm1, %v3986_v21 }
  0x9f   : > { %3350 = vmatmul.msk.f32.gmra.mxu3 %vm328_vm1, %v3914_v60 }
  0xa0   : > { %3283 = vmatmul.msk.f32.gmra.mxu1 %vm328_vm1, %v3973_v18 }
  0xa5   : > { %3385 = vmatmul.msk.f32.gmra.mxu0 %vm328_vm1, %v3996_v22 }
  0xa6   : > { %3317 = vmatmul.msk.f32.gmra.mxu2 %vm328_vm1, %v3998_v23 }
  0xa7   : > { %3351 = vmatmul.msk.f32.gmra.mxu3 %vm328_vm1, %v3934_v1 }
  0xa8   : > { %3284 = vmatmul.msk.f32.gmra.mxu1 %vm328_vm1, %v3984_v20 }
  0xad   : > { %3386 = vmatmul.msk.f32.gmra.mxu0 %vm328_vm1, %v4008_v24 }
  0xae   : > { %3318 = vmatmul.msk.f32.gmra.mxu2 %vm328_vm1, %v4010_v25 }
  0xaf   : > { %3352 = vmatmul.msk.f32.gmra.mxu3 %vm328_vm1, %v3950_v6 }
  0xb0   : > { %3285 = vmatmul.msk.f32.gmra.mxu1 %vm328_vm1, %v3996_v22 }
  0xb5   : > { %3387 = vmatmul.msk.f32.gmra.mxu0 %vm328_vm1, %v4020_v27 }
  0xb6   : > { %3319 = vmatmul.msk.f32.gmra.mxu2 %vm328_vm1, %v4022_v29 }
  0xb7   : > { %3353 = vmatmul.msk.f32.gmra.mxu3 %vm328_vm1, %v3666_v3  ;;  %v4048_v3 = vld [vmem:[#allocation2 + $0x79] sm:$0xff] }
  0xb8   : > { %3286 = vmatmul.msk.f32.gmra.mxu1 %vm328_vm1, %v4008_v24  ;;  %4906 = vst [vmem:[#allocation5_spill] sm:$0xff] %v4048_v3 }
  0xb9   : > { %v4052_v38 = vpop.f32.mrf.mxu1 }
  0xbc   : > { %v4060_v39 = vpop.f32.mrf.mxu2 }
  0xbd   : > { %3388 = vmatmul.msk.f32.gmra.mxu0 %vm328_vm1, %v4034_v32 }
  0xbe   : > { %3320 = vmatmul.msk.f32.gmra.mxu2 %vm328_vm1, %v4036_v33 }
  0xbf   : > { %3354 = vmatmul.msk.f32.gmra.mxu3 %vm328_vm1, %v3764_v15  ;;  %v4062_v15 = vpop.f32.mrf.mxu3 }
  0xc0   : > { %3287 = vmatmul.msk.f32.gmra.mxu1 %vm328_vm1, %v4020_v27  ;;  %4908 = vst [vmem:[#allocation7_spill] sm:$0xff] %v4062_v15  ;;  %v4223_v27 = vld [vmem:[#allocation2 + $0xe1] sm:$0xff] }
  0xc5   : > { %3389 = vmatmul.msk.f32.gmra.mxu0 %vm328_vm1, %v4048_v3 }
  0xc6   : > { %3321 = vmatmul.msk.f32.gmra.mxu2 %vm328_vm1, %v4050_v36 }
  0xc7   : > { %3355 = vmatmul.msk.f32.gmra.mxu3 %vm328_vm1, %v3819_v30 }
  0xc8   : > { %3288 = vmatmul.msk.f32.gmra.mxu1 %vm328_vm1, %v4034_v32  ;;  %v4211_v32 = vld [vmem:[%s4871_s4] ss:$0 sm:$0xff] }
  0xcd   : > { %v4072_v44 = vpop.f32.mrf.mxu1  ;;  %3390 = vmatmul.msk.f32.gmra.mxu0 %vm328_vm1, %v4068_v42 }
  0xce   : > { %3322 = vmatmul.msk.f32.gmra.mxu2 %vm328_vm1, %v4070_v43 }
  0xcf   : > { %3356 = vmatmul.msk.f32.gmra.mxu3 %vm328_vm1, %v3841_v40 }
  0xd0   : > { %3289 = vmatmul.msk.f32.gmra.mxu1 %vm328_vm1, %v4048_v3  ;;  %v4190_v3 = vld [vmem:[#allocation2 + $0xb2] sm:$0xff] }
  0xd1   : > { %v4082_v30 = vpop.f32.mrf.mxu2  ;;  %4931 = vst [vmem:[#allocation30_spill] sm:$0xff] %v4190_v3 }
  0xd2   : > { %v4084_v45 = vpop.f32.mrf.mxu3  ;;  %v4086_v46 = vpop.f32.mrf.mxu0 }
  0xd3   : > { %4911 = vst [vmem:[#allocation10_spill] sm:$0xff] %v4084_v45  ;;  %v4148_v45 = vld [vmem:[#allocation2 + $0xb1] sm:$0xff] }
  0xd4   : > { %4922 = vst [vmem:[#allocation21_spill] sm:$0xff] %v4148_v45 }
  0xd5   : > { %v4092_v52 = vpop.f32.mrf.mxu1  ;;  %3391 = vmatmul.msk.f32.gmra.mxu0 %vm328_vm1, %v4088_v47 }
  0xd6   : > { %3323 = vmatmul.msk.f32.gmra.mxu2 %vm328_vm1, %v4090_v49 }
  0xd7   : > { %3357 = vmatmul.msk.f32.gmra.mxu3 %vm328_vm1, %v3872_v51 }
  0xd8   : > { %3290 = vmatmul.msk.f32.gmra.mxu1 %vm328_vm1, %v4068_v42  ;;  %v4170_v42 = vld [vmem:[#allocation2 + $0xaa] sm:$0xff] }
  0xd9   : > { %v4102_v40 = vpop.f32.mrf.mxu2  ;;  %4927 = vst [vmem:[#allocation26_spill] sm:$0xff] %v4170_v42 }
  0xda   : > { %v4104_v57 = vpop.f32.mrf.mxu3  ;;  %v4106_v58 = vpop.f32.mrf.mxu0 }
  0xdb   : > { %4914 = vst [vmem:[#allocation13_spill] sm:$0xff] %v4104_v57 }
  0xdd   : > { %v4112_v9 = vpop.f32.mrf.mxu1  ;;  %3392 = vmatmul.msk.f32.gmra.mxu0 %vm328_vm1, %v4108_v59 }
  0xde   : > { %3324 = vmatmul.msk.f32.gmra.mxu2 %vm328_vm1, %v4110_v0 }
  0xdf   : > { %3358 = vmatmul.msk.f32.gmra.mxu3 %vm328_vm1, %v3892_v56 }
  0xe0   : > { %3291 = vmatmul.msk.f32.gmra.mxu1 %vm328_vm1, %v4088_v47  ;;  %v4150_v47 = vld [vmem:[#allocation2 + $0x9a] sm:$0xff] }
  0xe1   : > { %v4122_v51 = vpop.f32.mrf.mxu2  ;;  %4923 = vst [vmem:[#allocation22_spill] sm:$0xff] %v4150_v47 }
  0xe2   : > { %v4124_v10 = vpop.f32.mrf.mxu3  ;;  %v4126_v11 = vpop.f32.mrf.mxu0 }
  0xe3   : > { %4917 = vst [vmem:[#allocation16_spill] sm:$0xff] %v4124_v10 }
  0xe5   : > { %v4132_v17 = vpop.f32.mrf.mxu1  ;;  %3393 = vmatmul.msk.f32.gmra.mxu0 %vm328_vm1, %v4128_v12 }
  0xe6   : > { %3325 = vmatmul.msk.f32.gmra.mxu2 %vm328_vm1, %v4130_v16  ;;  %v4168_v16 = vld [vmem:[#allocation2 + $0xc1] sm:$0xff] }
  0xe7   : > { %3359 = vmatmul.msk.f32.gmra.mxu3 %vm328_vm1, %v3920_v63  ;;  %4926 = vst [vmem:[#allocation25_spill] sm:$0xff] %v4168_v16 }
  0xe8   : > { %3292 = vmatmul.msk.f32.gmra.mxu1 %vm328_vm1, %v4108_v59 }
  0xe9   : > { %v4142_v56 = vpop.f32.mrf.mxu2 }
  0xea   : > { %4920 = vst [vmem:[#allocation19_spill] sm:$0xff] %v4142_v56  ;;  %v4144_v10 = vpop.f32.mrf.mxu3  ;;  %v4146_v57 = vpop.f32.mrf.mxu0  ;;  %v4225_v56 = vld [vmem:[#allocation2 + $0xca] sm:$0xff] }
  0xeb   : > { %4921 = vst [vmem:[#allocation20_spill] sm:$0xff] %v4144_v10 }
  0xed   : > { %v4152_v15 = vpop.f32.mrf.mxu1  ;;  %3394 = vmatmul.msk.f32.gmra.mxu0 %vm328_vm1, %v4148_v45 }
  0xee   : > { %3326 = vmatmul.msk.f32.gmra.mxu2 %vm328_vm1, %v4150_v47  ;;  %v4188_v47 = vld [vmem:[#allocation2 + $0xc9] sm:$0xff] }
  0xef   : > { %3360 = vmatmul.msk.f32.gmra.mxu3 %vm328_vm1, %v3940_v5  ;;  %4930 = vst [vmem:[#allocation29_spill] sm:$0xff] %v4188_v47 }
  0xf0   : > { %3293 = vmatmul.msk.f32.gmra.mxu1 %vm328_vm1, %v4128_v12 }
  0xf1   : > { %v4162_v63 = vpop.f32.mrf.mxu2 }
  0xf2   : > { %4924 = vst [vmem:[#allocation23_spill] sm:$0xff] %v4162_v63  ;;  %v4164_v10 = vpop.f32.mrf.mxu3  ;;  %v4166_v59 = vpop.f32.mrf.mxu0 }
  0xf3   : > { %4925 = vst [vmem:[#allocation24_spill] sm:$0xff] %v4164_v10 }
  0xf5   : > { %v4172_v0 = vpop.f32.mrf.mxu1  ;;  %3395 = vmatmul.msk.f32.gmra.mxu0 %vm328_vm1, %v4168_v16 }
  0xf6   : > { %3327 = vmatmul.msk.f32.gmra.mxu2 %vm328_vm1, %v4170_v42  ;;  %v4204_v42 = vld [vmem:[#allocation2 + $0xd9] sm:$0xff] }
  0xf7   : > { %3361 = vmatmul.msk.f32.gmra.mxu3 %vm328_vm1, %v3750_v13 }
  0xf8   : > { %3294 = vmatmul.msk.f32.gmra.mxu1 %vm328_vm1, %v4148_v45 }
  0xf9   : > { %v4182_v5 = vpop.f32.mrf.mxu2 }
  0xfa   : > { %4928 = vst [vmem:[#allocation27_spill] sm:$0xff] %v4182_v5  ;;  %v4184_v10 = vpop.f32.mrf.mxu3  ;;  %v4186_v12 = vpop.f32.mrf.mxu0  ;;  %v4206_v5 = vld [vmem:[#allocation2 + $0xc2] sm:$0xff] }
  0xfb   : > { %4929 = vst [vmem:[#allocation28_spill] sm:$0xff] %v4184_v10 }
  0xfc   : > { %4934 = vst [vmem:[#allocation33_spill] sm:$0xff] %v4206_v5 }
  0xfd   : > { %v849_v49 = vpop.f32.mrf.mxu1  ;;  %3396 = vmatmul.msk.f32.gmra.mxu0 %vm328_vm1, %v4188_v47 }
  0xfe   : > { %3328 = vmatmul.msk.f32.gmra.mxu2 %vm328_vm1, %v4190_v3 }
  0xff   : > { %3362 = vmatmul.msk.f32.gmra.mxu3 %vm328_vm1, %v3807_v26  ;;  %v667_v26 = vadd.f32 %v4211_v32, %v4042_v34 }
 0x100   : > { %3295 = vmatmul.msk.f32.gmra.mxu1 %vm328_vm1, %v4168_v16 }
 0x101   : > { %v4200_v13 = vpop.f32.mrf.mxu2 }
 0x102   : > { %4932 = vst [vmem:[#allocation31_spill] sm:$0xff] %v4200_v13  ;;  %v4202_v10 = vpop.f32.mrf.mxu3  ;;  %v1683_v45 = vpop.f32.mrf.mxu0 }
 0x103   : > { %4933 = vst [vmem:[#allocation32_spill] sm:$0xff] %v4202_v10  ;;  %v945_v10 = vadd.f32 %v849_v49, %v667_v26 }
 0x105   : > { %v852_v3 = vpop.f32.mrf.mxu1  ;;  %3397 = vmatmul.msk.f32.gmra.mxu0 %vm328_vm1, %v4204_v42 }
 0x106   : > { %3329 = vmatmul.msk.f32.gmra.mxu2 %vm328_vm1, %v4206_v5  ;;  %v4241_v5 = vld [vmem:[#allocation2 + $0xda] sm:$0xff] }
 0x107   : > { %3363 = vmatmul.msk.f32.gmra.mxu3 %vm328_vm1, %v3831_v35  ;;  %v668_v35 = vadd.f32 %v4211_v32, %v4066_v41 }
 0x108   : > { %3296 = vmatmul.msk.f32.gmra.mxu1 %vm328_vm1, %v4188_v47  ;;  %v4239_v47 = vld [vmem:[#allocation2 + $0xf1] sm:$0xff] }
 0x109   : > { %v1127_v16 = vpop.f32.mrf.mxu2 }
 0x10a   : > { %v1223_v13 = vadd.f32 %v1127_v16, %v945_v10  ;;  %v1405_v63 = vpop.f32.mrf.mxu3  ;;  %v1686_v43 = vpop.f32.mrf.mxu0  ;;  %v946_v10 = vadd.f32 %v852_v3, %v668_v35 }
 0x10c   : > { %v1501_v36 = vadd.f32 %v1405_v63, %v1223_v13 }
 0x10d   : > { %v855_v34 = vpop.f32.mrf.mxu1  ;;  %3398 = vmatmul.msk.f32.gmra.mxu0 %vm328_vm1, %v4223_v27 }
 0x10e   : > { %v4231_v49 = vadd.f32 %v1683_v45, %v1501_v36  ;;  %3330 = vmatmul.msk.f32.gmra.mxu2 %vm328_vm1, %v4225_v56 }
 0x10f   : > { %3364 = vmatmul.msk.f32.gmra.mxu3 %vm328_vm1, %v3865_v48  ;;  %v669_v48 = vadd.f32 %v4211_v32, %v4086_v46 }
 0x110   : > { %4935 = vst [vmem:[#allocation34_spill] sm:$0xff] %v4231_v49  ;;  %3297 = vmatmul.msk.f32.gmra.mxu1 %vm328_vm1, %v4204_v42  ;;  %v4257_v49 = vld [vmem:[#allocation2 + $0xe2] sm:$0xff] }
 0x111   : > { %v1130_v16 = vpop.f32.mrf.mxu2  ;;  %v947_v45 = vadd.f32 %v855_v34, %v669_v48 }
 0x112   : > { %v1224_v63 = vadd.f32 %v1130_v16, %v946_v10  ;;  %v1408_v13 = vpop.f32.mrf.mxu3  ;;  %v1689_v26 = vpop.f32.mrf.mxu0 }
 0x114   : > { %v1502_v36 = vadd.f32 %v1408_v13, %v1224_v63  ;;  %v4255_v13 = vld [vmem:[#allocation2 + $0xf9] sm:$0xff] }
 0x115   : > { %v858_v41 = vpop.f32.mrf.mxu1  ;;  %3399 = vmatmul.msk.f32.gmra.mxu0 %vm328_vm1, %v4239_v47 }
 0x116   : > { %v4247_v3 = vadd.f32 %v1686_v43, %v1502_v36  ;;  %3331 = vmatmul.msk.f32.gmra.mxu2 %vm328_vm1, %v4241_v5 }
 0x117   : > { %3365 = vmatmul.msk.f32.gmra.mxu3 %vm328_vm1, %v3888_v54  ;;  %v670_v54 = vadd.f32 %v4211_v32, %v4106_v58 }
 0x118   : > { %4936 = vst [vmem:[#allocation35_spill] sm:$0xff] %v4247_v3  ;;  %3298 = vmatmul.msk.f32.gmra.mxu1 %vm328_vm1, %v4223_v27  ;;  %v4273_v3 = vld [vmem:[#allocation2 + $0xf2] sm:$0xff] }
 0x119   : > { %v1133_v35 = vpop.f32.mrf.mxu2  ;;  %v948_v36 = vadd.f32 %v858_v41, %v670_v54 }
 0x11a   : > { %v1225_v10 = vadd.f32 %v1133_v35, %v947_v45  ;;  %v1411_v16 = vpop.f32.mrf.mxu3  ;;  %v1692_v63 = vpop.f32.mrf.mxu0 }
 0x11c   : > { %v1503_v43 = vadd.f32 %v1411_v16, %v1225_v10  ;;  %v4271_v16 = vld [vmem:[#allocation2 + $0x109] sm:$0xff] }
 0x11d   : > { %v861_v46 = vpop.f32.mrf.mxu1  ;;  %3400 = vmatmul.msk.f32.gmra.mxu0 %vm328_vm1, %v4255_v13 }
 0x11e   : > { %v4263_v34 = vadd.f32 %v1689_v26, %v1503_v43  ;;  %3332 = vmatmul.msk.f32.gmra.mxu2 %vm328_vm1, %v4257_v49 }
 0x11f   : > { %3366 = vmatmul.msk.f32.gmra.mxu3 %vm328_vm1, %v3916_v61  ;;  %v671_v61 = vadd.f32 %v4211_v32, %v4126_v11 }
 0x120   : > { %4937 = vst [vmem:[#allocation36_spill] sm:$0xff] %v4263_v34  ;;  %3299 = vmatmul.msk.f32.gmra.mxu1 %vm328_vm1, %v4239_v47  ;;  %v4289_v34 = vld [vmem:[#allocation2 + $0xfa] sm:$0xff] }
 0x121   : > { %v1136_v48 = vpop.f32.mrf.mxu2  ;;  %v949_v43 = vadd.f32 %v861_v46, %v671_v61 }
 0x122   : > { %v1226_v45 = vadd.f32 %v1136_v48, %v948_v36  ;;  %v1414_v35 = vpop.f32.mrf.mxu3  ;;  %v1695_v10 = vpop.f32.mrf.mxu0 }
 0x124   : > { %v1504_v58 = vadd.f32 %v1414_v35, %v1226_v45  ;;  %v4287_v35 = vld [vmem:[#allocation2 + $0x111] sm:$0xff] }
 0x125   : > { %v864_v26 = vpop.f32.mrf.mxu1  ;;  %3401 = vmatmul.msk.f32.gmra.mxu0 %vm328_vm1, %v4271_v16 }
 0x126   : > { %v4279_v41 = vadd.f32 %v1692_v63, %v1504_v58  ;;  %3333 = vmatmul.msk.f32.gmra.mxu2 %vm328_vm1, %v4273_v3 }
 0x127   : > { %3367 = vmatmul.msk.f32.gmra.mxu3 %vm328_vm1, %v3936_v2  ;;  %v672_v2 = vadd.f32 %v4211_v32, %v4146_v57 }
 0x128   : > { %4938 = vst [vmem:[#allocation37_spill] sm:$0xff] %v4279_v41  ;;  %3300 = vmatmul.msk.f32.gmra.mxu1 %vm328_vm1, %v4255_v13  ;;  %v4305_v41 = vld [vmem:[#allocation2 + $0x10a] sm:$0xff] }
 0x129   : > { %v1139_v54 = vpop.f32.mrf.mxu2  ;;  %v950_v58 = vadd.f32 %v864_v26, %v672_v2 }
 0x12a   : > { %v1227_v36 = vadd.f32 %v1139_v54, %v949_v43  ;;  %v1417_v48 = vpop.f32.mrf.mxu3  ;;  %v1698_v45 = vpop.f32.mrf.mxu0 }
 0x12c   : > { %v1505_v11 = vadd.f32 %v1417_v48, %v1227_v36  ;;  %v4303_v48 = vld [vmem:[#allocation2 + $0x121] sm:$0xff] }
 0x12d   : > { %v867_v63 = vpop.f32.mrf.mxu1  ;;  %3402 = vmatmul.msk.f32.gmra.mxu0 %vm328_vm1, %v4287_v35 }
 0x12e   : > { %v4295_v46 = vadd.f32 %v1695_v10, %v1505_v11  ;;  %3334 = vmatmul.msk.f32.gmra.mxu2 %vm328_vm1, %v4289_v34 }
 0x12f   : > { %3368 = vmatmul.msk.f32.gmra.mxu3 %vm328_vm1, %v3952_v7  ;;  %v673_v7 = vadd.f32 %v4211_v32, %v4166_v59 }
 0x130   : > { %4939 = vst [vmem:[#allocation38_spill] sm:$0xff] %v4295_v46  ;;  %3301 = vmatmul.msk.f32.gmra.mxu1 %vm328_vm1, %v4271_v16  ;;  %v4321_v46 = vld [vmem:[#allocation2 + $0x112] sm:$0xff] }
 0x131   : > { %v1142_v61 = vpop.f32.mrf.mxu2  ;;  %v951_v11 = vadd.f32 %v867_v63, %v673_v7 }
 0x132   : > { %v1228_v43 = vadd.f32 %v1142_v61, %v950_v58  ;;  %v1420_v54 = vpop.f32.mrf.mxu3  ;;  %v1701_v36 = vpop.f32.mrf.mxu0 }
 0x134   : > { %v1506_v57 = vadd.f32 %v1420_v54, %v1228_v43  ;;  %v4319_v54 = vld [vmem:[#allocation2 + $0x129] sm:$0xff] }
 0x135   : > { %v870_v10 = vpop.f32.mrf.mxu1  ;;  %3403 = vmatmul.msk.f32.gmra.mxu0 %vm328_vm1, %v4303_v48 }
 0x136   : > { %v4311_v26 = vadd.f32 %v1698_v45, %v1506_v57  ;;  %3335 = vmatmul.msk.f32.gmra.mxu2 %vm328_vm1, %v4305_v41 }
 0x137   : > { %3369 = vmatmul.msk.f32.gmra.mxu3 %vm328_vm1, %v3756_v14  ;;  %v674_v14 = vadd.f32 %v4211_v32, %v4186_v12 }
 0x138   : > { %4940 = vst [vmem:[#allocation39_spill] sm:$0xff] %v4311_v26  ;;  %3302 = vmatmul.msk.f32.gmra.mxu1 %vm328_vm1, %v4287_v35  ;;  %v4337_v26 = vld [vmem:[#allocation2 + $0x122] sm:$0xff] }
 0x139   : > { %v1145_v2 = vpop.f32.mrf.mxu2  ;;  %v952_v57 = vadd.f32 %v870_v10, %v674_v14 }
 0x13a   : > { %v1229_v58 = vadd.f32 %v1145_v2, %v951_v11  ;;  %v1423_v61 = vpop.f32.mrf.mxu3  ;;  %v1704_v43 = vpop.f32.mrf.mxu0 }
 0x13c   : > { %v1507_v59 = vadd.f32 %v1423_v61, %v1229_v58  ;;  %v4335_v61 = vld [vmem:[#allocation2 + $0x139] sm:$0xff] }
 0x13d   : > { %v873_v45 = vpop.f32.mrf.mxu1  ;;  %3404 = vmatmul.msk.f32.gmra.mxu0 %vm328_vm1, %v4319_v54 }
 0x13e   : > { %v4327_v63 = vadd.f32 %v1701_v36, %v1507_v59  ;;  %3336 = vmatmul.msk.f32.gmra.mxu2 %vm328_vm1, %v4321_v46 }
 0x13f   : > { %3370 = vmatmul.msk.f32.gmra.mxu3 %vm328_vm1, %v3813_v28  ;;  %v675_v28 = vadd.f32 %v4211_v32, %v4032_v31  ;;  %v4353_v31 = vld [vmem:[#allocation2 + $0x12a] sm:$0xff] }
 0x140   : > { %4941 = vst [vmem:[#allocation40_spill] sm:$0xff] %v4327_v63  ;;  %3303 = vmatmul.msk.f32.gmra.mxu1 %vm328_vm1, %v4303_v48  ;;  %v1560_v63 = vld [vmem:[#allocation2 + $0x159] sm:$0xff] }
 0x141   : > { %v1148_v7 = vpop.f32.mrf.mxu2  ;;  %v953_v59 = vadd.f32 %v873_v45, %v675_v28  ;;  %v326_v28 = vld [vmem:[%s3646_s29 + $0xf0] sm:$0xff] }
 0x142   : > { %v1230_v11 = vadd.f32 %v1148_v7, %v952_v57  ;;  %v1426_v2 = vpop.f32.mrf.mxu3  ;;  %v1707_v58 = vpop.f32.mrf.mxu0  ;;  %415 = vst.msk [vmem:[#allocation2 + $0x181] sm:$0xff] %vm328_vm1, %v326_v28 }
 0x144   : > { %v1508_v12 = vadd.f32 %v1426_v2, %v1230_v11  ;;  %v4351_v2 = vld [vmem:[#allocation2 + $0x141] sm:$0xff] }
 0x145   : > { %v876_v36 = vpop.f32.mrf.mxu1  ;;  %3405 = vmatmul.msk.f32.gmra.mxu0 %vm328_vm1, %v4335_v61  ;;  %4943 = vst [vmem:[#allocation42_spill] sm:$0xff] %v4351_v2 }
 0x146   : > { %v4343_v10 = vadd.f32 %v1704_v43, %v1508_v12  ;;  %3337 = vmatmul.msk.f32.gmra.mxu2 %vm328_vm1, %v4337_v26 }
 0x147   : > { %3371 = vmatmul.msk.f32.gmra.mxu3 %vm328_vm1, %v3835_v37  ;;  %v676_v37 = vadd.f32 %v4211_v32, %v4052_v38 }
 0x148   : > { %4942 = vst [vmem:[#allocation41_spill] sm:$0xff] %v4343_v10  ;;  %3304 = vmatmul.msk.f32.gmra.mxu1 %vm328_vm1, %v4319_v54 }
 0x149   : > { %v1151_v14 = vpop.f32.mrf.mxu2 }
 0x14a   : > { %v1231_v57 = vadd.f32 %v1151_v14, %v953_v59  ;;  %v1429_v7 = vpop.f32.mrf.mxu3  ;;  %v1710_v11 = vpop.f32.mrf.mxu0  ;;  %v954_v59 = vadd.f32 %v876_v36, %v676_v37  ;;  %v327_v37 = vld [vmem:[%s3646_s29 + $0xf8] sm:$0xff] }
 0x14b   : > { %416 = vst.msk [vmem:[#allocation2 + $0x189] sm:$0xff] %vm328_vm1, %v327_v37 }
 0x14c   : > { %v1509_v43 = vadd.f32 %v1429_v7, %v1231_v57 }
 0x14d   : > { %v879_v12 = vpop.f32.mrf.mxu1  ;;  %3406 = vmatmul.msk.f32.gmra.mxu0 %vm328_vm1, %v4351_v2 }
 0x14e   : > { %v4359_v45 = vadd.f32 %v1707_v58, %v1509_v43  ;;  %3338 = vmatmul.msk.f32.gmra.mxu2 %vm328_vm1, %v4353_v31  ;;  %v1559_v58 = vld [vmem:[#allocation2 + $0x151] sm:$0xff]  ;;  %v1003_v43 = vld [vmem:[#allocation2 + $0x13a] sm:$0xff] }
 0x14f   : > { %3372 = vmatmul.msk.f32.gmra.mxu3 %vm328_vm1, %v3869_v50  ;;  %v677_v50 = vadd.f32 %v4211_v32, %v4072_v44  ;;  %v1004_v44 = vld [vmem:[#allocation2 + $0x142] sm:$0xff] }
 0x150   : > { %4944 = vst [vmem:[#allocation43_spill] sm:$0xff] %v4359_v45  ;;  %3305 = vmatmul.msk.f32.gmra.mxu1 %vm328_vm1, %v4335_v61 }
 0x151   : > { %v1154_v14 = vpop.f32.mrf.mxu2  ;;  %v955_v28 = vadd.f32 %v879_v12, %v677_v50 }
 0x152   : > { %v1232_v57 = vadd.f32 %v1154_v14, %v954_v59  ;;  %v1432_v7 = vpop.f32.mrf.mxu3  ;;  %v1713_v38 = vpop.f32.mrf.mxu0 }
 0x154   : > { %v1510_v45 = vadd.f32 %v1432_v7, %v1232_v57 }
 0x155   : > { %v882_v10 = vpop.f32.mrf.mxu1  ;;  %3407 = vmatmul.msk.f32.gmra.mxu0 %vm328_vm1, %v1559_v58 }
 0x156   : > { %v4372_v36 = vadd.f32 %v1710_v11, %v1510_v45  ;;  %3339 = vmatmul.msk.f32.gmra.mxu2 %vm328_vm1, %v1003_v43 }
 0x157   : > { %3373 = vmatmul.msk.f32.gmra.mxu3 %vm328_vm1, %v3890_v55  ;;  %v678_v55 = vadd.f32 %v4211_v32, %v4092_v52  ;;  %v679_v52 = vadd.f32 %v4211_v32, %v4112_v9  ;;  %v680_v9 = vadd.f32 %v4211_v32, %v4132_v17  ;;  %v681_v17 = vadd.f32 %v4211_v32, %v4152_v15 }
 0x158   : > { %4945 = vst [vmem:[#allocation44_spill] sm:$0xff] %v4372_v36  ;;  %3306 = vmatmul.msk.f32.gmra.mxu1 %vm328_vm1, %v4351_v2  ;;  %v682_v15 = vadd.f32 %v4211_v32, %v4172_v0  ;;  %v683_v0 = vadd.f32 %v4211_v32, %v4060_v39  ;;  %v684_v39 = vadd.f32 %v4211_v32, %v4082_v30 }
 0x159   : > { %v1157_v59 = vpop.f32.mrf.mxu2  ;;  %v956_v12 = vadd.f32 %v882_v10, %v678_v55  ;;  %v1562_v55 = vld [vmem:[#allocation2 + $0x171] sm:$0xff]  ;;  %v685_v30 = vadd.f32 %v4211_v32, %v4102_v40  ;;  %v686_v40 = vadd.f32 %v4211_v32, %v4122_v51  ;;  %v4946_v51 = vld [vmem:[#allocation6_spill] sm:$0xff] }
 0x15a   : > { %v1233_v14 = vadd.f32 %v1157_v59, %v955_v28  ;;  %v1435_v57 = vpop.f32.mrf.mxu3  ;;  %v1716_v7 = vpop.f32.mrf.mxu0 }
 0x15c   : > { %v1511_v11 = vadd.f32 %v1435_v57, %v1233_v14  ;;  %v1561_v14 = vld [vmem:[#allocation2 + $0x169] sm:$0xff]  ;;  %v1005_v57 = vld [vmem:[#allocation2 + $0x152] sm:$0xff] }
 0x15d   : > { %v885_v45 = vpop.f32.mrf.mxu1  ;;  %3408 = vmatmul.msk.f32.gmra.mxu0 %vm328_vm1, %v1560_v63 }
 0x15e   : > { %v4384_v43 = vadd.f32 %v1713_v38, %v1511_v11  ;;  %3340 = vmatmul.msk.f32.gmra.mxu2 %vm328_vm1, %v1004_v44 }
 0x15f   : > { %3374 = vmatmul.msk.f32.gmra.mxu3 %vm328_vm1, %v3918_v62  ;;  %v957_v62 = vadd.f32 %v885_v45, %v679_v52  ;;  %v1007_v52 = vld [vmem:[#allocation2 + $0x16a] sm:$0xff] }
 0x160   : > { %3307 = vmatmul.msk.f32.gmra.mxu1 %vm328_vm1, %v1559_v58 }
 0x161   : > { %v1160_v50 = vpop.f32.mrf.mxu2 }
 0x162   : > { %v1234_v37 = vadd.f32 %v1160_v50, %v956_v12  ;;  %v1438_v28 = vpop.f32.mrf.mxu3  ;;  %v1719_v59 = vpop.f32.mrf.mxu0  ;;  %v1006_v12 = vld [vmem:[#allocation2 + $0x15a] sm:$0xff] }
 0x164   : > { %v1512_v36 = vadd.f32 %v1438_v28, %v1234_v37 }
 0x165   : > { %v888_v2 = vpop.f32.mrf.mxu1  ;;  %3409 = vmatmul.msk.f32.gmra.mxu0 %vm328_vm1, %v1561_v14 }
 0x166   : > { %v4393_v38 = vadd.f32 %v1716_v7, %v1512_v36  ;;  %3341 = vmatmul.msk.f32.gmra.mxu2 %vm328_vm1, %v1005_v57  ;;  %v1563_v57 = vld [vmem:[#allocation2 + $0x181] sm:$0xff] }
 0x167   : > { %3375 = vmatmul.msk.f32.gmra.mxu3 %vm328_vm1, %v3938_v4  ;;  %v958_v4 = vadd.f32 %v888_v2, %v680_v9  ;;  %v1008_v9 = vld [vmem:[#allocation2 + $0x172] sm:$0xff] }
 0x168   : > { %3308 = vmatmul.msk.f32.gmra.mxu1 %vm328_vm1, %v1560_v63 }
 0x169   : > { %v1163_v10 = vpop.f32.mrf.mxu2 }
 0x16a   : > { %v1235_v58 = vadd.f32 %v1163_v10, %v957_v62  ;;  %v1441_v44 = vpop.f32.mrf.mxu3  ;;  %v1722_v11 = vpop.f32.mrf.mxu0  ;;  %v1285_v10 = vld [vmem:[#allocation2 + $0x180] sm:$0xff] }
 0x16c   : > { %v1513_v50 = vadd.f32 %v1441_v44, %v1235_v58 }
 0x16d   : > { %v891_v37 = vpop.f32.mrf.mxu1  ;;  %3410 = vmatmul.msk.f32.gmra.mxu0 %vm328_vm1, %v1562_v55 }
 0x16e   : > { %v4402_v36 = vadd.f32 %v1719_v59, %v1513_v50  ;;  %3342 = vmatmul.msk.f32.gmra.mxu2 %vm328_vm1, %v1006_v12  ;;  %v1564_v50 = vld [vmem:[#allocation2 + $0x189] sm:$0xff] }
 0x16f   : > { %3376 = vmatmul.msk.f32.gmra.mxu3 %vm328_vm1, %v3954_v8  ;;  %v959_v8 = vadd.f32 %v891_v37, %v681_v17 }
 0x170   : > { %3309 = vmatmul.msk.f32.gmra.mxu1 %vm328_vm1, %v1561_v14 }
 0x171   : > { %v1166_v63 = vpop.f32.mrf.mxu2 }
 0x172   : > { %v1236_v7 = vadd.f32 %v1166_v63, %v958_v4  ;;  %v1444_v45 = vpop.f32.mrf.mxu3  ;;  %v1725_v28 = vpop.f32.mrf.mxu0  ;;  %v1286_v63 = vld [vmem:[#allocation2 + $0x188] sm:$0xff] }
 0x174   : > { %v1514_v62 = vadd.f32 %v1444_v45, %v1236_v7 }
 0x175   : > { %v894_v58 = vpop.f32.mrf.mxu1  ;;  %3411 = vmatmul.msk.f32.gmra.mxu0 %vm328_vm1, %v1563_v57 }
 0x176   : > { %v4411_v59 = vadd.f32 %v1722_v11, %v1514_v62  ;;  %3343 = vmatmul.msk.f32.gmra.mxu2 %vm328_vm1, %v1007_v52 }
 0x177   : > { %3377 = vmatmul.msk.f32.gmra.mxu3 %vm328_vm1, %v1285_v10 }
 0x178   : > { %3310 = vmatmul.msk.f32.gmra.mxu1 %vm328_vm1, %v1562_v55  ;;  %v960_v55 = vadd.f32 %v894_v58, %v682_v15 }
 0x179   : > { %v1169_v2 = vpop.f32.mrf.mxu2 }
 0x17a   : > { %v1237_v14 = vadd.f32 %v1169_v2, %v959_v8  ;;  %v1447_v44 = vpop.f32.mrf.mxu3  ;;  %v1728_v12 = vpop.f32.mrf.mxu0 }
 0x17c   : > { %v1515_v4 = vadd.f32 %v1447_v44, %v1237_v14 }
 0x17d   : > { %v897_v7 = vpop.f32.mrf.mxu1  ;;  %3412 = vmatmul.msk.f32.gmra.mxu0 %vm328_vm1, %v1564_v50 }
 0x17e   : > { %v4419_v11 = vadd.f32 %v1725_v28, %v1515_v4  ;;  %3344 = vmatmul.msk.f32.gmra.mxu2 %vm328_vm1, %v1008_v9 }
 0x17f   : > { %3378 = vmatmul.msk.f32.gmra.mxu3 %vm328_vm1, %v1286_v63 }
 0x180   : > { %3415 = vmatmul.msk.f32.vlgmr.msra.gmra.mxu1 %vm328_vm1, %v3975_v19  ;;  %v961_v19 = vadd.f32 %v897_v7, %v683_v0 }
 0x181   : > { %v1172_v37 = vpop.f32.mrf.mxu2 }
 0x182   : > { %v1238_v45 = vadd.f32 %v1172_v37, %v960_v55  ;;  %v1450_v57 = vpop.f32.mrf.mxu3  ;;  %v1731_v52 = vpop.f32.mrf.mxu0 }
 0x184   : > { %v1516_v62 = vadd.f32 %v1450_v57, %v1238_v45 }
 0x185   : > { %v900_v10 = vpop.f32.mrf.mxu1  ;;  %3517 = vmatmul.msk.f32.vlgmr.msra.gmra.mxu0 %vm328_vm1, %v3998_v23 }
 0x186   : > { %v4429_v28 = vadd.f32 %v1728_v12, %v1516_v62  ;;  %3449 = vmatmul.msk.f32.vlgmr.msra.gmra.mxu2 %vm328_vm1, %v3886_v53 }
 0x187   : > { %3483 = vmatmul.msk.f32.vlgmr.msra.gmra.mxu3 %vm328_vm1, %v3973_v18  ;;  %v962_v18 = vadd.f32 %v900_v10, %v684_v39  ;;  %v2094_v10 = vld [vmem:[#allocation2 + $0x60] sm:$0xff]  ;;  %v2095_v39 = vld [vmem:[#allocation2 + $0x68] sm:$0xff] }
 0x188   : > { %3416 = vmatmul.msk.f32.gmra.mxu1 %vm328_vm1, %v3986_v21 }
 0x189   : > { %v1175_v58 = vpop.f32.mrf.mxu2 }
 0x18a   : > { %v1239_v17 = vadd.f32 %v1175_v58, %v961_v19  ;;  %v1453_v8 = vpop.f32.mrf.mxu3  ;;  %v1734_v2 = vpop.f32.mrf.mxu0  ;;  %v4947_v58 = vld [vmem:[#allocation19_spill] sm:$0xff] }
 0x18c   : > { %v1517_v14 = vadd.f32 %v1453_v8, %v1239_v17 }
 0x18d   : > { %v903_v44 = vpop.f32.mrf.mxu1  ;;  %3518 = vmatmul.msk.f32.gmra.mxu0 %vm328_vm1, %v4010_v25 }
 0x18e   : > { %v4441_v53 = vadd.f32 %v1731_v52, %v1517_v14  ;;  %3450 = vmatmul.msk.f32.gmra.mxu2 %vm328_vm1, %v3914_v60 }
 0x18f   : > { %3484 = vmatmul.msk.f32.gmra.mxu3 %vm328_vm1, %v3984_v20  ;;  %v963_v20 = vadd.f32 %v903_v44, %v685_v30 }
 0x190   : > { %3417 = vmatmul.msk.f32.gmra.mxu1 %vm328_vm1, %v3998_v23 }
 0x191   : > { %v1178_v21 = vpop.f32.mrf.mxu2 }
 0x192   : > { %v1240_v12 = vadd.f32 %v1178_v21, %v962_v18  ;;  %v1456_v50 = vpop.f32.mrf.mxu3  ;;  %v1737_v9 = vpop.f32.mrf.mxu0 }
 0x194   : > { %v1518_v4 = vadd.f32 %v1456_v50, %v1240_v12  ;;  %v4949_v12 = vld [vmem:[#allocation9_spill] sm:$0xff]  ;;  %v4950_v50 = vld [vmem:[#allocation23_spill] sm:$0xff] }
 0x195   : > { %v906_v63 = vpop.f32.mrf.mxu1  ;;  %3519 = vmatmul.msk.f32.gmra.mxu0 %vm328_vm1, %v4022_v29 }
 0x196   : > { %v4453_v60 = vadd.f32 %v1734_v2, %v1518_v4  ;;  %3451 = vmatmul.msk.f32.gmra.mxu2 %vm328_vm1, %v3934_v1 }
 0x197   : > { %3485 = vmatmul.msk.f32.gmra.mxu3 %vm328_vm1, %v3996_v22  ;;  %v964_v22 = vadd.f32 %v906_v63, %v686_v40  ;;  %v4951_v63 = vld [vmem:[#allocation4_spill] sm:$0xff]  ;;  %v4953_v40 = vld [vmem:[#allocation27_spill] sm:$0xff] }
 0x198   : > { %3418 = vmatmul.msk.f32.gmra.mxu1 %vm328_vm1, %v4010_v25 }
 0x199   : > { %v1181_v23 = vpop.f32.mrf.mxu2 }
 0x19a   : > { %v1241_v7 = vadd.f32 %v1181_v23, %v963_v20  ;;  %v1459_v15 = vpop.f32.mrf.mxu3  ;;  %v1740_v55 = vpop.f32.mrf.mxu0 }
 0x19c   : > { %v1519_v37 = vadd.f32 %v1459_v15, %v1241_v7  ;;  %v2096_v15 = vld [vmem:[#allocation2 + $0x78] sm:$0xff] }
 0x19d   : > { %v909_v45 = vpop.f32.mrf.mxu1  ;;  %3520 = vmatmul.msk.f32.gmra.mxu0 %vm328_vm1, %v4036_v33 }
 0x19e   : > { %v4465_v1 = vadd.f32 %v1737_v9, %v1519_v37  ;;  %3452 = vmatmul.msk.f32.gmra.mxu2 %vm328_vm1, %v3950_v6  ;;  %v687_v6 = vadd.f32 %v4211_v32, %v4947_v58  ;;  %v688_v9 = vadd.f32 %v4211_v32, %v4950_v50  ;;  %v2098_v50 = vld [vmem:[#allocation2 + $0x90] sm:$0xff] }
 0x19f   : > { %3486 = vmatmul.msk.f32.gmra.mxu3 %vm328_vm1, %v4008_v24  ;;  %v4948_v24 = vld [vmem:[#allocation3_spill] sm:$0xff] }
 0x1a0   : > { %3419 = vmatmul.msk.f32.gmra.mxu1 %vm328_vm1, %v4022_v29  ;;  %v965_v29 = vadd.f32 %v909_v45, %v687_v6  ;;  %v4952_v45 = vld [vmem:[#allocation12_spill] sm:$0xff] }
 0x1a1   : > { %v1184_v25 = vpop.f32.mrf.mxu2 }
 0x1a2   : > { %v1242_v57 = vadd.f32 %v1184_v25, %v964_v22  ;;  %v1462_v52 = vpop.f32.mrf.mxu3  ;;  %v1743_v62 = vpop.f32.mrf.mxu0  ;;  %v689_v22 = vadd.f32 %v4211_v32, %v4953_v40 }
 0x1a4   : > { %v1520_v0 = vadd.f32 %v1462_v52, %v1242_v57  ;;  %v4954_v57 = vld [vmem:[#allocation5_spill] sm:$0xff] }
 0x1a5   : > { %v912_v19 = vpop.f32.mrf.mxu1  ;;  %3521 = vmatmul.msk.f32.gmra.mxu0 %vm328_vm1, %v4946_v51 }
 0x1a6   : > { %v4477_v17 = vadd.f32 %v1740_v55, %v1520_v0  ;;  %3453 = vmatmul.msk.f32.gmra.mxu2 %vm328_vm1, %v2094_v10 }
 0x1a7   : > { %3487 = vmatmul.msk.f32.gmra.mxu3 %vm328_vm1, %v4948_v24  ;;  %v4955_v24 = vld [vmem:[#allocation15_spill] sm:$0xff] }
 0x1a8   : > { %3420 = vmatmul.msk.f32.gmra.mxu1 %vm328_vm1, %v4036_v33  ;;  %v966_v33 = vadd.f32 %v912_v19, %v688_v9 }
 0x1a9   : > { %v1187_v8 = vpop.f32.mrf.mxu2 }
 0x1aa   : > { %v1243_v2 = vadd.f32 %v1187_v8, %v965_v29  ;;  %v1465_v14 = vpop.f32.mrf.mxu3  ;;  %v1746_v44 = vpop.f32.mrf.mxu0  ;;  %v4956_v29 = vld [vmem:[#allocation31_spill] sm:$0xff] }
 0x1ab   : > { %v690_v8 = vadd.f32 %v4211_v32, %v4956_v29 }
 0x1ac   : > { %v1521_v18 = vadd.f32 %v1465_v14, %v1243_v2  ;;  %v4957_v14 = vld [vmem:[#allocation8_spill] sm:$0xff] }
 0x1ad   : > { %v915_v21 = vpop.f32.mrf.mxu1  ;;  %3522 = vmatmul.msk.f32.gmra.mxu0 %vm328_vm1, %v4949_v12 }
 0x1ae   : > { %v4488_v4 = vadd.f32 %v1743_v62, %v1521_v18  ;;  %3454 = vmatmul.msk.f32.gmra.mxu2 %vm328_vm1, %v2095_v39  ;;  %v967_v52 = vadd.f32 %v915_v21, %v689_v22  ;;  %v2099_v22 = vld [vmem:[#allocation2 + $0x98] sm:$0xff] }
 0x1af   : > { %3488 = vmatmul.msk.f32.gmra.mxu3 %vm328_vm1, %v4951_v63 }
 0x1b0   : > { %3421 = vmatmul.msk.f32.gmra.mxu1 %vm328_vm1, %v4946_v51  ;;  %v2097_v51 = vld [vmem:[#allocation2 + $0x80] sm:$0xff] }
 0x1b1   : > { %v1190_v30 = vpop.f32.mrf.mxu2 }
 0x1b2   : > { %v1244_v20 = vadd.f32 %v1190_v30, %v966_v33  ;;  %v1468_v23 = vpop.f32.mrf.mxu3  ;;  %v1749_v7 = vpop.f32.mrf.mxu0  ;;  %v4958_v33 = vld [vmem:[#allocation18_spill] sm:$0xff]  ;;  %v4959_v30 = vld [vmem:[#allocation7_spill] sm:$0xff] }
 0x1b4   : > { %v1522_v55 = vadd.f32 %v1468_v23, %v1244_v20  ;;  %v691_v20 = vadd.f32 %v4211_v32, %v4959_v30 }
 0x1b5   : > { %v918_v37 = vpop.f32.mrf.mxu1  ;;  %3523 = vmatmul.msk.f32.gmra.mxu0 %vm328_vm1, %v4952_v45 }
 0x1b6   : > { %v4499_v25 = vadd.f32 %v1746_v44, %v1522_v55  ;;  %3455 = vmatmul.msk.f32.gmra.mxu2 %vm328_vm1, %v2096_v15  ;;  %v968_v44 = vadd.f32 %v918_v37, %v690_v8 }
 0x1b7   : > { %3489 = vmatmul.msk.f32.gmra.mxu3 %vm328_vm1, %v4954_v57 }
 0x1b8   : > { %3422 = vmatmul.msk.f32.gmra.mxu1 %vm328_vm1, %v4949_v12 }
 0x1b9   : > { %v1193_v62 = vpop.f32.mrf.mxu2 }
 0x1ba   : > { %v1245_v10 = vadd.f32 %v1193_v62, %v967_v52  ;;  %v1471_v0 = vpop.f32.mrf.mxu3  ;;  %v1752_v19 = vpop.f32.mrf.mxu0  ;;  %v4961_v62 = vld [vmem:[#allocation22_spill] sm:$0xff] }
 0x1bc   : > { %v1523_v58 = vadd.f32 %v1471_v0, %v1245_v10  ;;  %v4962_v10 = vld [vmem:[#allocation10_spill] sm:$0xff] }
 0x1bd   : > { %v921_v6 = vpop.f32.mrf.mxu1  ;;  %3524 = vmatmul.msk.f32.gmra.mxu0 %vm328_vm1, %v4955_v24  ;;  %v692_v0 = vadd.f32 %v4211_v32, %v4962_v10 }
 0x1be   : > { %v4510_v2 = vadd.f32 %v1749_v7, %v1523_v58  ;;  %3456 = vmatmul.msk.f32.gmra.mxu2 %vm328_vm1, %v2097_v51  ;;  %v4960_v7 = vld [vmem:[#allocation11_spill] sm:$0xff]  ;;  %v969_v15 = vadd.f32 %v921_v6, %v691_v20  ;;  %v4963_v51 = vld [vmem:[#allocation14_spill] sm:$0xff] }
 0x1bf   : > { %3490 = vmatmul.msk.f32.gmra.mxu3 %vm328_vm1, %v4957_v14  ;;  %v2100_v14 = vld [vmem:[#allocation2 + $0xa8] sm:$0xff] }
 0x1c0   : > { %3423 = vmatmul.msk.f32.gmra.mxu1 %vm328_vm1, %v4952_v45 }
 0x1c1   : > { %v1196_v39 = vpop.f32.mrf.mxu2 }
 0x1c2   : > { %v1246_v18 = vadd.f32 %v1196_v39, %v968_v44  ;;  %v1474_v21 = vpop.f32.mrf.mxu3  ;;  %v1755_v12 = vpop.f32.mrf.mxu0 }
 0x1c4   : > { %v1524_v9 = vadd.f32 %v1474_v21, %v1246_v18  ;;  %v4964_v18 = vld [vmem:[#allocation26_spill] sm:$0xff]  ;;  %v4965_v21 = vld [vmem:[#allocation13_spill] sm:$0xff] }
 0x1c5   : > { %v924_v63 = vpop.f32.mrf.mxu1  ;;  %3525 = vmatmul.msk.f32.gmra.mxu0 %vm328_vm1, %v4958_v33 }
 0x1c6   : > { %v4521_v23 = vadd.f32 %v1752_v19, %v1524_v9  ;;  %3457 = vmatmul.msk.f32.gmra.mxu2 %vm328_vm1, %v2098_v50  ;;  %v970_v58 = vadd.f32 %v924_v63, %v692_v0  ;;  %v4966_v9 = vld [vmem:[#allocation17_spill] sm:$0xff] }
 0x1c7   : > { %3491 = vmatmul.msk.f32.gmra.mxu3 %vm328_vm1, %v4960_v7 }
 0x1c8   : > { %3424 = vmatmul.msk.f32.gmra.mxu1 %vm328_vm1, %v4955_v24 }
 0x1c9   : > { %v1199_v55 = vpop.f32.mrf.mxu2 }
 0x1ca   : > { %v1247_v37 = vadd.f32 %v1199_v55, %v969_v15  ;;  %v1477_v45 = vpop.f32.mrf.mxu3  ;;  %v1758_v40 = vpop.f32.mrf.mxu0  ;;  %v2101_v15 = vld [vmem:[#allocation2 + $0xb0] sm:$0xff] }
 0x1cc   : > { %v1525_v57 = vadd.f32 %v1477_v45, %v1247_v37  ;;  %v4967_v45 = vld [vmem:[#allocation30_spill] sm:$0xff] }
 0x1cd   : > { %v927_v52 = vpop.f32.mrf.mxu1  ;;  %3526 = vmatmul.msk.f32.gmra.mxu0 %vm328_vm1, %v4961_v62 }
 0x1ce   : > { %v4532_v19 = vadd.f32 %v1755_v12, %v1525_v57  ;;  %3458 = vmatmul.msk.f32.gmra.mxu2 %vm328_vm1, %v2099_v22  ;;  %v693_v12 = vadd.f32 %v4211_v32, %v4965_v21 }
 0x1cf   : > { %3492 = vmatmul.msk.f32.gmra.mxu3 %vm328_vm1, %v4963_v51 }
 0x1d0   : > { %3425 = vmatmul.msk.f32.gmra.mxu1 %vm328_vm1, %v4958_v33  ;;  %v971_v63 = vadd.f32 %v927_v52, %v693_v12  ;;  %v4969_v52 = vld [vmem:[#allocation21_spill] sm:$0xff] }
 0x1d1   : > { %v1202_v6 = vpop.f32.mrf.mxu2 }
 0x1d2   : > { %v1248_v24 = vadd.f32 %v1202_v6, %v970_v58  ;;  %v1480_v29 = vpop.f32.mrf.mxu3  ;;  %v1761_v8 = vpop.f32.mrf.mxu0  ;;  %v2102_v6 = vld [vmem:[#allocation2 + $0xc0] sm:$0xff] }
 0x1d4   : > { %v1526_v44 = vadd.f32 %v1480_v29, %v1248_v24 }
 0x1d5   : > { %v930_v39 = vpop.f32.mrf.mxu1  ;;  %3527 = vmatmul.msk.f32.gmra.mxu0 %vm328_vm1, %v4964_v18 }
 0x1d6   : > { %v4543_v50 = vadd.f32 %v1758_v40, %v1526_v44  ;;  %3459 = vmatmul.msk.f32.gmra.mxu2 %vm328_vm1, %v2100_v14  ;;  %v4968_v40 = vld [vmem:[#allocation16_spill] sm:$0xff]  ;;  %v4970_v14 = vld [vmem:[#allocation33_spill] sm:$0xff] }
 0x1d7   : > { %3493 = vmatmul.msk.f32.gmra.mxu3 %vm328_vm1, %v4966_v9  ;;  %v694_v22 = vadd.f32 %v4211_v32, %v4968_v40 }
 0x1d8   : > { %3426 = vmatmul.msk.f32.gmra.mxu1 %vm328_vm1, %v4961_v62 }
 0x1d9   : > { %v1205_v33 = vpop.f32.mrf.mxu2  ;;  %v972_v62 = vadd.f32 %v930_v39, %v694_v22  ;;  %v4972_v39 = vld [vmem:[#allocation25_spill] sm:$0xff] }
 0x1da   : > { %v1249_v30 = vadd.f32 %v1205_v33, %v971_v63  ;;  %v1483_v20 = vpop.f32.mrf.mxu3  ;;  %v1764_v7 = vpop.f32.mrf.mxu0 }
 0x1dc   : > { %v1527_v55 = vadd.f32 %v1483_v20, %v1249_v30  ;;  %v2103_v30 = vld [vmem:[#allocation2 + $0xc8] sm:$0xff] }
 0x1dd   : > { %v933_v37 = vpop.f32.mrf.mxu1  ;;  %3528 = vmatmul.msk.f32.gmra.mxu0 %vm328_vm1, %v4967_v45 }
 0x1de   : > { %v4554_v57 = vadd.f32 %v1761_v8, %v1527_v55  ;;  %3460 = vmatmul.msk.f32.gmra.mxu2 %vm328_vm1, %v2101_v15  ;;  %v4971_v8 = vld [vmem:[#allocation20_spill] sm:$0xff] }
 0x1df   : > { %3494 = vmatmul.msk.f32.gmra.mxu3 %vm328_vm1, %v4969_v52  ;;  %v695_v44 = vadd.f32 %v4211_v32, %v4971_v8 }
 0x1e0   : > { %3427 = vmatmul.msk.f32.gmra.mxu1 %vm328_vm1, %v4964_v18 }
 0x1e1   : > { %v1208_v10 = vpop.f32.mrf.mxu2  ;;  %v973_v18 = vadd.f32 %v933_v37, %v695_v44  ;;  %v4974_v37 = vld [vmem:[#allocation29_spill] sm:$0xff] }
 0x1e2   : > { %v1250_v0 = vadd.f32 %v1208_v10, %v972_v62  ;;  %v1486_v51 = vpop.f32.mrf.mxu3  ;;  %v1767_v58 = vpop.f32.mrf.mxu0 }
 0x1e4   : > { %v1528_v24 = vadd.f32 %v1486_v51, %v1250_v0  ;;  %v2104_v0 = vld [vmem:[#allocation2 + $0xd8] sm:$0xff] }
 0x1e5   : > { %v936_v29 = vpop.f32.mrf.mxu1  ;;  %3529 = vmatmul.msk.f32.gmra.mxu0 %vm328_vm1, %v4970_v14 }
 0x1e6   : > { %v4565_v21 = vadd.f32 %v1764_v7, %v1528_v24  ;;  %3461 = vmatmul.msk.f32.gmra.mxu2 %vm328_vm1, %v2102_v6  ;;  %v4973_v7 = vld [vmem:[#allocation24_spill] sm:$0xff] }
 0x1e7   : > { %3495 = vmatmul.msk.f32.gmra.mxu3 %vm328_vm1, %v4972_v39  ;;  %v696_v55 = vadd.f32 %v4211_v32, %v4973_v7 }
 0x1e8   : > { %3428 = vmatmul.msk.f32.gmra.mxu1 %vm328_vm1, %v4967_v45 }
 0x1e9   : > { %v1211_v12 = vpop.f32.mrf.mxu2  ;;  %v974_v45 = vadd.f32 %v936_v29, %v696_v55 }
 0x1ea   : > { %v1251_v9 = vadd.f32 %v1211_v12, %v973_v18  ;;  %v1489_v63 = vpop.f32.mrf.mxu3  ;;  %v1770_v33 = vpop.f32.mrf.mxu0  ;;  %v2105_v12 = vld [vmem:[#allocation2 + $0xe0] sm:$0xff] }
 0x1ec   : > { %v1529_v20 = vadd.f32 %v1489_v63, %v1251_v9 }
 0x1ed   : > { %v939_v15 = vpop.f32.mrf.mxu1  ;;  %3530 = vmatmul.msk.f32.gmra.mxu0 %vm328_vm1, %v4225_v56 }
 0x1ee   : > { %v4576_v40 = vadd.f32 %v1767_v58, %v1529_v20  ;;  %3462 = vmatmul.msk.f32.gmra.mxu2 %vm328_vm1, %v2103_v30  ;;  %v4975_v58 = vld [vmem:[#allocation28_spill] sm:$0xff] }
 0x1ef   : > { %3496 = vmatmul.msk.f32.gmra.mxu3 %vm328_vm1, %v4974_v37  ;;  %v697_v24 = vadd.f32 %v4211_v32, %v4975_v58  ;;  %v2106_v37 = vld [vmem:[#allocation2 + $0xf0] sm:$0xff] }
 0x1f0   : > { %3429 = vmatmul.msk.f32.gmra.mxu1 %vm328_vm1, %v4970_v14 }
 0x1f1   : > { %v1214_v22 = vpop.f32.mrf.mxu2  ;;  %v975_v29 = vadd.f32 %v939_v15, %v697_v24 }
 0x1f2   : > { %v1252_v52 = vadd.f32 %v1214_v22, %v974_v45  ;;  %v1492_v62 = vpop.f32.mrf.mxu3  ;;  %v1773_v10 = vpop.f32.mrf.mxu0 }
 0x1f4   : > { %v1530_v51 = vadd.f32 %v1492_v62, %v1252_v52 }
 0x1f5   : > { %v942_v6 = vpop.f32.mrf.mxu1  ;;  %3531 = vmatmul.msk.f32.gmra.mxu0 %vm328_vm1, %v4241_v5 }
 0x1f6   : > { %v4587_v8 = vadd.f32 %v1770_v33, %v1530_v51  ;;  %3463 = vmatmul.msk.f32.gmra.mxu2 %vm328_vm1, %v2104_v0  ;;  %v4976_v33 = vld [vmem:[#allocation32_spill] sm:$0xff] }
 0x1f7   : > { %3497 = vmatmul.msk.f32.gmra.mxu3 %vm328_vm1, %v4204_v42  ;;  %v698_v30 = vadd.f32 %v4211_v32, %v4976_v33  ;;  %v2107_v51 = vld [vmem:[#allocation2 + $0xf8] sm:$0xff] }
 0x1f8   : > { %3430 = vmatmul.msk.f32.gmra.mxu1 %vm328_vm1, %v4225_v56 }
 0x1f9   : > { %v1217_v14 = vpop.f32.mrf.mxu2  ;;  %v976_v42 = vadd.f32 %v942_v6, %v698_v30 }
 0x1fa   : > { %v1253_v44 = vadd.f32 %v1217_v14, %v975_v29  ;;  %v1495_v39 = vpop.f32.mrf.mxu3  ;;  %v1776_v18 = vpop.f32.mrf.mxu0 }
 0x1fc   : > { %v1531_v9 = vadd.f32 %v1495_v39, %v1253_v44 }
 0x1fd   : > { %v1961_v63 = vpop.f32.mrf.mxu1  ;;  %3532 = vmatmul.msk.f32.gmra.mxu0 %vm328_vm1, %v4257_v49 }
 0x1fe   : > { %v4598_v20 = vadd.f32 %v1773_v10, %v1531_v9  ;;  %3464 = vmatmul.msk.f32.gmra.mxu2 %vm328_vm1, %v2105_v12 }
 0x1ff   : > { %3498 = vmatmul.msk.f32.gmra.mxu3 %vm328_vm1, %v4223_v27  ;;  %v4977_v27 = vld [vmem:[#allocation34_spill] sm:$0xff] }
 0x200   : > { %3431 = vmatmul.msk.f32.gmra.mxu1 %vm328_vm1, %v4241_v5  ;;  %v2057_v5 = vadd.f32 %v1961_v63, %v4977_v27 }
 0x201   : > { %v1220_v56 = vpop.f32.mrf.mxu2 }
 0x202   : > { %v1254_v15 = vadd.f32 %v1220_v56, %v976_v42  ;;  %v1498_v7 = vpop.f32.mrf.mxu3  ;;  %v2796_v55 = vpop.f32.mrf.mxu0 }
 0x204   : > { %v1532_v45 = vadd.f32 %v1498_v7, %v1254_v15 }
 0x205   : > { %v1964_v22 = vpop.f32.mrf.mxu1  ;;  %3533 = vmatmul.msk.f32.gmra.mxu0 %vm328_vm1, %v4273_v3 }
 0x206   : > { %v4607_v32 = vadd.f32 %v1776_v18, %v1532_v45  ;;  %3465 = vmatmul.msk.f32.gmra.mxu2 %vm328_vm1, %v2106_v37  ;;  %v2108_v18 = vld [vmem:[#allocation2 + $0x108] sm:$0xff] }
 0x207   : > { %3499 = vmatmul.msk.f32.gmra.mxu3 %vm328_vm1, %v4239_v47 }
 0x208   : > { %3432 = vmatmul.msk.f32.gmra.mxu1 %vm328_vm1, %v4257_v49  ;;  %v4978_v49 = vld [vmem:[#allocation35_spill] sm:$0xff] }
 0x209   : > { %v2240_v52 = vpop.f32.mrf.mxu2  ;;  %v2058_v24 = vadd.f32 %v1964_v22, %v4978_v49 }
 0x20a   : > { %v2336_v62 = vadd.f32 %v2240_v52, %v2057_v5  ;;  %v2518_v10 = vpop.f32.mrf.mxu3  ;;  %v2799_v0 = vpop.f32.mrf.mxu0  ;;  %v2109_v5 = vld [vmem:[#allocation2 + $0x110] sm:$0xff] }
 0x20c   : > { %v2614_v6 = vadd.f32 %v2518_v10, %v2336_v62 }
 0x20d   : > { %v1967_v47 = vpop.f32.mrf.mxu1  ;;  %3534 = vmatmul.msk.f32.gmra.mxu0 %vm328_vm1, %v4289_v34 }
 0x20e   : > { %v2892_v58 = vadd.f32 %v2796_v55, %v2614_v6  ;;  %3466 = vmatmul.msk.f32.gmra.mxu2 %vm328_vm1, %v2107_v51 }
 0x20f   : > { %3500 = vmatmul.msk.f32.gmra.mxu3 %vm328_vm1, %v4255_v13 }
 0x210   : > { %2925 = vst.msk [vmem:[%s4620_s28] sm:$0xff] %vm2924_vm3, %v2892_v58  ;;  %3433 = vmatmul.msk.f32.gmra.mxu1 %vm328_vm1, %v4273_v3  ;;  %v3028_v63 = vmul.f32 %v2892_v58, %v2892_v58  ;;  %v2957_v33 = vsel %vm2924_vm3, %v2892_v58, 0.0  ;;  %v4979_v3 = vld [vmem:[#allocation36_spill] sm:$0xff] }
 0x211   : > { %v2243_v29 = vpop.f32.mrf.mxu2  ;;  %v2059_v30 = vadd.f32 %v1967_v47, %v4979_v3 }
 0x212   : > { %v2337_v14 = vadd.f32 %v2243_v29, %v2058_v24  ;;  %v2521_v44 = vpop.f32.mrf.mxu3  ;;  %v2802_v39 = vpop.f32.mrf.mxu0  ;;  %v3060_v55 = vsel %vm2924_vm3, %v3028_v63, 0.0 }
 0x214   : > { %v2615_v12 = vadd.f32 %v2521_v44, %v2337_v14 }
 0x215   : > { %v1970_v9 = vpop.f32.mrf.mxu1  ;;  %3535 = vmatmul.msk.f32.gmra.mxu0 %vm328_vm1, %v4305_v41 }
 0x216   : > { %v2893_v13 = vadd.f32 %v2799_v0, %v2615_v12  ;;  %3467 = vmatmul.msk.f32.gmra.mxu2 %vm328_vm1, %v2108_v18 }
 0x217   : > { %3501 = vmatmul.msk.f32.gmra.mxu3 %vm328_vm1, %v4271_v16 }
 0x218   : > { %2926 = vst.msk [vmem:[%s4620_s28 + $0x8] sm:$0xff] %vm2924_vm3, %v2893_v13  ;;  %v2958_v42 = vsel %vm2924_vm3, %v2893_v13, 0.0  ;;  %v3029_v56 = vmul.f32 %v2893_v13, %v2893_v13  ;;  %3434 = vmatmul.msk.f32.gmra.mxu1 %vm328_vm1, %v4289_v34  ;;  %v4980_v34 = vld [vmem:[#allocation37_spill] sm:$0xff] }
 0x219   : > { %v2959_v15 = vadd.f32 %v2958_v42, %v2957_v33  ;;  %v2246_v7 = vpop.f32.mrf.mxu2  ;;  %v2060_v0 = vadd.f32 %v1970_v9, %v4980_v34 }
 0x21a   : > { %v3061_v37 = vsel %vm2924_vm3, %v3029_v56, 0.0  ;;  %v2338_v16 = vadd.f32 %v2246_v7, %v2059_v30  ;;  %v2524_v45 = vpop.f32.mrf.mxu3  ;;  %v2805_v22 = vpop.f32.mrf.mxu0 }
 0x21b   : > { %v3062_v27 = vadd.f32 %v3061_v37, %v3060_v55  ;;  %v1833_v37 = vld [vmem:[#allocation2 + $0x122] sm:$0xff] }
 0x21c   : > { %v2616_v52 = vadd.f32 %v2524_v45, %v2338_v16 }
 0x21d   : > { %v1973_v62 = vpop.f32.mrf.mxu1  ;;  %3536 = vmatmul.msk.f32.gmra.mxu0 %vm328_vm1, %v4321_v46 }
 0x21e   : > { %v2894_v10 = vadd.f32 %v2802_v39, %v2616_v52  ;;  %3468 = vmatmul.msk.f32.gmra.mxu2 %vm328_vm1, %v2109_v5 }
 0x21f   : > { %3502 = vmatmul.msk.f32.gmra.mxu3 %vm328_vm1, %v4287_v35  ;;  %v2110_v35 = vld [vmem:[#allocation2 + $0x120] sm:$0xff] }
 0x220   : > { %2927 = vst.msk [vmem:[%s4620_s28 + $0x10] sm:$0xff] %vm2924_vm3, %v2894_v10  ;;  %v2960_v51 = vsel %vm2924_vm3, %v2894_v10, 0.0  ;;  %v3030_v6 = vmul.f32 %v2894_v10, %v2894_v10  ;;  %3435 = vmatmul.msk.f32.gmra.mxu1 %vm328_vm1, %v4305_v41  ;;  %v4981_v41 = vld [vmem:[#allocation38_spill] sm:$0xff] }
 0x221   : > { %v2961_v47 = vadd.f32 %v2960_v51, %v2959_v15  ;;  %v2249_v58 = vpop.f32.mrf.mxu2  ;;  %v2061_v9 = vadd.f32 %v1973_v62, %v4981_v41 }
 0x222   : > { %v3063_v49 = vsel %vm2924_vm3, %v3030_v6, 0.0  ;;  %v2339_v24 = vadd.f32 %v2249_v58, %v2060_v0  ;;  %v2527_v29 = vpop.f32.mrf.mxu3  ;;  %v2808_v14 = vpop.f32.mrf.mxu0  ;;  %v2668_v0 = vld [vmem:[#allocation2 + $0x13a] sm:$0xff]  ;;  %v1834_v58 = vld [vmem:[#allocation2 + $0x12a] sm:$0xff] }
 0x223   : > { %v3064_v44 = vadd.f32 %v3063_v49, %v3062_v27 }
 0x224   : > { %v2617_v39 = vadd.f32 %v2527_v29, %v2339_v24  ;;  %v4983_v24 = vld [vmem:[#allocation40_spill] sm:$0xff] }
 0x225   : > { %v1976_v18 = vpop.f32.mrf.mxu1  ;;  %3537 = vmatmul.msk.f32.gmra.mxu0 %vm328_vm1, %v4337_v26 }
 0x226   : > { %v2895_v12 = vadd.f32 %v2805_v22, %v2617_v39  ;;  %3469 = vmatmul.msk.f32.gmra.mxu2 %vm328_vm1, %v2110_v35 }
 0x227   : > { %3503 = vmatmul.msk.f32.gmra.mxu3 %vm328_vm1, %v4303_v48  ;;  %v2111_v48 = vld [vmem:[#allocation2 + $0x128] sm:$0xff] }
 0x228   : > { %2928 = vst.msk [vmem:[%s4620_s28 + $0x18] sm:$0xff] %vm2924_vm3, %v2895_v12  ;;  %v2962_v63 = vsel %vm2924_vm3, %v2895_v12, 0.0  ;;  %v3031_v13 = vmul.f32 %v2895_v12, %v2895_v12  ;;  %3436 = vmatmul.msk.f32.gmra.mxu1 %vm328_vm1, %v4321_v46  ;;  %v4982_v46 = vld [vmem:[#allocation39_spill] sm:$0xff] }
 0x229   : > { %v2963_v33 = vadd.f32 %v2962_v63, %v2961_v47  ;;  %v2252_v3 = vpop.f32.mrf.mxu2  ;;  %v2062_v45 = vadd.f32 %v1976_v18, %v4982_v46  ;;  %v2669_v63 = vld [vmem:[#allocation2 + $0x142] sm:$0xff] }
 0x22a   : > { %v3065_v26 = vsel %vm2924_vm3, %v3031_v13, 0.0  ;;  %v2340_v30 = vadd.f32 %v2252_v3, %v2061_v9  ;;  %v2530_v42 = vpop.f32.mrf.mxu3  ;;  %v2811_v56 = vpop.f32.mrf.mxu0 }
 0x22b   : > { %v3066_v15 = vadd.f32 %v3065_v26, %v3064_v44 }
 0x22c   : > { %v2618_v7 = vadd.f32 %v2530_v42, %v2340_v30  ;;  %v4984_v30 = vld [vmem:[#allocation42_spill] sm:$0xff]  ;;  %v4985_v42 = vld [vmem:[#allocation41_spill] sm:$0xff] }
 0x22d   : > { %v1979_v55 = vpop.f32.mrf.mxu1  ;;  %3538 = vmatmul.msk.f32.gmra.mxu0 %vm328_vm1, %v4353_v31 }
 0x22e   : > { %v2896_v16 = vadd.f32 %v2808_v14, %v2618_v7  ;;  %3470 = vmatmul.msk.f32.gmra.mxu2 %vm328_vm1, %v2111_v48  ;;  %v2063_v29 = vadd.f32 %v1979_v55, %v4983_v24 }
 0x22f   : > { %3504 = vmatmul.msk.f32.gmra.mxu3 %vm328_vm1, %v4319_v54  ;;  %v2112_v54 = vld [vmem:[#allocation2 + $0x138] sm:$0xff] }
 0x230   : > { %2929 = vst.msk [vmem:[%s4620_s28 + $0x20] sm:$0xff] %vm2924_vm3, %v2896_v16  ;;  %v2964_v22 = vsel %vm2924_vm3, %v2896_v16, 0.0  ;;  %v3032_v27 = vmul.f32 %v2896_v16, %v2896_v16  ;;  %3437 = vmatmul.msk.f32.gmra.mxu1 %vm328_vm1, %v1833_v37 }
 0x231   : > { %v2965_v5 = vadd.f32 %v2964_v22, %v2963_v33  ;;  %v2255_v52 = vpop.f32.mrf.mxu2  ;;  %v2670_v22 = vld [vmem:[#allocation2 + $0x152] sm:$0xff] }
 0x232   : > { %v3067_v31 = vsel %vm2924_vm3, %v3032_v27, 0.0  ;;  %v2341_v62 = vadd.f32 %v2255_v52, %v2062_v45  ;;  %v2533_v10 = vpop.f32.mrf.mxu3  ;;  %v2814_v34 = vpop.f32.mrf.mxu0 }
 0x233   : > { %v3068_v51 = vadd.f32 %v3067_v31, %v3066_v15  ;;  %v2392_v31 = vld [vmem:[#allocation2 + $0x151] sm:$0xff] }
 0x234   : > { %v2619_v6 = vadd.f32 %v2533_v10, %v2341_v62 }
 0x235   : > { %v1982_v47 = vpop.f32.mrf.mxu1  ;;  %3539 = vmatmul.msk.f32.gmra.mxu0 %vm328_vm1, %v2668_v0 }
 0x236   : > { %v2897_v49 = vadd.f32 %v2811_v56, %v2619_v6  ;;  %3471 = vmatmul.msk.f32.gmra.mxu2 %vm328_vm1, %v2112_v54  ;;  %v2064_v56 = vadd.f32 %v1982_v47, %v4985_v42 }
 0x237   : > { %3505 = vmatmul.msk.f32.gmra.mxu3 %vm328_vm1, %v4335_v61  ;;  %v2113_v61 = vld [vmem:[#allocation2 + $0x140] sm:$0xff] }
 0x238   : > { %2930 = vst.msk [vmem:[%s4620_s28 + $0x28] sm:$0xff] %vm2924_vm3, %v2897_v49  ;;  %v2966_v14 = vsel %vm2924_vm3, %v2897_v49, 0.0  ;;  %v3033_v44 = vmul.f32 %v2897_v49, %v2897_v49  ;;  %3438 = vmatmul.msk.f32.gmra.mxu1 %vm328_vm1, %v1834_v58 }
 0x239   : > { %v2967_v35 = vadd.f32 %v2966_v14, %v2965_v5  ;;  %v2258_v39 = vpop.f32.mrf.mxu2  ;;  %v2114_v5 = vld [vmem:[#allocation2 + $0x150] sm:$0xff]  ;;  %v2671_v14 = vld [vmem:[#allocation2 + $0x15a] sm:$0xff] }
 0x23a   : > { %v3069_v18 = vsel %vm2924_vm3, %v3033_v44, 0.0  ;;  %v2342_v12 = vadd.f32 %v2258_v39, %v2063_v29  ;;  %v2536_v41 = vpop.f32.mrf.mxu3  ;;  %v2817_v9 = vpop.f32.mrf.mxu0 }
 0x23b   : > { %v3070_v13 = vadd.f32 %v3069_v18, %v3068_v51  ;;  %v2393_v18 = vld [vmem:[#allocation2 + $0x159] sm:$0xff] }
 0x23c   : > { %v2620_v33 = vadd.f32 %v2536_v41, %v2342_v12 }
 0x23d   : > { %v1985_v3 = vpop.f32.mrf.mxu1  ;;  %3540 = vmatmul.msk.f32.gmra.mxu0 %vm328_vm1, %v2669_v63 }
 0x23e   : > { %v2898_v26 = vadd.f32 %v2814_v34, %v2620_v33  ;;  %3472 = vmatmul.msk.f32.gmra.mxu2 %vm328_vm1, %v2113_v61  ;;  %v4986_v34 = vld [vmem:[#allocation43_spill] sm:$0xff] }
 0x23f   : > { %3506 = vmatmul.msk.f32.gmra.mxu3 %vm328_vm1, %v4984_v30 }
 0x240   : > { %2931 = vst.msk [vmem:[%s4620_s28 + $0x30] sm:$0xff] %vm2924_vm3, %v2898_v26  ;;  %v2968_v15 = vsel %vm2924_vm3, %v2898_v26, 0.0  ;;  %v3034_v48 = vmul.f32 %v2898_v26, %v2898_v26  ;;  %3439 = vmatmul.msk.f32.gmra.mxu1 %vm328_vm1, %v2668_v0  ;;  %v2065_v0 = vadd.f32 %v1985_v3, %v4986_v34 }
 0x241   : > { %v2969_v7 = vadd.f32 %v2968_v15, %v2967_v35  ;;  %v2261_v55 = vpop.f32.mrf.mxu2  ;;  %v2115_v35 = vld [vmem:[#allocation2 + $0x158] sm:$0xff]  ;;  %v2672_v15 = vld [vmem:[#allocation2 + $0x16a] sm:$0xff] }
 0x242   : > { %v3071_v37 = vsel %vm2924_vm3, %v3034_v48, 0.0  ;;  %v2343_v16 = vadd.f32 %v2261_v55, %v2064_v56  ;;  %v2539_v46 = vpop.f32.mrf.mxu3  ;;  %v2820_v45 = vpop.f32.mrf.mxu0 }
 0x243   : > { %v3072_v27 = vadd.f32 %v3071_v37, %v3070_v13  ;;  %v2394_v37 = vld [vmem:[#allocation2 + $0x169] sm:$0xff] }
 0x244   : > { %v2621_v52 = vadd.f32 %v2539_v46, %v2343_v16 }
 0x245   : > { %v1988_v62 = vpop.f32.mrf.mxu1  ;;  %3541 = vmatmul.msk.f32.gmra.mxu0 %vm328_vm1, %v2670_v22 }
 0x246   : > { %v2899_v10 = vadd.f32 %v2817_v9, %v2621_v52  ;;  %3473 = vmatmul.msk.f32.gmra.mxu2 %vm328_vm1, %v2114_v5  ;;  %v4987_v9 = vld [vmem:[#allocation44_spill] sm:$0xff] }
 0x247   : > { %3507 = vmatmul.msk.f32.gmra.mxu3 %vm328_vm1, %v2392_v31 }
 0x248   : > { %2932 = vst.msk [vmem:[%s4620_s28 + $0x38] sm:$0xff] %vm2924_vm3, %v2899_v10  ;;  %v2970_v51 = vsel %vm2924_vm3, %v2899_v10, 0.0  ;;  %v3035_v54 = vmul.f32 %v2899_v10, %v2899_v10  ;;  %3440 = vmatmul.msk.f32.gmra.mxu1 %vm328_vm1, %v2669_v63  ;;  %v2066_v63 = vadd.f32 %v1988_v62, %v4987_v9 }
 0x249   : > { %v2971_v6 = vadd.f32 %v2970_v51, %v2969_v7  ;;  %v2264_v47 = vpop.f32.mrf.mxu2  ;;  %v2116_v7 = vld [vmem:[#allocation2 + $0x168] sm:$0xff] }
 0x24a   : > { %v3073_v58 = vsel %vm2924_vm3, %v3035_v54, 0.0  ;;  %v2344_v49 = vadd.f32 %v2264_v47, %v2065_v0  ;;  %v2542_v24 = vpop.f32.mrf.mxu3  ;;  %v2823_v29 = vpop.f32.mrf.mxu0  ;;  %v2673_v0 = vld [vmem:[#allocation2 + $0x172] sm:$0xff] }
 0x24b   : > { %v3074_v44 = vadd.f32 %v3073_v58, %v3072_v27  ;;  %v2117_v54 = vld [vmem:[#allocation2 + $0x170] sm:$0xff] }
 0x24c   : > { %v2622_v39 = vadd.f32 %v2542_v24, %v2344_v49 }
 0x24d   : > { %v1991_v12 = vpop.f32.mrf.mxu1  ;;  %3542 = vmatmul.msk.f32.gmra.mxu0 %vm328_vm1, %v2671_v14 }
 0x24e   : > { %v2900_v41 = vadd.f32 %v2820_v45, %v2622_v39  ;;  %3474 = vmatmul.msk.f32.gmra.mxu2 %vm328_vm1, %v2115_v35  ;;  %v2067_v45 = vadd.f32 %v1991_v12, %v4384_v43  ;;  %v2395_v43 = vld [vmem:[#allocation2 + $0x171] sm:$0xff] }
 0x24f   : > { %3508 = vmatmul.msk.f32.gmra.mxu3 %vm328_vm1, %v2393_v18 }
 0x250   : > { %2933 = vst.msk [vmem:[%s4620_s28 + $0x40] sm:$0xff] %vm2924_vm3, %v2900_v41  ;;  %v2972_v13 = vsel %vm2924_vm3, %v2900_v41, 0.0  ;;  %v3036_v61 = vmul.f32 %v2900_v41, %v2900_v41  ;;  %3441 = vmatmul.msk.f32.gmra.mxu1 %vm328_vm1, %v2670_v22  ;;  %v2674_v41 = vld [vmem:[#allocation2 + $0x182] sm:$0xff] }
 0x251   : > { %v2973_v33 = vadd.f32 %v2972_v13, %v2971_v6  ;;  %v2267_v3 = vpop.f32.mrf.mxu2 }
 0x252   : > { %v3075_v26 = vsel %vm2924_vm3, %v3036_v61, 0.0  ;;  %v2345_v30 = vadd.f32 %v2267_v3, %v2066_v63  ;;  %v2545_v42 = vpop.f32.mrf.mxu3  ;;  %v2826_v56 = vpop.f32.mrf.mxu0  ;;  %v2118_v63 = vld [vmem:[#allocation2 + $0x180] sm:$0xff] }
 0x253   : > { %v3076_v48 = vadd.f32 %v3075_v26, %v3074_v44 }
 0x254   : > { %v2623_v55 = vadd.f32 %v2545_v42, %v2345_v30 }
 0x255   : > { %v1994_v16 = vpop.f32.mrf.mxu1  ;;  %3543 = vmatmul.msk.f32.gmra.mxu0 %vm328_vm1, %v2672_v15 }
 0x256   : > { %v2901_v46 = vadd.f32 %v2823_v29, %v2623_v55  ;;  %3475 = vmatmul.msk.f32.gmra.mxu2 %vm328_vm1, %v2116_v7  ;;  %v2068_v49 = vadd.f32 %v1994_v16, %v4393_v38  ;;  %v2396_v38 = vld [vmem:[#allocation2 + $0x181] sm:$0xff] }
 0x257   : > { %3509 = vmatmul.msk.f32.gmra.mxu3 %vm328_vm1, %v2394_v37  ;;  %v2675_v37 = vld [vmem:[#allocation2 + $0x18a] sm:$0xff] }
 0x258   : > { %2934 = vst.msk [vmem:[%s4620_s28 + $0x48] sm:$0xff] %vm2924_vm3, %v2901_v46  ;;  %v2974_v22 = vsel %vm2924_vm3, %v2901_v46, 0.0  ;;  %v3037_v27 = vmul.f32 %v2901_v46, %v2901_v46  ;;  %3442 = vmatmul.msk.f32.gmra.mxu1 %vm328_vm1, %v2671_v14  ;;  %v2119_v46 = vld [vmem:[#allocation2 + $0x188] sm:$0xff] }
 0x259   : > { %v2975_v5 = vadd.f32 %v2974_v22, %v2973_v33  ;;  %v2270_v52 = vpop.f32.mrf.mxu2 }
 0x25a   : > { %v3077_v31 = vsel %vm2924_vm3, %v3037_v27, 0.0  ;;  %v2346_v62 = vadd.f32 %v2270_v52, %v2067_v45  ;;  %v2548_v10 = vpop.f32.mrf.mxu3  ;;  %v2829_v34 = vpop.f32.mrf.mxu0 }
 0x25b   : > { %v3078_v51 = vadd.f32 %v3077_v31, %v3076_v48 }
 0x25c   : > { %v2624_v6 = vadd.f32 %v2548_v10, %v2346_v62 }
 0x25d   : > { %v1997_v47 = vpop.f32.mrf.mxu1  ;;  %3544 = vmatmul.msk.f32.gmra.mxu0 %vm328_vm1, %v2673_v0 }
 0x25e   : > { %v2902_v58 = vadd.f32 %v2826_v56, %v2624_v6  ;;  %3476 = vmatmul.msk.f32.gmra.mxu2 %vm328_vm1, %v2117_v54  ;;  %v2069_v3 = vadd.f32 %v1997_v47, %v4402_v36  ;;  %v2397_v36 = vld [vmem:[#allocation2 + $0x189] sm:$0xff]  ;;  %v2676_v6 = vld [vmem:[#allocation2 + $0x19a] sm:$0xff] }
 0x25f   : > { %3510 = vmatmul.msk.f32.gmra.mxu3 %vm328_vm1, %v2395_v43  ;;  %v2120_v47 = vld [vmem:[#allocation2 + $0x198] sm:$0xff] }
 0x260   : > { %2935 = vst.msk [vmem:[%s4620_s28 + $0x50] sm:$0xff] %vm2924_vm3, %v2902_v58  ;;  %v2976_v24 = vsel %vm2924_vm3, %v2902_v58, 0.0  ;;  %v3038_v29 = vmul.f32 %v2902_v58, %v2902_v58  ;;  %3443 = vmatmul.msk.f32.gmra.mxu1 %vm328_vm1, %v2672_v15 }
 0x261   : > { %v2977_v14 = vadd.f32 %v2976_v24, %v2975_v5  ;;  %v2273_v44 = vpop.f32.mrf.mxu2 }
 0x262   : > { %v3079_v35 = vsel %vm2924_vm3, %v3038_v29, 0.0  ;;  %v2347_v39 = vadd.f32 %v2273_v44, %v2068_v49  ;;  %v2551_v18 = vpop.f32.mrf.mxu3  ;;  %v2832_v12 = vpop.f32.mrf.mxu0 }
 0x263   : > { %v3080_v9 = vadd.f32 %v3079_v35, %v3078_v51 }
 0x264   : > { %v2625_v13 = vadd.f32 %v2551_v18, %v2347_v39 }
 0x265   : > { %v2000_v61 = vpop.f32.mrf.mxu1  ;;  %3545 = vmatmul.msk.f32.gmra.mxu0 %vm328_vm1, %v2674_v41 }
 0x266   : > { %v2903_v33 = vadd.f32 %v2829_v34, %v2625_v13  ;;  %3477 = vmatmul.msk.f32.gmra.mxu2 %vm328_vm1, %v2118_v63  ;;  %v2070_v5 = vadd.f32 %v2000_v61, %v4411_v59  ;;  %v2398_v59 = vld [vmem:[#allocation2 + $0x199] sm:$0xff]  ;;  %v2677_v63 = vld [vmem:[#allocation2 + $0x1a2] sm:$0xff] }
 0x267   : > { %3511 = vmatmul.msk.f32.gmra.mxu3 %vm328_vm1, %v2396_v38  ;;  %v2121_v38 = vld [vmem:[#allocation2 + $0x1a0] sm:$0xff] }
 0x268   : > { %2936 = vst.msk [vmem:[%s4620_s28 + $0x58] sm:$0xff] %vm2924_vm3, %v2903_v33  ;;  %v2978_v26 = vsel %vm2924_vm3, %v2903_v33, 0.0  ;;  %v3039_v30 = vmul.f32 %v2903_v33, %v2903_v33  ;;  %3444 = vmatmul.msk.f32.gmra.mxu1 %vm328_vm1, %v2673_v0 }
 0x269   : > { %v2979_v42 = vadd.f32 %v2978_v26, %v2977_v14  ;;  %v2276_v56 = vpop.f32.mrf.mxu2 }
 0x26a   : > { %v3081_v15 = vsel %vm2924_vm3, %v3039_v30, 0.0  ;;  %v2348_v48 = vadd.f32 %v2276_v56, %v2069_v3  ;;  %v2554_v7 = vpop.f32.mrf.mxu3  ;;  %v2835_v55 = vpop.f32.mrf.mxu0 }
 0x26b   : > { %v3082_v16 = vadd.f32 %v3081_v15, %v3080_v9 }
 0x26c   : > { %v2626_v45 = vadd.f32 %v2554_v7, %v2348_v48 }
 0x26d   : > { %v2003_v22 = vpop.f32.mrf.mxu1  ;;  %3546 = vmatmul.msk.f32.gmra.mxu0 %vm328_vm1, %v2675_v37 }
 0x26e   : > { %v2904_v27 = vadd.f32 %v2832_v12, %v2626_v45  ;;  %3478 = vmatmul.msk.f32.gmra.mxu2 %vm328_vm1, %v2119_v46  ;;  %v2071_v29 = vadd.f32 %v2003_v22, %v4419_v11  ;;  %v2399_v11 = vld [vmem:[#allocation2 + $0x1a1] sm:$0xff] }
 0x26f   : > { %3512 = vmatmul.msk.f32.gmra.mxu3 %vm328_vm1, %v2397_v36 }
 0x270   : > { %2937 = vst.msk [vmem:[%s4620_s28 + $0x60] sm:$0xff] %vm2924_vm3, %v2904_v27  ;;  %v2980_v52 = vsel %vm2924_vm3, %v2904_v27, 0.0  ;;  %v3040_v31 = vmul.f32 %v2904_v27, %v2904_v27  ;;  %3445 = vmatmul.msk.f32.gmra.mxu1 %vm328_vm1, %v2674_v41 }
 0x271   : > { %v2981_v62 = vadd.f32 %v2980_v52, %v2979_v42  ;;  %v2279_v10 = vpop.f32.mrf.mxu2 }
 0x272   : > { %v3083_v34 = vsel %vm2924_vm3, %v3040_v31, 0.0  ;;  %v2349_v0 = vadd.f32 %v2279_v10, %v2070_v5  ;;  %v2557_v51 = vpop.f32.mrf.mxu3  ;;  %v2838_v54 = vpop.f32.mrf.mxu0 }
 0x273   : > { %v3084_v43 = vadd.f32 %v3083_v34, %v3082_v16 }
 0x274   : > { %v2627_v58 = vadd.f32 %v2557_v51, %v2349_v0 }
 0x275   : > { %v2006_v49 = vpop.f32.mrf.mxu1  ;;  %3547 = vmatmul.msk.f32.gmra.mxu0 %vm328_vm1, %v2676_v6 }
 0x276   : > { %v2905_v24 = vadd.f32 %v2835_v55, %v2627_v58  ;;  %3479 = vmatmul.msk.f32.gmra.mxu2 %vm328_vm1, %v2120_v47  ;;  %v2072_v26 = vadd.f32 %v2006_v49, %v4429_v28 }
 0x277   : > { %3513 = vmatmul.msk.f32.gmra.mxu3 %vm328_vm1, %v2398_v59 }
 0x278   : > { %2938 = vst.msk [vmem:[%s4620_s28 + $0x68] sm:$0xff] %vm2924_vm3, %v2905_v24  ;;  %v2982_v14 = vsel %vm2924_vm3, %v2905_v24, 0.0  ;;  %v3041_v44 = vmul.f32 %v2905_v24, %v2905_v24  ;;  %3446 = vmatmul.msk.f32.gmra.mxu1 %vm328_vm1, %v2675_v37 }
 0x279   : > { %v2983_v35 = vadd.f32 %v2982_v14, %v2981_v62  ;;  %v2282_v39 = vpop.f32.mrf.mxu2 }
 0x27a   : > { %v3085_v18 = vsel %vm2924_vm3, %v3041_v44, 0.0  ;;  %v2350_v12 = vadd.f32 %v2282_v39, %v2071_v29  ;;  %v2560_v41 = vpop.f32.mrf.mxu3  ;;  %v2841_v9 = vpop.f32.mrf.mxu0 }
 0x27b   : > { %v3086_v13 = vadd.f32 %v3085_v18, %v3084_v43 }
 0x27c   : > { %v2628_v61 = vadd.f32 %v2560_v41, %v2350_v12 }
 0x27d   : > { %v2009_v33 = vpop.f32.mrf.mxu1  ;;  %3548 = vmatmul.msk.f32.gmra.mxu0 %vm328_vm1, %v2677_v63 }
 0x27e   : > { %v2906_v3 = vadd.f32 %v2838_v54, %v2628_v61  ;;  %3480 = vmatmul.msk.f32.gmra.mxu2 %vm328_vm1, %v2121_v38  ;;  %v2073_v22 = vadd.f32 %v2009_v33, %v4441_v53 }
 0x27f   : > { %3514 = vmatmul.msk.f32.gmra.mxu3 %vm328_vm1, %v2399_v11 }
 0x280   : > { %2939 = vst.msk [vmem:[%s4620_s28 + $0x70] sm:$0xff] %vm2924_vm3, %v2906_v3  ;;  %v2984_v30 = vsel %vm2924_vm3, %v2906_v3, 0.0  ;;  %v3042_v42 = vmul.f32 %v2906_v3, %v2906_v3 }
 0x281   : > { %v2985_v56 = vadd.f32 %v2984_v30, %v2983_v35  ;;  %v2285_v15 = vpop.f32.mrf.mxu2 }
 0x282   : > { %v3087_v48 = vsel %vm2924_vm3, %v3042_v42, 0.0  ;;  %v2351_v7 = vadd.f32 %v2285_v15, %v2072_v26  ;;  %v2563_v55 = vpop.f32.mrf.mxu3  ;;  %v2844_v37 = vpop.f32.mrf.mxu0 }
 0x283   : > { %v3088_v16 = vadd.f32 %v3087_v48, %v3086_v13 }
 0x284   : > { %v2629_v46 = vadd.f32 %v2563_v55, %v2351_v7 }
 0x285   : > { %v2012_v45 = vpop.f32.mrf.mxu1 }
 0x286   : > { %v2907_v36 = vadd.f32 %v2841_v9, %v2629_v46  ;;  %v2074_v43 = vadd.f32 %v2012_v45, %v4453_v60 }
 0x288   : > { %2940 = vst.msk [vmem:[%s4620_s28 + $0x78] sm:$0xff] %vm2924_vm3, %v2907_v36  ;;  %v2986_v28 = vsel %vm2924_vm3, %v2907_v36, 0.0  ;;  %v3043_v27 = vmul.f32 %v2907_v36, %v2907_v36 }
 0x289   : > { %v2987_v5 = vadd.f32 %v2986_v28, %v2985_v56  ;;  %v2288_v52 = vpop.f32.mrf.mxu2 }
 0x28a   : > { %v3089_v31 = vsel %vm2924_vm3, %v3043_v27, 0.0  ;;  %v2352_v62 = vadd.f32 %v2288_v52, %v2073_v22  ;;  %v2566_v10 = vpop.f32.mrf.mxu3  ;;  %v2847_v34 = vpop.f32.mrf.mxu0 }
 0x28b   : > { %v3090_v0 = vadd.f32 %v3089_v31, %v3088_v16 }
 0x28c   : > { %v2630_v51 = vadd.f32 %v2566_v10, %v2352_v62 }
 0x28d   : > { %v2015_v54 = vpop.f32.mrf.mxu1 }
 0x28e   : > { %v2908_v6 = vadd.f32 %v2844_v37, %v2630_v51  ;;  %v2075_v12 = vadd.f32 %v2015_v54, %v4465_v1 }
 0x290   : > { %2941 = vst.msk [vmem:[%s4620_s28 + $0x80] sm:$0xff] %vm2924_vm3, %v2908_v6  ;;  %v2988_v53 = vsel %vm2924_vm3, %v2908_v6, 0.0  ;;  %v3044_v47 = vmul.f32 %v2908_v6, %v2908_v6 }
 0x291   : > { %v2989_v58 = vadd.f32 %v2988_v53, %v2987_v5  ;;  %v2291_v59 = vpop.f32.mrf.mxu2 }
 0x292   : > { %v3091_v49 = vsel %vm2924_vm3, %v3044_v47, 0.0  ;;  %v2353_v24 = vadd.f32 %v2291_v59, %v2074_v43  ;;  %v2569_v29 = vpop.f32.mrf.mxu3  ;;  %v2850_v14 = vpop.f32.mrf.mxu0 }
 0x293   : > { %v3092_v44 = vadd.f32 %v3091_v49, %v3090_v0 }
 0x294   : > { %v2631_v35 = vadd.f32 %v2569_v29, %v2353_v24 }
 0x295   : > { %v2018_v39 = vpop.f32.mrf.mxu1 }
 0x296   : > { %v2909_v18 = vadd.f32 %v2847_v34, %v2631_v35  ;;  %v2076_v42 = vadd.f32 %v2018_v39, %v4477_v17 }
 0x298   : > { %2942 = vst.msk [vmem:[%s4620_s28 + $0x88] sm:$0xff] %vm2924_vm3, %v2909_v18  ;;  %v2990_v60 = vsel %vm2924_vm3, %v2909_v18, 0.0  ;;  %v3045_v41 = vmul.f32 %v2909_v18, %v2909_v18 }
 0x299   : > { %v2991_v9 = vadd.f32 %v2990_v60, %v2989_v58  ;;  %v2294_v63 = vpop.f32.mrf.mxu2 }
 0x29a   : > { %v3093_v13 = vsel %vm2924_vm3, %v3045_v41, 0.0  ;;  %v2354_v38 = vadd.f32 %v2294_v63, %v2075_v12  ;;  %v2572_v61 = vpop.f32.mrf.mxu3  ;;  %v2853_v11 = vpop.f32.mrf.mxu0 }
 0x29b   : > { %v3094_v33 = vadd.f32 %v3093_v13, %v3092_v44 }
 0x29c   : > { %v2632_v3 = vadd.f32 %v2572_v61, %v2354_v38 }
 0x29d   : > { %v2021_v26 = vpop.f32.mrf.mxu1 }
 0x29e   : > { %v2910_v30 = vadd.f32 %v2850_v14, %v2632_v3  ;;  %v2077_v28 = vadd.f32 %v2021_v26, %v4488_v4 }
 0x2a0   : > { %2943 = vst.msk [vmem:[%s4620_s28 + $0x90] sm:$0xff] %vm2924_vm3, %v2910_v30  ;;  %v2992_v1 = vsel %vm2924_vm3, %v2910_v30, 0.0  ;;  %v3046_v56 = vmul.f32 %v2910_v30, %v2910_v30 }
 0x2a1   : > { %v2993_v15 = vadd.f32 %v2992_v1, %v2991_v9  ;;  %v2297_v48 = vpop.f32.mrf.mxu2 }
 0x2a2   : > { %v3095_v7 = vsel %vm2924_vm3, %v3046_v56, 0.0  ;;  %v2355_v55 = vadd.f32 %v2297_v48, %v2076_v42  ;;  %v2575_v37 = vpop.f32.mrf.mxu3  ;;  %v2856_v16 = vpop.f32.mrf.mxu0 }
 0x2a3   : > { %v3096_v46 = vadd.f32 %v3095_v7, %v3094_v33 }
 0x2a4   : > { %v2633_v45 = vadd.f32 %v2575_v37, %v2355_v55 }
 0x2a5   : > { %v2024_v36 = vpop.f32.mrf.mxu1 }
 0x2a6   : > { %v2911_v22 = vadd.f32 %v2853_v11, %v2633_v45  ;;  %v2078_v43 = vadd.f32 %v2024_v36, %v4499_v25 }
 0x2a8   : > { %2944 = vst.msk [vmem:[%s4620_s28 + $0x98] sm:$0xff] %vm2924_vm3, %v2911_v22  ;;  %v2994_v17 = vsel %vm2924_vm3, %v2911_v22, 0.0  ;;  %v3047_v27 = vmul.f32 %v2911_v22, %v2911_v22 }
 0x2a9   : > { %v2995_v5 = vadd.f32 %v2994_v17, %v2993_v15  ;;  %v2300_v52 = vpop.f32.mrf.mxu2 }
 0x2aa   : > { %v3097_v31 = vsel %vm2924_vm3, %v3047_v27, 0.0  ;;  %v2356_v62 = vadd.f32 %v2300_v52, %v2077_v28  ;;  %v2578_v10 = vpop.f32.mrf.mxu3  ;;  %v2859_v34 = vpop.f32.mrf.mxu0 }
 0x2ab   : > { %v3098_v0 = vadd.f32 %v3097_v31, %v3096_v46 }
 0x2ac   : > { %v2634_v51 = vadd.f32 %v2578_v10, %v2356_v62 }
 0x2ad   : > { %v2027_v54 = vpop.f32.mrf.mxu1 }
 0x2ae   : > { %v2912_v6 = vadd.f32 %v2856_v16, %v2634_v51  ;;  %v2079_v18 = vadd.f32 %v2027_v54, %v4510_v2 }
 0x2b0   : > { %2945 = vst.msk [vmem:[%s4620_s28 + $0xa0] sm:$0xff] %vm2924_vm3, %v2912_v6  ;;  %v2996_v4 = vsel %vm2924_vm3, %v2912_v6, 0.0  ;;  %v3048_v53 = vmul.f32 %v2912_v6, %v2912_v6 }
 0x2b1   : > { %v2997_v47 = vadd.f32 %v2996_v4, %v2995_v5  ;;  %v2303_v58 = vpop.f32.mrf.mxu2 }
 0x2b2   : > { %v3099_v59 = vsel %vm2924_vm3, %v3048_v53, 0.0  ;;  %v2357_v49 = vadd.f32 %v2303_v58, %v2078_v43  ;;  %v2581_v24 = vpop.f32.mrf.mxu3  ;;  %v2862_v29 = vpop.f32.mrf.mxu0 }
 0x2b3   : > { %v3100_v14 = vadd.f32 %v3099_v59, %v3098_v0 }
 0x2b4   : > { %v2635_v44 = vadd.f32 %v2581_v24, %v2357_v49 }
 0x2b5   : > { %v2030_v35 = vpop.f32.mrf.mxu1 }
 0x2b6   : > { %v2913_v39 = vadd.f32 %v2859_v34, %v2635_v44  ;;  %v2080_v26 = vadd.f32 %v2030_v35, %v4521_v23 }
 0x2b8   : > { %2946 = vst.msk [vmem:[%s4620_s28 + $0xa8] sm:$0xff] %vm2924_vm3, %v2913_v39  ;;  %v2998_v25 = vsel %vm2924_vm3, %v2913_v39, 0.0  ;;  %v3049_v12 = vmul.f32 %v2913_v39, %v2913_v39 }
 0x2b9   : > { %v2999_v60 = vadd.f32 %v2998_v25, %v2997_v47  ;;  %v2306_v41 = vpop.f32.mrf.mxu2 }
 0x2ba   : > { %v3101_v9 = vsel %vm2924_vm3, %v3049_v12, 0.0  ;;  %v2358_v63 = vadd.f32 %v2306_v41, %v2079_v18  ;;  %v2584_v13 = vpop.f32.mrf.mxu3  ;;  %v2865_v38 = vpop.f32.mrf.mxu0 }
 0x2bb   : > { %v3102_v61 = vadd.f32 %v3101_v9, %v3100_v14 }
 0x2bc   : > { %v2636_v11 = vadd.f32 %v2584_v13, %v2358_v63 }
 0x2bd   : > { %v2033_v33 = vpop.f32.mrf.mxu1 }
 0x2be   : > { %v2914_v3 = vadd.f32 %v2862_v29, %v2636_v11  ;;  %v2081_v45 = vadd.f32 %v2033_v33, %v4532_v19 }
 0x2c0   : > { %2947 = vst.msk [vmem:[%s4620_s28 + $0xb0] sm:$0xff] %vm2924_vm3, %v2914_v3  ;;  %v3000_v2 = vsel %vm2924_vm3, %v2914_v3, 0.0  ;;  %v3050_v30 = vmul.f32 %v2914_v3, %v2914_v3 }
 0x2c1   : > { %v3001_v42 = vadd.f32 %v3000_v2, %v2999_v60  ;;  %v2309_v1 = vpop.f32.mrf.mxu2 }
 0x2c2   : > { %v3103_v56 = vsel %vm2924_vm3, %v3050_v30, 0.0  ;;  %v2359_v15 = vadd.f32 %v2309_v1, %v2080_v26  ;;  %v2587_v48 = vpop.f32.mrf.mxu3  ;;  %v2868_v7 = vpop.f32.mrf.mxu0 }
 0x2c3   : > { %v3104_v55 = vadd.f32 %v3103_v56, %v3102_v61 }
 0x2c4   : > { %v2637_v37 = vadd.f32 %v2587_v48, %v2359_v15 }
 0x2c5   : > { %v2036_v16 = vpop.f32.mrf.mxu1 }
 0x2c6   : > { %v2915_v46 = vadd.f32 %v2865_v38, %v2637_v37  ;;  %v2082_v0 = vadd.f32 %v2036_v16, %v4543_v50 }
 0x2c8   : > { %2948 = vst.msk [vmem:[%s4620_s28 + $0xb8] sm:$0xff] %vm2924_vm3, %v2915_v46  ;;  %v3002_v23 = vsel %vm2924_vm3, %v2915_v46, 0.0  ;;  %v3051_v36 = vmul.f32 %v2915_v46, %v2915_v46 }
 0x2c9   : > { %v3003_v22 = vadd.f32 %v3002_v23, %v3001_v42  ;;  %v2312_v28 = vpop.f32.mrf.mxu2 }
 0x2ca   : > { %v3105_v17 = vsel %vm2924_vm3, %v3051_v36, 0.0  ;;  %v2360_v27 = vadd.f32 %v2312_v28, %v2081_v45  ;;  %v2590_v5 = vpop.f32.mrf.mxu3  ;;  %v2871_v52 = vpop.f32.mrf.mxu0 }
 0x2cb   : > { %v3106_v31 = vadd.f32 %v3105_v17, %v3104_v55 }
 0x2cc   : > { %v2638_v62 = vadd.f32 %v2590_v5, %v2360_v27 }
 0x2cd   : > { %v2039_v10 = vpop.f32.mrf.mxu1 }
 0x2ce   : > { %v2916_v34 = vadd.f32 %v2868_v7, %v2638_v62  ;;  %v2083_v29 = vadd.f32 %v2039_v10, %v4554_v57 }
 0x2d0   : > { %2949 = vst.msk [vmem:[%s4620_s28 + $0xc0] sm:$0xff] %vm2924_vm3, %v2916_v34  ;;  %v3004_v19 = vsel %vm2924_vm3, %v2916_v34, 0.0  ;;  %v3052_v51 = vmul.f32 %v2916_v34, %v2916_v34 }
 0x2d1   : > { %v3005_v54 = vadd.f32 %v3004_v19, %v3003_v22  ;;  %v2315_v6 = vpop.f32.mrf.mxu2 }
 0x2d2   : > { %v3107_v43 = vsel %vm2924_vm3, %v3052_v51, 0.0  ;;  %v2361_v4 = vadd.f32 %v2315_v6, %v2082_v0  ;;  %v2593_v53 = vpop.f32.mrf.mxu3  ;;  %v2874_v47 = vpop.f32.mrf.mxu0 }
 0x2d3   : > { %v3108_v58 = vadd.f32 %v3107_v43, %v3106_v31 }
 0x2d4   : > { %v2639_v59 = vadd.f32 %v2593_v53, %v2361_v4 }
 0x2d5   : > { %v2042_v49 = vpop.f32.mrf.mxu1 }
 0x2d6   : > { %v2917_v24 = vadd.f32 %v2871_v52, %v2639_v59  ;;  %v2084_v13 = vadd.f32 %v2042_v49, %v4565_v21 }
 0x2d8   : > { %2950 = vst.msk [vmem:[%s4620_s28 + $0xc8] sm:$0xff] %vm2924_vm3, %v2917_v24  ;;  %v3006_v50 = vsel %vm2924_vm3, %v2917_v24, 0.0  ;;  %v3053_v14 = vmul.f32 %v2917_v24, %v2917_v24 }
 0x2d9   : > { %v3007_v44 = vadd.f32 %v3006_v50, %v3005_v54  ;;  %v2318_v35 = vpop.f32.mrf.mxu2 }
 0x2da   : > { %v3109_v39 = vsel %vm2924_vm3, %v3053_v14, 0.0  ;;  %v2362_v18 = vadd.f32 %v2318_v35, %v2083_v29  ;;  %v2596_v25 = vpop.f32.mrf.mxu3  ;;  %v2877_v60 = vpop.f32.mrf.mxu0 }
 0x2db   : > { %v3110_v12 = vadd.f32 %v3109_v39, %v3108_v58 }
 0x2dc   : > { %v2640_v41 = vadd.f32 %v2596_v25, %v2362_v18 }
 0x2dd   : > { %v2045_v63 = vpop.f32.mrf.mxu1 }
 0x2de   : > { %v2918_v9 = vadd.f32 %v2874_v47, %v2640_v41  ;;  %v2085_v56 = vadd.f32 %v2045_v63, %v4576_v40 }
 0x2e0   : > { %2951 = vst.msk [vmem:[%s4620_s28 + $0xd0] sm:$0xff] %vm2924_vm3, %v2918_v9  ;;  %v3008_v57 = vsel %vm2924_vm3, %v2918_v9, 0.0  ;;  %v3054_v38 = vmul.f32 %v2918_v9, %v2918_v9 }
 0x2e1   : > { %v3009_v61 = vadd.f32 %v3008_v57, %v3007_v44  ;;  %v2321_v11 = vpop.f32.mrf.mxu2 }
 0x2e2   : > { %v3111_v33 = vsel %vm2924_vm3, %v3054_v38, 0.0  ;;  %v2363_v3 = vadd.f32 %v2321_v11, %v2084_v13  ;;  %v2599_v26 = vpop.f32.mrf.mxu3  ;;  %v2880_v42 = vpop.f32.mrf.mxu0 }
 0x2e3   : > { %v3112_v2 = vadd.f32 %v3111_v33, %v3110_v12 }
 0x2e4   : > { %v2641_v30 = vadd.f32 %v2599_v26, %v2363_v3 }
 0x2e5   : > { %v2048_v55 = vpop.f32.mrf.mxu1 }
 0x2e6   : > { %v2919_v1 = vadd.f32 %v2877_v60, %v2641_v30  ;;  %v2086_v28 = vadd.f32 %v2048_v55, %v4587_v8 }
 0x2e8   : > { %2952 = vst.msk [vmem:[%s4620_s28 + $0xd8] sm:$0xff] %vm2924_vm3, %v2919_v1  ;;  %v3010_v21 = vsel %vm2924_vm3, %v2919_v1, 0.0  ;;  %v3055_v15 = vmul.f32 %v2919_v1, %v2919_v1 }
 0x2e9   : > { %v3011_v48 = vadd.f32 %v3010_v21, %v3009_v61  ;;  %v2324_v7 = vpop.f32.mrf.mxu2 }
 0x2ea   : > { %v3113_v37 = vsel %vm2924_vm3, %v3055_v15, 0.0  ;;  %v2364_v16 = vadd.f32 %v2324_v7, %v2085_v56  ;;  %v2602_v46 = vpop.f32.mrf.mxu3  ;;  %v2883_v22 = vpop.f32.mrf.mxu0 }
 0x2eb   : > { %v3114_v45 = vadd.f32 %v3113_v37, %v3112_v2 }
 0x2ec   : > { %v2642_v23 = vadd.f32 %v2602_v46, %v2364_v16 }
 0x2ed   : > { %v2051_v34 = vpop.f32.mrf.mxu1 }
 0x2ee   : > { %v2920_v36 = vadd.f32 %v2880_v42, %v2642_v23  ;;  %v2087_v51 = vadd.f32 %v2051_v34, %v4598_v20 }
 0x2f0   : > { %2953 = vst.msk [vmem:[%s4620_s28 + $0xe0] sm:$0xff] %vm2924_vm3, %v2920_v36  ;;  %v3012_v40 = vsel %vm2924_vm3, %v2920_v36, 0.0  ;;  %v3056_v17 = vmul.f32 %v2920_v36, %v2920_v36 }
 0x2f1   : > { %v3013_v27 = vadd.f32 %v3012_v40, %v3011_v48  ;;  %v2327_v5 = vpop.f32.mrf.mxu2 }
 0x2f2   : > { %v3115_v52 = vsel %vm2924_vm3, %v3056_v17, 0.0  ;;  %v2365_v31 = vadd.f32 %v2327_v5, %v2086_v28  ;;  %v2605_v62 = vpop.f32.mrf.mxu3  ;;  %v2886_v4 = vpop.f32.mrf.mxu0 }
 0x2f3   : > { %v3116_v10 = vadd.f32 %v3115_v52, %v3114_v45 }
 0x2f4   : > { %v2643_v0 = vadd.f32 %v2605_v62, %v2365_v31 }
 0x2f5   : > { %v2054_v24 = vpop.f32.mrf.mxu1 }
 0x2f6   : > { %v2921_v19 = vadd.f32 %v2883_v22, %v2643_v0  ;;  %v2088_v50 = vadd.f32 %v2054_v24, %v4607_v32 }
 0x2f8   : > { %2954 = vst.msk [vmem:[%s4620_s28 + $0xe8] sm:$0xff] %vm2924_vm3, %v2921_v19  ;;  %v3014_v8 = vsel %vm2924_vm3, %v2921_v19, 0.0  ;;  %v3057_v54 = vmul.f32 %v2921_v19, %v2921_v19 }
 0x2f9   : > { %v3015_v6 = vadd.f32 %v3014_v8, %v3013_v27  ;;  %v2330_v43 = vpop.f32.mrf.mxu2 }
 0x2fa   : > { %v3117_v53 = vsel %vm2924_vm3, %v3057_v54, 0.0  ;;  %v2366_v47 = vadd.f32 %v2330_v43, %v2087_v51  ;;  %v2608_v58 = vpop.f32.mrf.mxu3  ;;  %v2889_v60 = vpop.f32.mrf.mxu0 }
 0x2fb   : > { %v3118_v59 = vadd.f32 %v3117_v53, %v3116_v10 }
 0x2fc   : > { %v2644_v49 = vadd.f32 %v2608_v58, %v2366_v47 }
 0x2fe   : > { %v2922_v29 = vadd.f32 %v2886_v4, %v2644_v49 }
 0x300   : > { %2955 = vst.msk [vmem:[%s4620_s28 + $0xf0] sm:$0xff] %vm2924_vm3, %v2922_v29  ;;  %v3016_v20 = vsel %vm2924_vm3, %v2922_v29, 0.0  ;;  %v3058_v14 = vmul.f32 %v2922_v29, %v2922_v29 }
 0x301   : > { %v3017_v44 = vadd.f32 %v3016_v20, %v3015_v6  ;;  %v2333_v35 = vpop.f32.mrf.mxu2 }
 0x302   : > { %v3119_v39 = vsel %vm2924_vm3, %v3058_v14, 0.0  ;;  %v2367_v18 = vadd.f32 %v2333_v35, %v2088_v50  ;;  %v2611_v25 = vpop.f32.mrf.mxu3 }
 0x303   : > { %v3120_v12 = vadd.f32 %v3119_v39, %v3118_v59 }
 0x304   : > { %v2645_v41 = vadd.f32 %v2611_v25, %v2367_v18 }
 0x306   : > { %v2923_v9 = vadd.f32 %v2889_v60, %v2645_v41 }
 0x308   : > { %2956 = vst.msk [vmem:[%s4620_s28 + $0xf8] sm:$0xff] %vm2924_vm3, %v2923_v9  ;;  %v3018_v32 = vsel %vm2924_vm3, %v2923_v9, 0.0  ;;  %v3059_v63 = vmul.f32 %v2923_v9, %v2923_v9 }
 0x309   : > { %v3019_v13 = vadd.f32 %v3018_v32, %v3017_v44 }
 0x30a   : > { %v3121_v57 = vsel %vm2924_vm3, %v3059_v63, 0.0 }
 0x30b   : > { %v3020_v38 = vrot.slane %v3019_v13, 4  ;;  %v3122_v61 = vadd.f32 %v3121_v57, %v3120_v12 }
 0x30d   : > { %v3021_v11 = vadd.f32 %v3020_v38, %v3019_v13  ;;  %v3123_v33 = vrot.slane %v3122_v61, 4 }
 0x30f   : > { %v3022_v3 = vrot.slane %v3021_v11, 2  ;;  %v3124_v26 = vadd.f32 %v3123_v33, %v3122_v61 }
 0x311   : > { %v3023_v2 = vadd.f32 %v3022_v3, %v3021_v11  ;;  %v3125_v30 = vrot.slane %v3124_v26, 2 }
 0x313   : > { %v3024_v42 = vrot.slane %v3023_v2, 1  ;;  %v3126_v1 = vadd.f32 %v3125_v30, %v3124_v26 }
 0x315   : > { %v3025_v56 = vadd.f32 %v3024_v42, %v3023_v2  ;;  %v3127_v21 = vrot.slane %v3126_v1, 1 }
 0x317   : > { %3027 = vst.msk [vmem:[%s292_s30] sm:$0x1] %vm3026_vm4, %v3025_v56  ;;  %v3128_v15 = vadd.f32 %v3127_v21, %v3126_v1 }
 0x319   : > { %3129 = vst.msk [vmem:[%s295_s10] sm:$0x1] %vm3026_vm4, %v3128_v15 }
 0x31a PF: > { %s18_s24 = sadd.s32 1, %s3572_s24  }
 0x31b   : > { %p15_p4 = scmp.ge.s32.totalorder %s18_s24, 4  }
 0x31d   :  { %17 = sbr.rel (!%p15_p4) target bundleno = 1 (0x1), region = 104 }

// kernel: conv_block_forward.4
= control target key start
LH: loop header
LB: loop body
LE: loop exit
PB: predicated region body
PF: predicated region fallthrough
CT: control target
= control target key end

     0   :  { %s3685_s24 = smov 0   ;;  %s4971_s0 = inlined_call_operand.vmem [shape: f32[2,16,16,8], index: 0, kind: input, shape index: {}]   ;;  %s4972_s1 = inlined_call_operand.vmem [shape: f32[1,8], index: 1, kind: input, shape index: {}]   ;;  %s4973_s2 = inlined_call_operand.vmem [shape: f32[1,8], index: 2, kind: input, shape index: {}]   ;;  %s4974_s3 = inlined_call_operand.vmem [shape: f32[3,3,8,8], index: 3, kind: input, shape index: {}]   ;;  %s4975_s4 = inlined_call_operand.vmem [shape: f32[1,8], index: 4, kind: input, shape index: {}]   ;;  %s4976_s5 = inlined_call_operand.vmem [shape: f32[2,16,16,8], index: 5, kind: output, shape index: {0}]   ;;  %s4977_s6 = inlined_call_operand.vmem [shape: f32[2,1,8], index: 6, kind: output, shape index: {1}]   ;;  %s4978_s7 = inlined_call_operand.vmem [shape: f32[2,1,8], index: 7, kind: output, shape index: {2}]  }
   0x1 LB: > { %s3310_s25 = sadd.s32 4294967295, %s3642_s24   ;;  %p3314_p0 = scmp.ge.s32.totalorder %s3642_s24, 1  ;;  %s3642_s24 = sphi %s3685_s24, %s18_s24  }
   0x2   : > { %p242_p1 = scmp.lt.s32.totalorder %s3642_s24, 3 }
   0x4   : > { %p243_p2 = pnand %p3314_p0, %p242_p1 }
   0x6   : > { %246 = sbr.rel (%p243_p2) target bundleno = 794 (0x31a), region = 40 }
   0xb   : > { %v557_v0 = vld [vmem:[%s4974_s3] sm:$0xff]  ;;  %p280_p3 = scmp.lt.s32.totalorder %s3310_s25, 1  ;;  %vm432_vm0 = vcmask 64512   ;;  %v3644_v1 = vmov 0.0   ;;  %v3384_v8 = vld [vmem:[%s4974_s3 + $0x10] sm:$0xff]  ;;  %v3417_v9 = vld [vmem:[%s4974_s3 + $0x18] sm:$0xff] }
   0xc   : > { %3619 = vmatpush.msra.mxu1 %v557_v0  ;;  %3620 = vmatpush.msra.mxu2 %v557_v0  ;;  %446 = vst.msk [vmem:[#allocation2 + $0x60] sm:$0xff] %vm432_vm0, %v3644_v1  ;;  %v3703_v2 = vld [vmem:[%s4972_s1] ss:$0 sm:$0xff]  ;;  %v3351_v10 = vld [vmem:[%s4974_s3 + $0x8] sm:$0xff]  ;;  %vm435_vm1 = vcmask 58368   ;;  %vm3101_vm2 = vcmask 57344  }
   0xd   : > { %s5088_s25 = smov (!%p280_p3, %s3310_s25), 1  ;;  %3621 = vmatpush.msra.mxu3 %v557_v0  ;;  %669 = vmatpush.msra.mxu0 %v557_v0  ;;  %447 = vst.msk [vmem:[#allocation2 + $0x68] sm:$0xff] %vm432_vm0, %v3644_v1  ;;  %v3720_v3 = vld [vmem:[%s4973_s2] ss:$0 sm:$0xff] }
   0xe   : > { %s3617_s30 = sshll.u32 %s5088_s25, 8  ;;  %433 = vst.msk [vmem:[#allocation2] sm:$0xff] %vm432_vm0, %v3644_v1  ;;  %1219 = vmatpush.msrb.mxu2 %v3384_v8  ;;  %944 = vmatpush.msrb.mxu1 %v3351_v10  ;;  %v3450_v24 = vld [vmem:[%s4974_s3 + $0x20] sm:$0xff]  ;;  %s292_s19 = scalar_lea.vmem %s4977_s6, %s5088_s25 }
   0xf   : > { %s3715_s10 = scalar_lea.vmem %s4971_s0, %s3617_s30  ;;  %434 = vst.msk [vmem:[#allocation2 + $0x8] sm:$0xff] %vm432_vm0, %v3644_v1  ;;  %1494 = vmatpush.msrb.mxu3 %v3417_v9  ;;  %1769 = vmatpush.msrb.mxu0 %v3450_v24  ;;  %s4726_s17 = scalar_lea.vmem %s4976_s5, %s3617_s30 }
  0x10   : > { %v302_v4 = vld [vmem:[%s3715_s10 + $0x30] sm:$0xff]  ;;  %437 = vst.msk [vmem:[#allocation2 + $0x18] sm:$0xff] %vm432_vm0, %v3644_v1  ;;  %v303_v15 = vld [vmem:[%s3715_s10 + $0x38] sm:$0xff]  ;;  %v304_v31 = vld [vmem:[%s3715_s10 + $0x40] sm:$0xff]  ;;  %s295_s22 = scalar_lea.vmem %s4978_s7, %s5088_s25 }
  0x11   : > { %v338_v5 = vmul.f32 %v3703_v2, %v302_v4  ;;  %438 = vst.msk [vmem:[#allocation2 + $0x20] sm:$0xff] %vm432_vm0, %v3644_v1  ;;  %v310_v12 = vld [vmem:[%s3715_s10 + $0x70] sm:$0xff]  ;;  %v339_v17 = vmul.f32 %v3703_v2, %v303_v15  ;;  %v311_v27 = vld [vmem:[%s3715_s10 + $0x78] sm:$0xff]  ;;  %v312_v33 = vld [vmem:[%s3715_s10 + $0x80] sm:$0xff]  ;;  %v340_v37 = vmul.f32 %v3703_v2, %v304_v31 }
  0x12   : > { %440 = vst.msk [vmem:[#allocation2 + $0x30] sm:$0xff] %vm432_vm0, %v3644_v1  ;;  %v318_v13 = vld [vmem:[%s3715_s10 + $0xb0] sm:$0xff]  ;;  %v346_v14 = vmul.f32 %v3703_v2, %v310_v12  ;;  %v319_v29 = vld [vmem:[%s3715_s10 + $0xb8] sm:$0xff]  ;;  %v347_v32 = vmul.f32 %v3703_v2, %v311_v27  ;;  %v320_v36 = vld [vmem:[%s3715_s10 + $0xc0] sm:$0xff]  ;;  %v348_v39 = vmul.f32 %v3703_v2, %v312_v33 }
  0x13   : > { %v374_v6 = vadd.f32 %v3720_v3, %v338_v5  ;;  %441 = vst.msk [vmem:[#allocation2 + $0x38] sm:$0xff] %vm432_vm0, %v3644_v1  ;;  %v354_v16 = vmul.f32 %v3703_v2, %v318_v13  ;;  %v375_v20 = vadd.f32 %v3720_v3, %v339_v17  ;;  %v355_v35 = vmul.f32 %v3703_v2, %v319_v29  ;;  %v305_v38 = vld [vmem:[%s3715_s10 + $0x48] sm:$0xff]  ;;  %v296_v43 = vld [vmem:[%s3715_s10] sm:$0xff]  ;;  %v306_v49 = vld [vmem:[%s3715_s10 + $0x50] sm:$0xff] }
  0x14   : > { %443 = vst.msk [vmem:[#allocation2 + $0x48] sm:$0xff] %vm432_vm0, %v3644_v1  ;;  %v382_v18 = vadd.f32 %v3720_v3, %v346_v14  ;;  %v313_v40 = vld [vmem:[%s3715_s10 + $0x88] sm:$0xff]  ;;  %v383_v41 = vadd.f32 %v3720_v3, %v347_v32  ;;  %v356_v42 = vmul.f32 %v3703_v2, %v320_v36  ;;  %v341_v45 = vmul.f32 %v3703_v2, %v305_v38  ;;  %v314_v52 = vld [vmem:[%s3715_s10 + $0x90] sm:$0xff]  ;;  %v307_v0 = vld [vmem:[%s3715_s10 + $0x58] sm:$0xff] }
  0x15   : > { %v406_v7 = vmax.f32 %v374_v6, 0.0  ;;  %444 = vst.msk [vmem:[#allocation2 + $0x50] sm:$0xff] %vm432_vm0, %v3644_v1  ;;  %v390_v19 = vadd.f32 %v3720_v3, %v354_v16  ;;  %v525_v23 = vld [vmem:[#allocation2] sm:$0xff]  ;;  %v407_v25 = vmax.f32 %v375_v20, 0.0  ;;  %v391_v44 = vadd.f32 %v3720_v3, %v355_v35  ;;  %v321_v46 = vld [vmem:[%s3715_s10 + $0xc8] sm:$0xff]  ;;  %v322_v60 = vld [vmem:[%s3715_s10 + $0xd0] sm:$0xff] }
  0x16   : > { %449 = vst.msk [vmem:[#allocation2 + $0x78] sm:$0xff] %vm432_vm0, %v3644_v1  ;;  %v414_v21 = vmax.f32 %v382_v18, 0.0  ;;  %3319 = vmatmul.msk.f32.vlgmr.msra.gmra.mxu0 %vm432_vm0, %v525_v23  ;;  %v526_v26 = vld [vmem:[#allocation2 + $0x8] sm:$0xff]  ;;  %v376_v47 = vadd.f32 %v3720_v3, %v340_v37  ;;  %v349_v48 = vmul.f32 %v3703_v2, %v313_v40  ;;  %v384_v50 = vadd.f32 %v3720_v3, %v348_v39  ;;  %v298_v12 = vld [vmem:[%s3715_s10 + $0x10] sm:$0xff]  ;;  %v323_v15 = vld [vmem:[%s3715_s10 + $0xd8] sm:$0xff] }
  0x17   : > { %495 = vst.msk [vmem:[#allocation2 + $0x61] sm:$0xff] %vm432_vm0, %v406_v7  ;;  %v422_v22 = vmax.f32 %v390_v19, 0.0  ;;  %v332_v51 = vmul.f32 %v3703_v2, %v296_v43  ;;  %v415_v53 = vmax.f32 %v383_v41, 0.0  ;;  %v392_v54 = vadd.f32 %v3720_v3, %v356_v42  ;;  %v297_v56 = vld [vmem:[%s3715_s10 + $0x8] sm:$0xff]  ;;  %v315_v7 = vld [vmem:[%s3715_s10 + $0x98] sm:$0xff]  ;;  %v308_v19 = vld [vmem:[%s3715_s10 + $0x60] sm:$0xff] }
  0x18   : > { %450 = vst.msk [vmem:[#allocation2 + $0x80] sm:$0xff] %vm432_vm0, %v3644_v1  ;;  %v357_v55 = vmul.f32 %v3703_v2, %v321_v46  ;;  %v423_v57 = vmax.f32 %v391_v44, 0.0  ;;  %v377_v58 = vadd.f32 %v3720_v3, %v341_v45  ;;  %v342_v59 = vmul.f32 %v3703_v2, %v306_v49  ;;  %v316_v23 = vld [vmem:[%s3715_s10 + $0xa0] sm:$0xff]  ;;  %v299_v27 = vld [vmem:[%s3715_s10 + $0x18] sm:$0xff]  ;;  %v317_v49 = vld [vmem:[%s3715_s10 + $0xa8] sm:$0xff] }
  0x19   : > { %452 = vst.msk [vmem:[#allocation2 + $0x90] sm:$0xff] %vm432_vm0, %v3644_v1  ;;  %v408_v61 = vmax.f32 %v376_v47, 0.0  ;;  %v385_v62 = vadd.f32 %v3720_v3, %v349_v48  ;;  %v350_v63 = vmul.f32 %v3703_v2, %v314_v52  ;;  %v416_v4 = vmax.f32 %v384_v50, 0.0  ;;  %v324_v32 = vld [vmem:[%s3715_s10 + $0xe0] sm:$0xff]  ;;  %v309_v48 = vld [vmem:[%s3715_s10 + $0x68] sm:$0xff] }
  0x1a   : > { %453 = vst.msk [vmem:[#allocation2 + $0x98] sm:$0xff] %vm432_vm0, %v3644_v1  ;;  %v368_v5 = vadd.f32 %v3720_v3, %v332_v51  ;;  %v333_v6 = vmul.f32 %v3703_v2, %v297_v56  ;;  %v424_v8 = vmax.f32 %v392_v54, 0.0  ;;  %v393_v9 = vadd.f32 %v3720_v3, %v357_v55  ;;  %v300_v56 = vld [vmem:[%s3715_s10 + $0x20] sm:$0xff] }
  0x1b   : > { %455 = vst.msk [vmem:[#allocation2 + $0xa8] sm:$0xff] %vm432_vm0, %v3644_v1  ;;  %v358_v10 = vmul.f32 %v3703_v2, %v322_v60  ;;  %v409_v13 = vmax.f32 %v377_v58, 0.0  ;;  %v343_v14 = vmul.f32 %v3703_v2, %v307_v0  ;;  %v417_v16 = vmax.f32 %v385_v62, 0.0 }
  0x1c   : > { %456 = vst.msk [vmem:[#allocation2 + $0xb0] sm:$0xff] %vm432_vm0, %v3644_v1  ;;  %v386_v17 = vadd.f32 %v3720_v3, %v350_v63  ;;  %v351_v18 = vmul.f32 %v3703_v2, %v315_v7  ;;  %v400_v20 = vmax.f32 %v368_v5, 0.0  ;;  %v425_v24 = vmax.f32 %v393_v9, 0.0 }
  0x1d   : > { %458 = vst.msk [vmem:[#allocation2 + $0xc0] sm:$0xff] %vm432_vm0, %v3644_v1  ;;  %v344_v31 = vmul.f32 %v3703_v2, %v308_v19  ;;  %v352_v36 = vmul.f32 %v3703_v2, %v316_v23  ;;  %v335_v40 = vmul.f32 %v3703_v2, %v299_v27  ;;  %v360_v44 = vmul.f32 %v3703_v2, %v324_v32  ;;  %v3516_v27 = vld [vmem:[%s4974_s3 + $0x30] sm:$0xff] }
  0x1e   : > { %v3763_v11 = vld [vmem:[#allocation2 + $0x60] sm:$0xff]  ;;  %459 = vst.msk [vmem:[#allocation2 + $0xc8] sm:$0xff] %vm432_vm0, %v3644_v1  ;;  %3320 = vmatmul.msk.f32.gmra.mxu0 %vm432_vm0, %v526_v26  ;;  %v359_v26 = vmul.f32 %v3703_v2, %v323_v15  ;;  %v418_v33 = vmax.f32 %v386_v17, 0.0  ;;  %v387_v35 = vadd.f32 %v3720_v3, %v351_v18  ;;  %v345_v52 = vmul.f32 %v3703_v2, %v309_v48 }
  0x1f   : > { %3327 = vmatmul.msk.f32.vlgmr.msra.gmra.mxu1 %vm432_vm0, %v3763_v11  ;;  %461 = vst.msk [vmem:[#allocation2 + $0xd8] sm:$0xff] %vm432_vm0, %v3644_v1  ;;  %v380_v47 = vadd.f32 %v3720_v3, %v344_v31  ;;  %v388_v51 = vadd.f32 %v3720_v3, %v352_v36  ;;  %v371_v55 = vadd.f32 %v3720_v3, %v335_v40  ;;  %v3582_v36 = vld [vmem:[%s4974_s3 + $0x40] sm:$0xff] }
  0x20   : > { %462 = vst.msk [vmem:[#allocation2 + $0xe0] sm:$0xff] %vm432_vm0, %v3644_v1  ;;  %v395_v43 = vadd.f32 %v3720_v3, %v359_v26  ;;  %v419_v50 = vmax.f32 %v387_v35, 0.0  ;;  %v336_v60 = vmul.f32 %v3703_v2, %v300_v56  ;;  %v381_v0 = vadd.f32 %v3720_v3, %v345_v52  ;;  %2870 = vmatpush.msra.mxu0 %v3582_v36 }
  0x21   : > { %464 = vst.msk [vmem:[#allocation2 + $0xf0] sm:$0xff] %vm432_vm0, %v3644_v1  ;;  %v412_v63 = vmax.f32 %v380_v47, 0.0  ;;  %v403_v9 = vmax.f32 %v371_v55, 0.0  ;;  %v799_v47 = vld [vmem:[#allocation2 + $0x1] sm:$0xff] }
  0x22   : > { %465 = vst.msk [vmem:[#allocation2 + $0xf8] sm:$0xff] %vm432_vm0, %v3644_v1  ;;  %v427_v58 = vmax.f32 %v395_v43, 0.0 }
  0x23   : > { %467 = vst.msk [vmem:[#allocation2 + $0x108] sm:$0xff] %vm432_vm0, %v3644_v1 }
  0x24   : > { %468 = vst.msk [vmem:[#allocation2 + $0x110] sm:$0xff] %vm432_vm0, %v3644_v1 }
  0x25   : > { %470 = vst.msk [vmem:[#allocation2 + $0x120] sm:$0xff] %vm432_vm0, %v3644_v1 }
  0x26   : > { %471 = vst.msk [vmem:[#allocation2 + $0x128] sm:$0xff] %vm432_vm0, %v3644_v1 }
  0x27   : > { %473 = vst.msk [vmem:[#allocation2 + $0x138] sm:$0xff] %vm432_vm0, %v3644_v1 }
  0x28   : > { %474 = vst.msk [vmem:[#allocation2 + $0x140] sm:$0xff] %vm432_vm0, %v3644_v1 }
  0x29   : > { %476 = vst.msk [vmem:[#allocation2 + $0x150] sm:$0xff] %vm432_vm0, %v3644_v1 }
  0x2a   : > { %477 = vst.msk [vmem:[#allocation2 + $0x158] sm:$0xff] %vm432_vm0, %v3644_v1 }
  0x2b   : > { %479 = vst.msk [vmem:[#allocation2 + $0x168] sm:$0xff] %vm432_vm0, %v3644_v1 }
  0x2c   : > { %480 = vst.msk [vmem:[#allocation2 + $0x170] sm:$0xff] %vm432_vm0, %v3644_v1 }
  0x2d   : > { %482 = vst.msk [vmem:[#allocation2 + $0x180] sm:$0xff] %vm432_vm0, %v3644_v1 }
  0x2e   : > { %483 = vst.msk [vmem:[#allocation2 + $0x188] sm:$0xff] %vm432_vm0, %v3644_v1 }
  0x2f   : > { %485 = vst.msk [vmem:[#allocation2 + $0x198] sm:$0xff] %vm432_vm0, %v3644_v1 }
  0x30   : > { %486 = vst.msk [vmem:[#allocation2 + $0x1a0] sm:$0xff] %vm432_vm0, %v3644_v1 }
  0x31   : > { %503 = vst.msk [vmem:[#allocation2 + $0xc1] sm:$0xff] %vm432_vm0, %v414_v21  ;;  %v369_v21 = vadd.f32 %v3720_v3, %v333_v6  ;;  %v420_v6 = vmax.f32 %v388_v51, 0.0 }
  0x32   : > { %511 = vst.msk [vmem:[#allocation2 + $0x121] sm:$0xff] %vm432_vm0, %v422_v22  ;;  %v334_v22 = vmul.f32 %v3703_v2, %v298_v12 }
  0x33   : > { %448 = vst.msk [vmem:[#allocation2 + $0x70] sm:$0x3] %vm435_vm1, %v3644_v1  ;;  %v401_v38 = vmax.f32 %v369_v21, 0.0 }
  0x34   : > { %496 = vst.msk [vmem:[#allocation2 + $0x69] sm:$0xff] %vm432_vm0, %v407_v25  ;;  %v394_v25 = vadd.f32 %v3720_v3, %v358_v10  ;;  %v370_v39 = vadd.f32 %v3720_v3, %v334_v22  ;;  %v372_v10 = vadd.f32 %v3720_v3, %v336_v60 }
  0x35   : > { %436 = vst.msk [vmem:[#allocation2 + $0x10] sm:$0x3] %vm435_vm1, %v3644_v1 }
  0x36   : > { %439 = vst.msk [vmem:[#allocation2 + $0x28] sm:$0x3] %vm435_vm1, %v3644_v1  ;;  %v426_v42 = vmax.f32 %v394_v25, 0.0  ;;  %v402_v54 = vmax.f32 %v370_v39, 0.0  ;;  %v404_v15 = vmax.f32 %v372_v10, 0.0 }
  0x37   : > { %442 = vst.msk [vmem:[#allocation2 + $0x40] sm:$0x3] %vm435_vm1, %v3644_v1 }
  0x38   : > { %v3831_v28 = vld [vmem:[#allocation2 + $0xc0] sm:$0xff]  ;;  %445 = vst.msk [vmem:[#allocation2 + $0x58] sm:$0x3] %vm435_vm1, %v3644_v1 }
  0x39   : > { %3335 = vmatmul.msk.f32.vlgmr.msra.gmra.mxu2 %vm432_vm0, %v3831_v28  ;;  %v549_v30 = vld [vmem:[#allocation2 + $0x120] sm:$0xff]  ;;  %451 = vst.msk [vmem:[#allocation2 + $0x88] sm:$0x3] %vm435_vm1, %v3644_v1 }
  0x3a   : > { %3343 = vmatmul.msk.f32.vlgmr.msra.gmra.mxu3 %vm432_vm0, %v549_v30  ;;  %454 = vst.msk [vmem:[#allocation2 + $0xa0] sm:$0x3] %vm435_vm1, %v3644_v1  ;;  %v379_v30 = vadd.f32 %v3720_v3, %v343_v14  ;;  %2320 = vmatpush.msra.mxu2 %v3516_v27 }
  0x3b   : > { %v3846_v34 = vld [vmem:[#allocation2 + $0x68] sm:$0xff]  ;;  %457 = vst.msk [vmem:[#allocation2 + $0xb8] sm:$0x3] %vm435_vm1, %v3644_v1 }
  0x3c   : > { %3328 = vmatmul.msk.f32.gmra.mxu1 %vm432_vm0, %v3846_v34  ;;  %460 = vst.msk [vmem:[#allocation2 + $0xd0] sm:$0x3] %vm435_vm1, %v3644_v1  ;;  %v411_v46 = vmax.f32 %v379_v30, 0.0  ;;  %v3483_v30 = vld [vmem:[%s4974_s3 + $0x28] sm:$0xff] }
  0x3d   : > { %463 = vst.msk [vmem:[#allocation2 + $0xe8] sm:$0x3] %vm435_vm1, %v3644_v1  ;;  %2044 = vmatpush.msra.mxu1 %v3483_v30  ;;  %v1075_v52 = vld [vmem:[#allocation2 + $0xa] sm:$0xff] }
  0x3e   : > { %466 = vst.msk [vmem:[#allocation2 + $0x100] sm:$0x3] %vm435_vm1, %v3644_v1 }
  0x3f   : > { %469 = vst.msk [vmem:[#allocation2 + $0x118] sm:$0x3] %vm435_vm1, %v3644_v1 }
  0x40   : > { %472 = vst.msk [vmem:[#allocation2 + $0x130] sm:$0x3] %vm435_vm1, %v3644_v1 }
  0x41   : > { %475 = vst.msk [vmem:[#allocation2 + $0x148] sm:$0x3] %vm435_vm1, %v3644_v1 }
  0x42   : > { %478 = vst.msk [vmem:[#allocation2 + $0x160] sm:$0x3] %vm435_vm1, %v3644_v1 }
  0x43   : > { %481 = vst.msk [vmem:[#allocation2 + $0x178] sm:$0x3] %vm435_vm1, %v3644_v1 }
  0x44   : > { %484 = vst.msk [vmem:[#allocation2 + $0x190] sm:$0x3] %vm435_vm1, %v3644_v1 }
  0x45   : > { %487 = vst.msk [vmem:[#allocation2 + $0x1a8] sm:$0x3] %vm435_vm1, %v3644_v1  ;;  %v378_v1 = vadd.f32 %v3720_v3, %v342_v59  ;;  %v396_v59 = vadd.f32 %v3720_v3, %v360_v44 }
  0x46   : > { %504 = vst.msk [vmem:[#allocation2 + $0xc9] sm:$0xff] %vm432_vm0, %v415_v53  ;;  %v353_v53 = vmul.f32 %v3703_v2, %v317_v49  ;;  %v1074_v49 = vld [vmem:[#allocation2 + $0x2] sm:$0xff] }
  0x47   : > { %512 = vst.msk [vmem:[#allocation2 + $0x129] sm:$0xff] %vm432_vm0, %v423_v57  ;;  %v410_v29 = vmax.f32 %v378_v1, 0.0  ;;  %v325_v57 = vld [vmem:[%s3715_s10 + $0xe8] sm:$0xff]  ;;  %v428_v12 = vmax.f32 %v396_v59, 0.0  ;;  %v413_v1 = vmax.f32 %v381_v0, 0.0 }
  0x48   : > { %497 = vst.msk [vmem:[#allocation2 + $0x79] sm:$0xff] %vm432_vm0, %v408_v61  ;;  %v361_v61 = vmul.f32 %v3703_v2, %v325_v57  ;;  %v389_v7 = vadd.f32 %v3720_v3, %v353_v53 }
  0x49   : > { %505 = vst.msk [vmem:[#allocation2 + $0xd9] sm:$0xff] %vm432_vm0, %v416_v4 }
  0x4a   : > { %513 = vst.msk [vmem:[#allocation2 + $0x139] sm:$0xff] %vm432_vm0, %v424_v8  ;;  %v421_v14 = vmax.f32 %v389_v7, 0.0 }
  0x4b   : > { %498 = vst.msk [vmem:[#allocation2 + $0x81] sm:$0xff] %vm432_vm0, %v409_v13  ;;  %v397_v13 = vadd.f32 %v3720_v3, %v361_v61  ;;  %v4129_v61 = vld [vmem:[#allocation2 + $0x61] sm:$0xff] }
  0x4c   : > { %506 = vst.msk [vmem:[#allocation2 + $0xe1] sm:$0xff] %vm432_vm0, %v417_v16  ;;  %v301_v16 = vld [vmem:[%s3715_s10 + $0x28] sm:$0xff] }
  0x4d   : > { %v3929_v37 = vld [vmem:[#allocation2 + $0xc8] sm:$0xff]  ;;  %489 = vst.msk [vmem:[#allocation2 + $0x19] sm:$0xff] %vm432_vm0, %v400_v20  ;;  %v429_v18 = vmax.f32 %v397_v13, 0.0  ;;  %v337_v19 = vmul.f32 %v3703_v2, %v301_v16 }
  0x4e   : > { %3336 = vmatmul.msk.f32.gmra.mxu2 %vm432_vm0, %v3929_v37  ;;  %v3936_v41 = vld [vmem:[#allocation2 + $0x128] sm:$0xff]  ;;  %514 = vst.msk [vmem:[#allocation2 + $0x141] sm:$0xff] %vm432_vm0, %v425_v24 }
  0x4f   : > { %3344 = vmatmul.msk.f32.gmra.mxu3 %vm432_vm0, %v3936_v41  ;;  %v3943_v45 = vld [vmem:[#allocation2 + $0x78] sm:$0xff]  ;;  %499 = vst.msk [vmem:[#allocation2 + $0x91] sm:$0xff] %vm432_vm0, %v410_v29  ;;  %v373_v22 = vadd.f32 %v3720_v3, %v337_v19 }
  0x50   : > { %3329 = vmatmul.msk.f32.gmra.mxu1 %vm432_vm0, %v3943_v45  ;;  %507 = vst.msk [vmem:[#allocation2 + $0xf1] sm:$0xff] %vm432_vm0, %v418_v33  ;;  %v3963_v62 = vld [vmem:[#allocation2 + $0xd8] sm:$0xff] }
  0x51   : > { %490 = vst.msk [vmem:[#allocation2 + $0x21] sm:$0xff] %vm432_vm0, %v401_v38  ;;  %v3967_v4 = vld [vmem:[#allocation2 + $0x138] sm:$0xff]  ;;  %v405_v2 = vmax.f32 %v373_v22, 0.0 }
  0x52   : > { %515 = vst.msk [vmem:[#allocation2 + $0x151] sm:$0xff] %vm432_vm0, %v426_v42  ;;  %v3973_v8 = vld [vmem:[#allocation2 + $0x80] sm:$0xff]  ;;  %v3549_v29 = vld [vmem:[%s4974_s3 + $0x38] sm:$0xff] }
  0x53   : > { %500 = vst.msk [vmem:[#allocation2 + $0x99] sm:$0xff] %vm432_vm0, %v411_v46  ;;  %v3995_v20 = vld [vmem:[#allocation2 + $0xe0] sm:$0xff]  ;;  %2595 = vmatpush.msra.mxu3 %v3549_v29 }
  0x54   : > { %v3969_v5 = vld [vmem:[#allocation2 + $0x18] sm:$0xff]  ;;  %508 = vst.msk [vmem:[#allocation2 + $0xf9] sm:$0xff] %vm432_vm0, %v419_v50  ;;  %v800_v50 = vld [vmem:[#allocation2 + $0x9] sm:$0xff] }
  0x55   : > { %3321 = vmatmul.msk.f32.gmra.mxu0 %vm432_vm0, %v3969_v5  ;;  %491 = vst.msk [vmem:[#allocation2 + $0x31] sm:$0xff] %vm432_vm0, %v402_v54  ;;  %v3998_v21 = vld [vmem:[#allocation2 + $0x140] sm:$0xff] }
  0x56   : > { %3337 = vmatmul.msk.f32.gmra.mxu2 %vm432_vm0, %v3963_v62  ;;  %516 = vst.msk [vmem:[#allocation2 + $0x159] sm:$0xff] %vm432_vm0, %v427_v58  ;;  %v4002_v23 = vld [vmem:[#allocation2 + $0x90] sm:$0xff]  ;;  %v1624_v48 = vld [vmem:[#allocation2 + $0x19] sm:$0xff]  ;;  %v4219_v29 = vld [vmem:[#allocation2 + $0x82] sm:$0xff] }
  0x57   : > { %3345 = vmatmul.msk.f32.gmra.mxu3 %vm432_vm0, %v3967_v4  ;;  %501 = vst.msk [vmem:[#allocation2 + $0xa9] sm:$0xff] %vm432_vm0, %v412_v63  ;;  %v4015_v24 = vld [vmem:[#allocation2 + $0xf0] sm:$0xff]  ;;  %v4199_v19 = vld [vmem:[#allocation2 + $0x7a] sm:$0xff] }
  0x58   : > { %3330 = vmatmul.msk.f32.gmra.mxu1 %vm432_vm0, %v3973_v8  ;;  %509 = vst.msk [vmem:[#allocation2 + $0x109] sm:$0xff] %vm432_vm0, %v420_v6  ;;  %v3991_v17 = vld [vmem:[#allocation2 + $0x20] sm:$0xff] }
  0x59   : > { %492 = vst.msk [vmem:[#allocation2 + $0x39] sm:$0xff] %vm432_vm0, %v403_v9  ;;  %v4017_v25 = vld [vmem:[#allocation2 + $0x150] sm:$0xff]  ;;  %v1625_v51 = vld [vmem:[#allocation2 + $0x21] sm:$0xff] }
  0x5a   : > { %517 = vst.msk [vmem:[#allocation2 + $0x169] sm:$0xff] %vm432_vm0, %v428_v12  ;;  %v4019_v26 = vld [vmem:[#allocation2 + $0x98] sm:$0xff]  ;;  %v4098_v56 = vld [vmem:[#allocation2 + $0x22] sm:$0xff] }
  0x5b   : > { %502 = vst.msk [vmem:[#allocation2 + $0xb1] sm:$0xff] %vm432_vm0, %v413_v1  ;;  %v4037_v32 = vld [vmem:[#allocation2 + $0xf8] sm:$0xff]  ;;  %v4159_v9 = vld [vmem:[#allocation2 + $0x62] sm:$0xff] }
  0x5c   : > { %510 = vst.msk [vmem:[#allocation2 + $0x111] sm:$0xff] %vm432_vm0, %v421_v14  ;;  %v529_v3 = vld [vmem:[#allocation2 + $0x30] sm:$0xff]  ;;  %v4088_v54 = vld [vmem:[#allocation2 + $0x1a] sm:$0xff] }
  0x5d   : > { %3322 = vmatmul.msk.f32.gmra.mxu0 %vm432_vm0, %v3991_v17  ;;  %493 = vst.msk [vmem:[#allocation2 + $0x49] sm:$0xff] %vm432_vm0, %v404_v15  ;;  %v4039_v33 = vld [vmem:[#allocation2 + $0x158] sm:$0xff]  ;;  %v4177_v1 = vld [vmem:[#allocation2 + $0x81] sm:$0xff]  ;;  %v4179_v14 = vld [vmem:[#allocation2 + $0x6a] sm:$0xff] }
  0x5e   : > { %3338 = vmatmul.msk.f32.gmra.mxu2 %vm432_vm0, %v3995_v20  ;;  %518 = vst.msk [vmem:[#allocation2 + $0x171] sm:$0xff] %vm432_vm0, %v429_v18  ;;  %v4041_v35 = vld [vmem:[#allocation2 + $0xa8] sm:$0xff]  ;;  %v4086_v53 = vld [vmem:[#allocation2 + $0x31] sm:$0xff]  ;;  %v4217_v27 = vld [vmem:[#allocation2 + $0x99] sm:$0xff] }
  0x5f   : > { %3346 = vmatmul.msk.f32.gmra.mxu3 %vm432_vm0, %v3998_v21  ;;  %494 = vst.msk [vmem:[#allocation2 + $0x51] sm:$0xff] %vm432_vm0, %v405_v2  ;;  %v4053_v39 = vld [vmem:[#allocation2 + $0x108] sm:$0xff]  ;;  %v4197_v18 = vld [vmem:[#allocation2 + $0x91] sm:$0xff] }
  0x60   : > { %3331 = vmatmul.msk.f32.gmra.mxu1 %vm432_vm0, %v4002_v23  ;;  %v530_v31 = vld [vmem:[#allocation2 + $0x38] sm:$0xff]  ;;  %5010 = vst [vmem:[#allocation6_spill] sm:$0xff] %v4177_v1 }
  0x61   : > { %v4055_v40 = vld [vmem:[#allocation2 + $0x168] sm:$0xff]  ;;  %v4096_v55 = vld [vmem:[#allocation2 + $0x39] sm:$0xff]  ;;  %5012 = vst [vmem:[#allocation8_spill] sm:$0xff] %v4197_v18 }
  0x62   : > { %v4057_v42 = vld [vmem:[#allocation2 + $0xb0] sm:$0xff]  ;;  %v4120_v60 = vld [vmem:[#allocation2 + $0x3a] sm:$0xff]  ;;  %5013 = vst [vmem:[#allocation9_spill] sm:$0xff] %v4199_v19 }
  0x63   : > { %v4066_v44 = vld [vmem:[#allocation2 + $0x110] sm:$0xff]  ;;  %5015 = vst [vmem:[#allocation11_spill] sm:$0xff] %v4217_v27 }
  0x64   : > { %v531_v38 = vld [vmem:[#allocation2 + $0x48] sm:$0xff]  ;;  %v4109_v58 = vld [vmem:[#allocation2 + $0x32] sm:$0xff]  ;;  %5016 = vst [vmem:[#allocation12_spill] sm:$0xff] %v4219_v29 }
  0x65   : > { %3323 = vmatmul.msk.f32.gmra.mxu0 %vm432_vm0, %v529_v3  ;;  %v4068_v46 = vld [vmem:[#allocation2 + $0x170] sm:$0xff] }
  0x66   : > { %3339 = vmatmul.msk.f32.gmra.mxu2 %vm432_vm0, %v4015_v24  ;;  %v532_v43 = vld [vmem:[#allocation2 + $0x50] sm:$0xff] }
  0x67   : > { %3347 = vmatmul.msk.f32.gmra.mxu3 %vm432_vm0, %v4017_v25  ;;  %v4107_v57 = vld [vmem:[#allocation2 + $0x49] sm:$0xff]  ;;  %v4118_v59 = vld [vmem:[#allocation2 + $0x51] sm:$0xff] }
  0x68   : > { %3332 = vmatmul.msk.f32.gmra.mxu1 %vm432_vm0, %v4019_v26  ;;  %v4131_v63 = vld [vmem:[#allocation2 + $0x4a] sm:$0xff]  ;;  %v4145_v6 = vld [vmem:[#allocation2 + $0x52] sm:$0xff] }
  0x6d   : > { %3324 = vmatmul.msk.f32.gmra.mxu0 %vm432_vm0, %v530_v31 }
  0x6e   : > { %3340 = vmatmul.msk.f32.gmra.mxu2 %vm432_vm0, %v4037_v32 }
  0x6f   : > { %3348 = vmatmul.msk.f32.gmra.mxu3 %vm432_vm0, %v4039_v33 }
  0x70   : > { %3333 = vmatmul.msk.f32.gmra.mxu1 %vm432_vm0, %v4041_v35 }
  0x75   : > { %3325 = vmatmul.msk.f32.gmra.mxu0 %vm432_vm0, %v531_v38 }
  0x76   : > { %3341 = vmatmul.msk.f32.gmra.mxu2 %vm432_vm0, %v4053_v39 }
  0x77   : > { %3349 = vmatmul.msk.f32.gmra.mxu3 %vm432_vm0, %v4055_v40 }
  0x78   : > { %3334 = vmatmul.msk.f32.gmra.mxu1 %vm432_vm0, %v4057_v42 }
  0x7d   : > { %3326 = vmatmul.msk.f32.gmra.mxu0 %vm432_vm0, %v532_v43 }
  0x7e   : > { %3342 = vmatmul.msk.f32.gmra.mxu2 %vm432_vm0, %v4066_v44 }
  0x7f   : > { %3350 = vmatmul.msk.f32.gmra.mxu3 %vm432_vm0, %v4068_v46 }
  0x80   : > { %3352 = vmatmul.msk.f32.vlgmr.msrb.gmra.mxu1 %vm432_vm0, %v799_v47 }
  0x85   : > { %3451 = vmatmul.msk.f32.vlgmr.msrb.gmra.mxu0 %vm432_vm0, %v1624_v48 }
  0x86   : > { %3385 = vmatmul.msk.f32.vlgmr.msrb.gmra.mxu2 %vm432_vm0, %v1074_v49 }
  0x87   : > { %3418 = vmatmul.msk.f32.vlgmr.msrb.gmra.mxu3 %vm432_vm0, %v3969_v5  ;;  %v4143_v5 = vld [vmem:[#allocation2 + $0x69] sm:$0xff] }
  0x88   : > { %3353 = vmatmul.msk.f32.gmra.mxu1 %vm432_vm0, %v800_v50  ;;  %5007 = vst [vmem:[#allocation3_spill] sm:$0xff] %v4143_v5  ;;  %v4257_v50 = vld [vmem:[#allocation2 + $0xb1] sm:$0xff] }
  0x89   : > { %5021 = vst [vmem:[#allocation17_spill] sm:$0xff] %v4257_v50 }
  0x8d   : > { %3452 = vmatmul.msk.f32.gmra.mxu0 %vm432_vm0, %v1625_v51 }
  0x8e   : > { %3386 = vmatmul.msk.f32.gmra.mxu2 %vm432_vm0, %v1075_v52 }
  0x8f   : > { %3419 = vmatmul.msk.f32.gmra.mxu3 %vm432_vm0, %v3991_v17 }
  0x90   : > { %3354 = vmatmul.msk.f32.gmra.mxu1 %vm432_vm0, %v1624_v48 }
  0x93   : > { %v4151_v7 = vpop.f32.mrf.mxu0 }
  0x95   : > { %3453 = vmatmul.msk.f32.gmra.mxu0 %vm432_vm0, %v4086_v53 }
  0x96   : > { %3387 = vmatmul.msk.f32.gmra.mxu2 %vm432_vm0, %v4088_v54 }
  0x97   : > { %3420 = vmatmul.msk.f32.gmra.mxu3 %vm432_vm0, %v529_v3 }
  0x98   : > { %3355 = vmatmul.msk.f32.gmra.mxu1 %vm432_vm0, %v1625_v51  ;;  %v4259_v51 = vld [vmem:[#allocation2 + $0x9a] sm:$0xff] }
  0x99   : > { %5022 = vst [vmem:[#allocation18_spill] sm:$0xff] %v4259_v51 }
  0x9b   : > { %v4175_v13 = vpop.f32.mrf.mxu0 }
  0x9c   : > { %v4141_v0 = vpop.f32.mrf.mxu1 }
  0x9d   : > { %3454 = vmatmul.msk.f32.gmra.mxu0 %vm432_vm0, %v4096_v55 }
  0x9e   : > { %3388 = vmatmul.msk.f32.gmra.mxu2 %vm432_vm0, %v4098_v56 }
  0x9f   : > { %3421 = vmatmul.msk.f32.gmra.mxu3 %vm432_vm0, %v530_v31 }
  0xa0   : > { %3356 = vmatmul.msk.f32.gmra.mxu1 %vm432_vm0, %v4086_v53 }
  0xa5   : > { %3455 = vmatmul.msk.f32.gmra.mxu0 %vm432_vm0, %v4107_v57 }
  0xa6   : > { %3389 = vmatmul.msk.f32.gmra.mxu2 %vm432_vm0, %v4109_v58 }
  0xa7   : > { %3422 = vmatmul.msk.f32.gmra.mxu3 %vm432_vm0, %v531_v38  ;;  %v4237_v38 = vld [vmem:[#allocation2 + $0xa9] sm:$0xff] }
  0xa8   : > { %3357 = vmatmul.msk.f32.gmra.mxu1 %vm432_vm0, %v4096_v55  ;;  %5018 = vst [vmem:[#allocation14_spill] sm:$0xff] %v4237_v38 }
  0xad   : > { %3456 = vmatmul.msk.f32.gmra.mxu0 %vm432_vm0, %v4118_v59 }
  0xae   : > { %3390 = vmatmul.msk.f32.gmra.mxu2 %vm432_vm0, %v4120_v60 }
  0xaf   : > { %3423 = vmatmul.msk.f32.gmra.mxu3 %vm432_vm0, %v532_v43  ;;  %v4239_v43 = vld [vmem:[#allocation2 + $0x92] sm:$0xff] }
  0xb0   : > { %3358 = vmatmul.msk.f32.gmra.mxu1 %vm432_vm0, %v4107_v57  ;;  %5019 = vst [vmem:[#allocation15_spill] sm:$0xff] %v4239_v43 }
  0xb5   : > { %3457 = vmatmul.msk.f32.gmra.mxu0 %vm432_vm0, %v4129_v61 }
  0xb6   : > { %3391 = vmatmul.msk.f32.gmra.mxu2 %vm432_vm0, %v4131_v63 }
  0xb7   : > { %3424 = vmatmul.msk.f32.gmra.mxu3 %vm432_vm0, %v3763_v11  ;;  %v4157_v11 = vld [vmem:[#allocation2 + $0x79] sm:$0xff] }
  0xb8   : > { %3359 = vmatmul.msk.f32.gmra.mxu1 %vm432_vm0, %v4118_v59  ;;  %5008 = vst [vmem:[#allocation4_spill] sm:$0xff] %v4157_v11 }
  0xb9   : > { %v4161_v10 = vpop.f32.mrf.mxu1 }
  0xbc   : > { %v4169_v12 = vpop.f32.mrf.mxu2 }
  0xbd   : > { %3458 = vmatmul.msk.f32.gmra.mxu0 %vm432_vm0, %v4143_v5 }
  0xbe   : > { %3392 = vmatmul.msk.f32.gmra.mxu2 %vm432_vm0, %v4145_v6 }
  0xbf   : > { %3425 = vmatmul.msk.f32.gmra.mxu3 %vm432_vm0, %v3846_v34  ;;  %v4171_v34 = vpop.f32.mrf.mxu3 }
  0xc0   : > { %3360 = vmatmul.msk.f32.gmra.mxu1 %vm432_vm0, %v4129_v61  ;;  %5009 = vst [vmem:[#allocation5_spill] sm:$0xff] %v4171_v34 }
  0xc5   : > { %3459 = vmatmul.msk.f32.gmra.mxu0 %vm432_vm0, %v4157_v11 }
  0xc6   : > { %3393 = vmatmul.msk.f32.gmra.mxu2 %vm432_vm0, %v4159_v9 }
  0xc7   : > { %3426 = vmatmul.msk.f32.gmra.mxu3 %vm432_vm0, %v3943_v45 }
  0xc8   : > { %3361 = vmatmul.msk.f32.gmra.mxu1 %vm432_vm0, %v4143_v5 }
  0xcd   : > { %v4181_v15 = vpop.f32.mrf.mxu1  ;;  %3460 = vmatmul.msk.f32.gmra.mxu0 %vm432_vm0, %v4177_v1 }
  0xce   : > { %3394 = vmatmul.msk.f32.gmra.mxu2 %vm432_vm0, %v4179_v14 }
  0xcf   : > { %3427 = vmatmul.msk.f32.gmra.mxu3 %vm432_vm0, %v3973_v8 }
  0xd0   : > { %3362 = vmatmul.msk.f32.gmra.mxu1 %vm432_vm0, %v4157_v11 }
  0xd1   : > { %v4191_v45 = vpop.f32.mrf.mxu2 }
  0xd2   : > { %v4193_v16 = vpop.f32.mrf.mxu3  ;;  %v4195_v17 = vpop.f32.mrf.mxu0 }
  0xd3   : > { %5011 = vst [vmem:[#allocation7_spill] sm:$0xff] %v4193_v16 }
  0xd5   : > { %v4201_v22 = vpop.f32.mrf.mxu1  ;;  %3461 = vmatmul.msk.f32.gmra.mxu0 %vm432_vm0, %v4197_v18 }
  0xd6   : > { %3395 = vmatmul.msk.f32.gmra.mxu2 %vm432_vm0, %v4199_v19  ;;  %v4334_v19 = vld [vmem:[#allocation2 + $0xca] sm:$0xff] }
  0xd7   : > { %3428 = vmatmul.msk.f32.gmra.mxu3 %vm432_vm0, %v4002_v23 }
  0xd8   : > { %3363 = vmatmul.msk.f32.gmra.mxu1 %vm432_vm0, %v4177_v1  ;;  %v4320_v1 = vld [vmem:[%s4975_s4] ss:$0 sm:$0xff] }
  0xd9   : > { %v4211_v8 = vpop.f32.mrf.mxu2 }
  0xda   : > { %v4213_v2 = vpop.f32.mrf.mxu3  ;;  %v4215_v3 = vpop.f32.mrf.mxu0 }
  0xdb   : > { %5014 = vst [vmem:[#allocation10_spill] sm:$0xff] %v4213_v2  ;;  %v4277_v2 = vld [vmem:[#allocation2 + $0xc1] sm:$0xff] }
  0xdc   : > { %5024 = vst [vmem:[#allocation20_spill] sm:$0xff] %v4277_v2 }
  0xdd   : > { %v4221_v30 = vpop.f32.mrf.mxu1  ;;  %3462 = vmatmul.msk.f32.gmra.mxu0 %vm432_vm0, %v4217_v27 }
  0xde   : > { %3396 = vmatmul.msk.f32.gmra.mxu2 %vm432_vm0, %v4219_v29 }
  0xdf   : > { %3429 = vmatmul.msk.f32.gmra.mxu3 %vm432_vm0, %v4019_v26 }
  0xe0   : > { %3364 = vmatmul.msk.f32.gmra.mxu1 %vm432_vm0, %v4197_v18  ;;  %v4299_v18 = vld [vmem:[#allocation2 + $0xb2] sm:$0xff] }
  0xe1   : > { %v4231_v23 = vpop.f32.mrf.mxu2  ;;  %5029 = vst [vmem:[#allocation25_spill] sm:$0xff] %v4299_v18 }
  0xe2   : > { %v4233_v31 = vpop.f32.mrf.mxu3  ;;  %v4235_v36 = vpop.f32.mrf.mxu0 }
  0xe3   : > { %5017 = vst [vmem:[#allocation13_spill] sm:$0xff] %v4233_v31 }
  0xe5   : > { %v4241_v47 = vpop.f32.mrf.mxu1  ;;  %3463 = vmatmul.msk.f32.gmra.mxu0 %vm432_vm0, %v4237_v38 }
  0xe6   : > { %3397 = vmatmul.msk.f32.gmra.mxu2 %vm432_vm0, %v4239_v43  ;;  %v4315_v43 = vld [vmem:[#allocation2 + $0xc2] sm:$0xff] }
  0xe7   : > { %3430 = vmatmul.msk.f32.gmra.mxu3 %vm432_vm0, %v4041_v35  ;;  %5032 = vst [vmem:[#allocation28_spill] sm:$0xff] %v4315_v43 }
  0xe8   : > { %3365 = vmatmul.msk.f32.gmra.mxu1 %vm432_vm0, %v4217_v27  ;;  %v4279_v27 = vld [vmem:[#allocation2 + $0xaa] sm:$0xff] }
  0xe9   : > { %v4251_v26 = vpop.f32.mrf.mxu2  ;;  %5025 = vst [vmem:[#allocation21_spill] sm:$0xff] %v4279_v27 }
  0xea   : > { %v4253_v48 = vpop.f32.mrf.mxu3  ;;  %v4255_v49 = vpop.f32.mrf.mxu0 }
  0xeb   : > { %5020 = vst [vmem:[#allocation16_spill] sm:$0xff] %v4253_v48 }
  0xed   : > { %v4261_v52 = vpop.f32.mrf.mxu1  ;;  %3464 = vmatmul.msk.f32.gmra.mxu0 %vm432_vm0, %v4257_v50 }
  0xee   : > { %3398 = vmatmul.msk.f32.gmra.mxu2 %vm432_vm0, %v4259_v51  ;;  %v4297_v51 = vld [vmem:[#allocation2 + $0xc9] sm:$0xff] }
  0xef   : > { %3431 = vmatmul.msk.f32.gmra.mxu3 %vm432_vm0, %v4057_v42  ;;  %5028 = vst [vmem:[#allocation24_spill] sm:$0xff] %v4297_v51 }
  0xf0   : > { %3366 = vmatmul.msk.f32.gmra.mxu1 %vm432_vm0, %v4237_v38 }
  0xf1   : > { %v4271_v35 = vpop.f32.mrf.mxu2 }
  0xf2   : > { %v4273_v48 = vpop.f32.mrf.mxu3  ;;  %v4275_v31 = vpop.f32.mrf.mxu0 }
  0xf3   : > { %5023 = vst [vmem:[#allocation19_spill] sm:$0xff] %v4273_v48 }
  0xf5   : > { %v4281_v16 = vpop.f32.mrf.mxu1  ;;  %3465 = vmatmul.msk.f32.gmra.mxu0 %vm432_vm0, %v4277_v2 }
  0xf6   : > { %3399 = vmatmul.msk.f32.gmra.mxu2 %vm432_vm0, %v4279_v27  ;;  %v4313_v27 = vld [vmem:[#allocation2 + $0xd9] sm:$0xff] }
  0xf7   : > { %3432 = vmatmul.msk.f32.gmra.mxu3 %vm432_vm0, %v3831_v28 }
  0xf8   : > { %3367 = vmatmul.msk.f32.gmra.mxu1 %vm432_vm0, %v4257_v50 }
  0xf9   : > { %v4291_v42 = vpop.f32.mrf.mxu2 }
  0xfa   : > { %5026 = vst [vmem:[#allocation22_spill] sm:$0xff] %v4291_v42  ;;  %v4293_v48 = vpop.f32.mrf.mxu3  ;;  %v4295_v38 = vpop.f32.mrf.mxu0  ;;  %v4332_v42 = vld [vmem:[#allocation2 + $0xe1] sm:$0xff] }
  0xfb   : > { %5027 = vst [vmem:[#allocation23_spill] sm:$0xff] %v4293_v48 }
  0xfd   : > { %v946_v34 = vpop.f32.mrf.mxu1  ;;  %3466 = vmatmul.msk.f32.gmra.mxu0 %vm432_vm0, %v4297_v51 }
  0xfe   : > { %3400 = vmatmul.msk.f32.gmra.mxu2 %vm432_vm0, %v4299_v18 }
  0xff   : > { %3433 = vmatmul.msk.f32.gmra.mxu3 %vm432_vm0, %v3929_v37  ;;  %v767_v37 = vadd.f32 %v4320_v1, %v4151_v7 }
 0x100   : > { %3368 = vmatmul.msk.f32.gmra.mxu1 %vm432_vm0, %v4277_v2 }
 0x101   : > { %v4309_v28 = vpop.f32.mrf.mxu2 }
 0x102   : > { %5030 = vst [vmem:[#allocation26_spill] sm:$0xff] %v4309_v28  ;;  %v4311_v48 = vpop.f32.mrf.mxu3  ;;  %v1771_v50 = vpop.f32.mrf.mxu0 }
 0x103   : > { %5031 = vst [vmem:[#allocation27_spill] sm:$0xff] %v4311_v48  ;;  %v1042_v48 = vadd.f32 %v946_v34, %v767_v37 }
 0x105   : > { %v949_v18 = vpop.f32.mrf.mxu1  ;;  %3467 = vmatmul.msk.f32.gmra.mxu0 %vm432_vm0, %v4313_v27 }
 0x106   : > { %3401 = vmatmul.msk.f32.gmra.mxu2 %vm432_vm0, %v4315_v43  ;;  %v4350_v43 = vld [vmem:[#allocation2 + $0xda] sm:$0xff] }
 0x107   : > { %3434 = vmatmul.msk.f32.gmra.mxu3 %vm432_vm0, %v3963_v62  ;;  %v768_v62 = vadd.f32 %v4320_v1, %v4175_v13 }
 0x108   : > { %3369 = vmatmul.msk.f32.gmra.mxu1 %vm432_vm0, %v4297_v51  ;;  %v4348_v51 = vld [vmem:[#allocation2 + $0xf1] sm:$0xff] }
 0x109   : > { %v1221_v2 = vpop.f32.mrf.mxu2 }
 0x10a   : > { %v1317_v28 = vadd.f32 %v1221_v2, %v1042_v48  ;;  %v1496_v29 = vpop.f32.mrf.mxu3  ;;  %v1774_v11 = vpop.f32.mrf.mxu0  ;;  %v1043_v2 = vadd.f32 %v949_v18, %v768_v62 }
 0x10c   : > { %v1592_v5 = vadd.f32 %v1496_v29, %v1317_v28 }
 0x10d   : > { %v952_v7 = vpop.f32.mrf.mxu1  ;;  %3468 = vmatmul.msk.f32.gmra.mxu0 %vm432_vm0, %v4332_v42 }
 0x10e   : > { %v4340_v34 = vadd.f32 %v1771_v50, %v1592_v5  ;;  %3402 = vmatmul.msk.f32.gmra.mxu2 %vm432_vm0, %v4334_v19 }
 0x10f   : > { %3435 = vmatmul.msk.f32.gmra.mxu3 %vm432_vm0, %v3995_v20  ;;  %v769_v20 = vadd.f32 %v4320_v1, %v4195_v17 }
 0x110   : > { %5033 = vst [vmem:[#allocation29_spill] sm:$0xff] %v4340_v34  ;;  %3370 = vmatmul.msk.f32.gmra.mxu1 %vm432_vm0, %v4313_v27  ;;  %v4366_v34 = vld [vmem:[#allocation2 + $0xe2] sm:$0xff] }
 0x111   : > { %v1224_v29 = vpop.f32.mrf.mxu2  ;;  %v1044_v50 = vadd.f32 %v952_v7, %v769_v20 }
 0x112   : > { %v1318_v48 = vadd.f32 %v1224_v29, %v1043_v2  ;;  %v1499_v28 = vpop.f32.mrf.mxu3  ;;  %v1777_v37 = vpop.f32.mrf.mxu0 }
 0x114   : > { %v1593_v5 = vadd.f32 %v1499_v28, %v1318_v48  ;;  %v4364_v28 = vld [vmem:[#allocation2 + $0xf9] sm:$0xff] }
 0x115   : > { %v955_v13 = vpop.f32.mrf.mxu1  ;;  %3469 = vmatmul.msk.f32.gmra.mxu0 %vm432_vm0, %v4348_v51 }
 0x116   : > { %v4356_v18 = vadd.f32 %v1774_v11, %v1593_v5  ;;  %3403 = vmatmul.msk.f32.gmra.mxu2 %vm432_vm0, %v4350_v43 }
 0x117   : > { %3436 = vmatmul.msk.f32.gmra.mxu3 %vm432_vm0, %v4015_v24  ;;  %v770_v24 = vadd.f32 %v4320_v1, %v4215_v3 }
 0x118   : > { %5034 = vst [vmem:[#allocation30_spill] sm:$0xff] %v4356_v18  ;;  %3371 = vmatmul.msk.f32.gmra.mxu1 %vm432_vm0, %v4332_v42  ;;  %v4382_v18 = vld [vmem:[#allocation2 + $0xf2] sm:$0xff] }
 0x119   : > { %v1227_v62 = vpop.f32.mrf.mxu2  ;;  %v1045_v5 = vadd.f32 %v955_v13, %v770_v24 }
 0x11a   : > { %v1319_v2 = vadd.f32 %v1227_v62, %v1044_v50  ;;  %v1502_v29 = vpop.f32.mrf.mxu3  ;;  %v1780_v48 = vpop.f32.mrf.mxu0 }
 0x11c   : > { %v1594_v11 = vadd.f32 %v1502_v29, %v1319_v2  ;;  %v4380_v29 = vld [vmem:[#allocation2 + $0x109] sm:$0xff] }
 0x11d   : > { %v958_v17 = vpop.f32.mrf.mxu1  ;;  %3470 = vmatmul.msk.f32.gmra.mxu0 %vm432_vm0, %v4364_v28  ;;  %5036 = vst [vmem:[#allocation32_spill] sm:$0xff] %v4380_v29 }
 0x11e   : > { %v4372_v7 = vadd.f32 %v1777_v37, %v1594_v11  ;;  %3404 = vmatmul.msk.f32.gmra.mxu2 %vm432_vm0, %v4366_v34 }
 0x11f   : > { %3437 = vmatmul.msk.f32.gmra.mxu3 %vm432_vm0, %v4037_v32  ;;  %v771_v32 = vadd.f32 %v4320_v1, %v4235_v36 }
 0x120   : > { %5035 = vst [vmem:[#allocation31_spill] sm:$0xff] %v4372_v7  ;;  %3372 = vmatmul.msk.f32.gmra.mxu1 %vm432_vm0, %v4348_v51  ;;  %v4398_v7 = vld [vmem:[#allocation2 + $0xfa] sm:$0xff] }
 0x121   : > { %v1230_v20 = vpop.f32.mrf.mxu2  ;;  %v1046_v11 = vadd.f32 %v958_v17, %v771_v32 }
 0x122   : > { %v1320_v50 = vadd.f32 %v1230_v20, %v1045_v5  ;;  %v1505_v62 = vpop.f32.mrf.mxu3  ;;  %v1783_v2 = vpop.f32.mrf.mxu0 }
 0x124   : > { %v1595_v3 = vadd.f32 %v1505_v62, %v1320_v50  ;;  %v4396_v62 = vld [vmem:[#allocation2 + $0x111] sm:$0xff] }
 0x125   : > { %v961_v37 = vpop.f32.mrf.mxu1  ;;  %3471 = vmatmul.msk.f32.gmra.mxu0 %vm432_vm0, %v4380_v29 }
 0x126   : > { %v4388_v13 = vadd.f32 %v1780_v48, %v1595_v3  ;;  %3405 = vmatmul.msk.f32.gmra.mxu2 %vm432_vm0, %v4382_v18 }
 0x127   : > { %3438 = vmatmul.msk.f32.gmra.mxu3 %vm432_vm0, %v4053_v39  ;;  %v772_v39 = vadd.f32 %v4320_v1, %v4255_v49 }
 0x128   : > { %5037 = vst [vmem:[#allocation33_spill] sm:$0xff] %v4388_v13  ;;  %3373 = vmatmul.msk.f32.gmra.mxu1 %vm432_vm0, %v4364_v28  ;;  %v4414_v13 = vld [vmem:[#allocation2 + $0x10a] sm:$0xff] }
 0x129   : > { %v1233_v24 = vpop.f32.mrf.mxu2  ;;  %v1047_v3 = vadd.f32 %v961_v37, %v772_v39 }
 0x12a   : > { %v1321_v5 = vadd.f32 %v1233_v24, %v1046_v11  ;;  %v1508_v20 = vpop.f32.mrf.mxu3  ;;  %v1786_v50 = vpop.f32.mrf.mxu0 }
 0x12c   : > { %v1596_v36 = vadd.f32 %v1508_v20, %v1321_v5  ;;  %v4412_v20 = vld [vmem:[#allocation2 + $0x121] sm:$0xff] }
 0x12d   : > { %v964_v48 = vpop.f32.mrf.mxu1  ;;  %3472 = vmatmul.msk.f32.gmra.mxu0 %vm432_vm0, %v4396_v62  ;;  %5039 = vst [vmem:[#allocation35_spill] sm:$0xff] %v4412_v20 }
 0x12e   : > { %v4404_v17 = vadd.f32 %v1783_v2, %v1596_v36  ;;  %3406 = vmatmul.msk.f32.gmra.mxu2 %vm432_vm0, %v4398_v7  ;;  %v4416_v2 = vld [vmem:[#allocation2 + $0x120] sm:$0xff] }
 0x12f   : > { %3439 = vmatmul.msk.f32.gmra.mxu3 %vm432_vm0, %v4066_v44  ;;  %5040 = vst [vmem:[#allocation36_spill] sm:$0xff] %v4416_v2  ;;  %v773_v44 = vadd.f32 %v4320_v1, %v4275_v31 }
 0x130   : > { %5038 = vst [vmem:[#allocation34_spill] sm:$0xff] %v4404_v17  ;;  %3374 = vmatmul.msk.f32.gmra.mxu1 %vm432_vm0, %v4380_v29  ;;  %v4430_v17 = vld [vmem:[#allocation2 + $0x129] sm:$0xff]  ;;  %v4432_v29 = vld [vmem:[#allocation2 + $0x112] sm:$0xff] }
 0x131   : > { %v1236_v32 = vpop.f32.mrf.mxu2  ;;  %v1048_v39 = vadd.f32 %v964_v48, %v773_v44  ;;  %5042 = vst [vmem:[#allocation38_spill] sm:$0xff] %v4430_v17 }
 0x132   : > { %v1322_v11 = vadd.f32 %v1236_v32, %v1047_v3  ;;  %v1511_v24 = vpop.f32.mrf.mxu3  ;;  %v1789_v5 = vpop.f32.mrf.mxu0 }
 0x134   : > { %v1597_v49 = vadd.f32 %v1511_v24, %v1322_v11 }
 0x135   : > { %v967_v36 = vpop.f32.mrf.mxu1  ;;  %3473 = vmatmul.msk.f32.gmra.mxu0 %vm432_vm0, %v4412_v20 }
 0x136   : > { %v4422_v37 = vadd.f32 %v1786_v50, %v1597_v49  ;;  %3407 = vmatmul.msk.f32.gmra.mxu2 %vm432_vm0, %v4414_v13  ;;  %v774_v49 = vadd.f32 %v4320_v1, %v4295_v38  ;;  %v4448_v38 = vld [vmem:[#allocation2 + $0x122] sm:$0xff] }
 0x137   : > { %3440 = vmatmul.msk.f32.gmra.mxu3 %vm432_vm0, %v4416_v2  ;;  %5044 = vst [vmem:[#allocation40_spill] sm:$0xff] %v4448_v38 }
 0x138   : > { %5041 = vst [vmem:[#allocation37_spill] sm:$0xff] %v4422_v37  ;;  %3375 = vmatmul.msk.f32.gmra.mxu1 %vm432_vm0, %v4396_v62  ;;  %v1049_v44 = vadd.f32 %v967_v36, %v774_v49  ;;  %v4446_v37 = vld [vmem:[#allocation2 + $0x139] sm:$0xff] }
 0x139   : > { %v1239_v3 = vpop.f32.mrf.mxu2 }
 0x13a   : > { %v1323_v32 = vadd.f32 %v1239_v3, %v1048_v39  ;;  %v1514_v11 = vpop.f32.mrf.mxu3  ;;  %v1792_v24 = vpop.f32.mrf.mxu0 }
 0x13c   : > { %v1598_v31 = vadd.f32 %v1514_v11, %v1323_v32 }
 0x13d   : > { %v970_v50 = vpop.f32.mrf.mxu1  ;;  %3474 = vmatmul.msk.f32.gmra.mxu0 %vm432_vm0, %v4430_v17 }
 0x13e   : > { %v4438_v48 = vadd.f32 %v1789_v5, %v1598_v31  ;;  %3408 = vmatmul.msk.f32.gmra.mxu2 %vm432_vm0, %v4432_v29 }
 0x13f   : > { %3441 = vmatmul.msk.f32.gmra.mxu3 %vm432_vm0, %v3936_v41  ;;  %v775_v41 = vadd.f32 %v4320_v1, %v4141_v0  ;;  %v3634_v0 = vld [vmem:[%s4972_s1] ss:$0 sm:$0xff] }
 0x140   : > { %5043 = vst [vmem:[#allocation39_spill] sm:$0xff] %v4438_v48  ;;  %3376 = vmatmul.msk.f32.gmra.mxu1 %vm432_vm0, %v4412_v20  ;;  %v1649_v20 = vld [vmem:[#allocation2 + $0x141] sm:$0xff] }
 0x141   : > { %v1242_v39 = vpop.f32.mrf.mxu2  ;;  %v1050_v49 = vadd.f32 %v970_v50, %v775_v41 }
 0x142   : > { %v1324_v3 = vadd.f32 %v1242_v39, %v1049_v44  ;;  %v1517_v32 = vpop.f32.mrf.mxu3  ;;  %v1795_v11 = vpop.f32.mrf.mxu0  ;;  %v326_v39 = vld [vmem:[%s3715_s10 + $0xf0] sm:$0xff] }
 0x144   : > { %v1599_v5 = vadd.f32 %v1517_v32, %v1324_v3 }
 0x145   : > { %v973_v31 = vpop.f32.mrf.mxu1  ;;  %3475 = vmatmul.msk.f32.gmra.mxu0 %vm432_vm0, %v4446_v37 }
 0x146   : > { %v4454_v36 = vadd.f32 %v1792_v24, %v1599_v5  ;;  %3409 = vmatmul.msk.f32.gmra.mxu2 %vm432_vm0, %v4448_v38  ;;  %v362_v24 = vmul.f32 %v3634_v0, %v326_v39  ;;  %v1099_v5 = vld [vmem:[#allocation2 + $0x12a] sm:$0xff] }
 0x147   : > { %3442 = vmatmul.msk.f32.gmra.mxu3 %vm432_vm0, %v3967_v4  ;;  %v3635_v4 = vld [vmem:[%s4973_s2] ss:$0 sm:$0xff] }
 0x148   : > { %5045 = vst [vmem:[#allocation41_spill] sm:$0xff] %v4454_v36  ;;  %3377 = vmatmul.msk.f32.gmra.mxu1 %vm432_vm0, %v4430_v17  ;;  %v398_v50 = vadd.f32 %v3635_v4, %v362_v24 }
 0x149   : > { %v1245_v44 = vpop.f32.mrf.mxu2 }
 0x14a   : > { %v1325_v3 = vadd.f32 %v1245_v44, %v1050_v49  ;;  %v1520_v32 = vpop.f32.mrf.mxu3  ;;  %v1798_v48 = vpop.f32.mrf.mxu0  ;;  %v776_v49 = vadd.f32 %v4320_v1, %v4161_v10  ;;  %v430_v17 = vmax.f32 %v398_v50, 0.0  ;;  %v1650_v10 = vld [vmem:[#allocation2 + $0x151] sm:$0xff] }
 0x14c   : > { %v1600_v36 = vadd.f32 %v1520_v32, %v1325_v3  ;;  %v1051_v39 = vadd.f32 %v973_v31, %v776_v49  ;;  %519 = vst.msk [vmem:[#allocation2 + $0x181] sm:$0xff] %vm432_vm0, %v430_v17  ;;  %v327_v32 = vld [vmem:[%s3715_s10 + $0xf8] sm:$0xff] }
 0x14d   : > { %v976_v41 = vpop.f32.mrf.mxu1  ;;  %3476 = vmatmul.msk.f32.gmra.mxu0 %vm432_vm0, %v1649_v20 }
 0x14e   : > { %v4472_v44 = vadd.f32 %v1795_v11, %v1600_v36  ;;  %3410 = vmatmul.msk.f32.gmra.mxu2 %vm432_vm0, %v1099_v5  ;;  %v363_v11 = vmul.f32 %v3634_v0, %v327_v32  ;;  %v1100_v36 = vld [vmem:[#allocation2 + $0x13a] sm:$0xff]  ;;  %v1101_v32 = vld [vmem:[#allocation2 + $0x142] sm:$0xff] }
 0x14f   : > { %3443 = vmatmul.msk.f32.gmra.mxu3 %vm432_vm0, %v3998_v21  ;;  %v777_v21 = vadd.f32 %v4320_v1, %v4181_v15 }
 0x150   : > { %5046 = vst [vmem:[#allocation42_spill] sm:$0xff] %v4472_v44  ;;  %3378 = vmatmul.msk.f32.gmra.mxu1 %vm432_vm0, %v4446_v37  ;;  %v399_v5 = vadd.f32 %v3635_v4, %v363_v11 }
 0x151   : > { %v1248_v3 = vpop.f32.mrf.mxu2  ;;  %v1052_v49 = vadd.f32 %v976_v41, %v777_v21  ;;  %v1102_v21 = vld [vmem:[#allocation2 + $0x152] sm:$0xff] }
 0x152   : > { %v1326_v24 = vadd.f32 %v1248_v3, %v1051_v39  ;;  %v1523_v2 = vpop.f32.mrf.mxu3  ;;  %v1801_v38 = vpop.f32.mrf.mxu0  ;;  %v431_v17 = vmax.f32 %v399_v5, 0.0  ;;  %v1651_v3 = vld [vmem:[#allocation2 + $0x159] sm:$0xff]  ;;  %v1652_v5 = vld [vmem:[#allocation2 + $0x169] sm:$0xff] }
 0x154   : > { %v1601_v44 = vadd.f32 %v1523_v2, %v1326_v24  ;;  %520 = vst.msk [vmem:[#allocation2 + $0x189] sm:$0xff] %vm432_vm0, %v431_v17 }
 0x155   : > { %v979_v50 = vpop.f32.mrf.mxu1  ;;  %3477 = vmatmul.msk.f32.gmra.mxu0 %vm432_vm0, %v1650_v10 }
 0x156   : > { %v4484_v31 = vadd.f32 %v1798_v48, %v1601_v44  ;;  %3411 = vmatmul.msk.f32.gmra.mxu2 %vm432_vm0, %v1100_v36  ;;  %v778_v44 = vadd.f32 %v4320_v1, %v4201_v22  ;;  %v779_v22 = vadd.f32 %v4320_v1, %v4221_v30  ;;  %v780_v30 = vadd.f32 %v4320_v1, %v4241_v47 }
 0x157   : > { %3444 = vmatmul.msk.f32.gmra.mxu3 %vm432_vm0, %v4017_v25  ;;  %v781_v47 = vadd.f32 %v4320_v1, %v4261_v52  ;;  %v782_v52 = vadd.f32 %v4320_v1, %v4281_v16  ;;  %v783_v16 = vadd.f32 %v4320_v1, %v4169_v12  ;;  %v784_v12 = vadd.f32 %v4320_v1, %v4191_v45 }
 0x158   : > { %3379 = vmatmul.msk.f32.gmra.mxu1 %vm432_vm0, %v1649_v20  ;;  %v1053_v25 = vadd.f32 %v979_v50, %v778_v44  ;;  %v785_v45 = vadd.f32 %v4320_v1, %v4211_v8  ;;  %v786_v8 = vadd.f32 %v4320_v1, %v4231_v23  ;;  %v787_v23 = vadd.f32 %v4320_v1, %v4251_v26 }
 0x159   : > { %v1251_v2 = vpop.f32.mrf.mxu2  ;;  %v788_v26 = vadd.f32 %v4320_v1, %v4271_v35  ;;  %v5049_v35 = vld [vmem:[#allocation22_spill] sm:$0xff] }
 0x15a   : > { %v1327_v0 = vadd.f32 %v1251_v2, %v1052_v49  ;;  %v1526_v4 = vpop.f32.mrf.mxu3  ;;  %v1804_v39 = vpop.f32.mrf.mxu0 }
 0x15c   : > { %v1602_v15 = vadd.f32 %v1526_v4, %v1327_v0  ;;  %v1653_v4 = vld [vmem:[#allocation2 + $0x171] sm:$0xff] }
 0x15d   : > { %v982_v48 = vpop.f32.mrf.mxu1  ;;  %3478 = vmatmul.msk.f32.gmra.mxu0 %vm432_vm0, %v1651_v3 }
 0x15e   : > { %v4494_v24 = vadd.f32 %v1801_v38, %v1602_v15  ;;  %3412 = vmatmul.msk.f32.gmra.mxu2 %vm432_vm0, %v1101_v32  ;;  %v1103_v32 = vld [vmem:[#allocation2 + $0x15a] sm:$0xff] }
 0x15f   : > { %3445 = vmatmul.msk.f32.gmra.mxu3 %vm432_vm0, %v4039_v33  ;;  %v1054_v33 = vadd.f32 %v982_v48, %v779_v22 }
 0x160   : > { %3380 = vmatmul.msk.f32.gmra.mxu1 %vm432_vm0, %v1650_v10 }
 0x161   : > { %v1254_v20 = vpop.f32.mrf.mxu2 }
 0x162   : > { %v1328_v41 = vadd.f32 %v1254_v20, %v1053_v25  ;;  %v1529_v11 = vpop.f32.mrf.mxu3  ;;  %v1807_v36 = vpop.f32.mrf.mxu0 }
 0x164   : > { %v1603_v17 = vadd.f32 %v1529_v11, %v1328_v41  ;;  %v1654_v41 = vld [vmem:[#allocation2 + $0x181] sm:$0xff]  ;;  %v1104_v11 = vld [vmem:[#allocation2 + $0x16a] sm:$0xff] }
 0x165   : > { %v985_v49 = vpop.f32.mrf.mxu1  ;;  %3479 = vmatmul.msk.f32.gmra.mxu0 %vm432_vm0, %v1652_v5 }
 0x166   : > { %v4503_v38 = vadd.f32 %v1804_v39, %v1603_v17  ;;  %3413 = vmatmul.msk.f32.gmra.mxu2 %vm432_vm0, %v1102_v21  ;;  %v1379_v17 = vld [vmem:[#allocation2 + $0x180] sm:$0xff] }
 0x167   : > { %3446 = vmatmul.msk.f32.gmra.mxu3 %vm432_vm0, %v4055_v40  ;;  %v1055_v40 = vadd.f32 %v985_v49, %v780_v30 }
 0x168   : > { %3381 = vmatmul.msk.f32.gmra.mxu1 %vm432_vm0, %v1651_v3 }
 0x169   : > { %v1257_v10 = vpop.f32.mrf.mxu2 }
 0x16a   : > { %v1329_v50 = vadd.f32 %v1257_v10, %v1054_v33  ;;  %v1532_v2 = vpop.f32.mrf.mxu3  ;;  %v1810_v0 = vpop.f32.mrf.mxu0 }
 0x16c   : > { %v1604_v15 = vadd.f32 %v1532_v2, %v1329_v50  ;;  %v1655_v50 = vld [vmem:[#allocation2 + $0x189] sm:$0xff]  ;;  %v1105_v2 = vld [vmem:[#allocation2 + $0x172] sm:$0xff] }
 0x16d   : > { %v988_v44 = vpop.f32.mrf.mxu1  ;;  %3480 = vmatmul.msk.f32.gmra.mxu0 %vm432_vm0, %v1653_v4 }
 0x16e   : > { %v4512_v39 = vadd.f32 %v1807_v36, %v1604_v15  ;;  %3414 = vmatmul.msk.f32.gmra.mxu2 %vm432_vm0, %v1103_v32  ;;  %v1380_v15 = vld [vmem:[#allocation2 + $0x188] sm:$0xff] }
 0x16f   : > { %3447 = vmatmul.msk.f32.gmra.mxu3 %vm432_vm0, %v4068_v46  ;;  %v1056_v46 = vadd.f32 %v988_v44, %v781_v47 }
 0x170   : > { %3382 = vmatmul.msk.f32.gmra.mxu1 %vm432_vm0, %v1652_v5 }
 0x171   : > { %v1260_v3 = vpop.f32.mrf.mxu2 }
 0x172   : > { %v1330_v48 = vadd.f32 %v1260_v3, %v1055_v40  ;;  %v1535_v25 = vpop.f32.mrf.mxu3  ;;  %v1813_v20 = vpop.f32.mrf.mxu0 }
 0x174   : > { %v1605_v21 = vadd.f32 %v1535_v25, %v1330_v48  ;;  %v2175_v25 = vld [vmem:[#allocation2 + $0x30] sm:$0xff] }
 0x175   : > { %v991_v22 = vpop.f32.mrf.mxu1  ;;  %3481 = vmatmul.msk.f32.gmra.mxu0 %vm432_vm0, %v1654_v41 }
 0x176   : > { %v4521_v36 = vadd.f32 %v1810_v0, %v1605_v21  ;;  %3415 = vmatmul.msk.f32.gmra.mxu2 %vm432_vm0, %v1104_v11 }
 0x177   : > { %3448 = vmatmul.msk.f32.gmra.mxu3 %vm432_vm0, %v1379_v17 }
 0x178   : > { %3383 = vmatmul.msk.f32.gmra.mxu1 %vm432_vm0, %v1653_v4  ;;  %v1057_v4 = vadd.f32 %v991_v22, %v782_v52 }
 0x179   : > { %v1263_v5 = vpop.f32.mrf.mxu2 }
 0x17a   : > { %v1331_v49 = vadd.f32 %v1263_v5, %v1056_v46  ;;  %v1538_v33 = vpop.f32.mrf.mxu3  ;;  %v1816_v10 = vpop.f32.mrf.mxu0  ;;  %v2176_v46 = vld [vmem:[#allocation2 + $0x38] sm:$0xff] }
 0x17c   : > { %v1606_v32 = vadd.f32 %v1538_v33, %v1331_v49 }
 0x17d   : > { %v994_v30 = vpop.f32.mrf.mxu1  ;;  %3482 = vmatmul.msk.f32.gmra.mxu0 %vm432_vm0, %v1655_v50 }
 0x17e   : > { %v4529_v0 = vadd.f32 %v1813_v20, %v1606_v32  ;;  %3416 = vmatmul.msk.f32.gmra.mxu2 %vm432_vm0, %v1105_v2  ;;  %v2177_v32 = vld [vmem:[#allocation2 + $0x48] sm:$0xff] }
 0x17f   : > { %3449 = vmatmul.msk.f32.gmra.mxu3 %vm432_vm0, %v1380_v15 }
 0x180   : > { %3484 = vmatmul.msk.f32.vlgmr.msra.gmra.mxu1 %vm432_vm0, %v4088_v54  ;;  %v1058_v54 = vadd.f32 %v994_v30, %v783_v16 }
 0x181   : > { %v1266_v44 = vpop.f32.mrf.mxu2 }
 0x182   : > { %v1332_v40 = vadd.f32 %v1266_v44, %v1057_v4  ;;  %v1541_v3 = vpop.f32.mrf.mxu3  ;;  %v1819_v48 = vpop.f32.mrf.mxu0 }
 0x184   : > { %v1607_v41 = vadd.f32 %v1541_v3, %v1332_v40  ;;  %v2178_v3 = vld [vmem:[#allocation2 + $0x50] sm:$0xff] }
 0x185   : > { %v997_v11 = vpop.f32.mrf.mxu1  ;;  %3583 = vmatmul.msk.f32.vlgmr.msra.gmra.mxu0 %vm432_vm0, %v4109_v58 }
 0x186   : > { %v4539_v20 = vadd.f32 %v1816_v10, %v1607_v41  ;;  %3517 = vmatmul.msk.f32.vlgmr.msra.gmra.mxu2 %vm432_vm0, %v2175_v25 }
 0x187   : > { %3550 = vmatmul.msk.f32.vlgmr.msra.gmra.mxu3 %vm432_vm0, %v4086_v53  ;;  %v1059_v53 = vadd.f32 %v997_v11, %v784_v12  ;;  %v2180_v12 = vld [vmem:[#allocation2 + $0x68] sm:$0xff] }
 0x188   : > { %3485 = vmatmul.msk.f32.gmra.mxu1 %vm432_vm0, %v4098_v56 }
 0x189   : > { %v1269_v21 = vpop.f32.mrf.mxu2 }
 0x18a   : > { %v1333_v17 = vadd.f32 %v1269_v21, %v1058_v54  ;;  %v1544_v22 = vpop.f32.mrf.mxu3  ;;  %v1822_v47 = vpop.f32.mrf.mxu0  ;;  %v2179_v21 = vld [vmem:[#allocation2 + $0x60] sm:$0xff] }
 0x18c   : > { %v1608_v5 = vadd.f32 %v1544_v22, %v1333_v17 }
 0x18d   : > { %v1000_v49 = vpop.f32.mrf.mxu1  ;;  %3584 = vmatmul.msk.f32.gmra.mxu0 %vm432_vm0, %v4120_v60 }
 0x18e   : > { %v4550_v33 = vadd.f32 %v1819_v48, %v1608_v5  ;;  %3518 = vmatmul.msk.f32.gmra.mxu2 %vm432_vm0, %v2176_v46 }
 0x18f   : > { %3551 = vmatmul.msk.f32.gmra.mxu3 %vm432_vm0, %v4096_v55  ;;  %v1060_v55 = vadd.f32 %v1000_v49, %v785_v45 }
 0x190   : > { %3486 = vmatmul.msk.f32.gmra.mxu1 %vm432_vm0, %v4109_v58 }
 0x191   : > { %v1272_v56 = vpop.f32.mrf.mxu2 }
 0x192   : > { %v1334_v10 = vadd.f32 %v1272_v56, %v1059_v53  ;;  %v1547_v50 = vpop.f32.mrf.mxu3  ;;  %v1825_v2 = vpop.f32.mrf.mxu0 }
 0x194   : > { %v1609_v15 = vadd.f32 %v1547_v50, %v1334_v10 }
 0x195   : > { %v1003_v30 = vpop.f32.mrf.mxu1  ;;  %3585 = vmatmul.msk.f32.gmra.mxu0 %vm432_vm0, %v4131_v63 }
 0x196   : > { %v4561_v52 = vadd.f32 %v1822_v47, %v1609_v15  ;;  %3519 = vmatmul.msk.f32.gmra.mxu2 %vm432_vm0, %v2177_v32 }
 0x197   : > { %3552 = vmatmul.msk.f32.gmra.mxu3 %vm432_vm0, %v4107_v57  ;;  %v1061_v57 = vadd.f32 %v1003_v30, %v786_v8  ;;  %v2181_v30 = vld [vmem:[#allocation2 + $0x78] sm:$0xff] }
 0x198   : > { %3487 = vmatmul.msk.f32.gmra.mxu1 %vm432_vm0, %v4120_v60 }
 0x199   : > { %v1275_v58 = vpop.f32.mrf.mxu2 }
 0x19a   : > { %v1335_v4 = vadd.f32 %v1275_v58, %v1060_v55  ;;  %v1550_v44 = vpop.f32.mrf.mxu3  ;;  %v1828_v40 = vpop.f32.mrf.mxu0  ;;  %v5048_v58 = vld [vmem:[#allocation9_spill] sm:$0xff] }
 0x19c   : > { %v1610_v48 = vadd.f32 %v1550_v44, %v1335_v4  ;;  %v789_v4 = vadd.f32 %v4320_v1, %v5049_v35  ;;  %v5057_v35 = vld [vmem:[#allocation18_spill] sm:$0xff] }
 0x19d   : > { %v1006_v25 = vpop.f32.mrf.mxu1  ;;  %3586 = vmatmul.msk.f32.gmra.mxu0 %vm432_vm0, %v4145_v6 }
 0x19e   : > { %v4572_v41 = vadd.f32 %v1825_v2, %v1610_v48  ;;  %3520 = vmatmul.msk.f32.gmra.mxu2 %vm432_vm0, %v2178_v3 }
 0x19f   : > { %3553 = vmatmul.msk.f32.gmra.mxu3 %vm432_vm0, %v4118_v59  ;;  %v1062_v59 = vadd.f32 %v1006_v25, %v787_v23 }
 0x1a0   : > { %3488 = vmatmul.msk.f32.gmra.mxu1 %vm432_vm0, %v4131_v63 }
 0x1a1   : > { %v1278_v60 = vpop.f32.mrf.mxu2 }
 0x1a2   : > { %v1336_v11 = vadd.f32 %v1278_v60, %v1061_v57  ;;  %v1553_v16 = vpop.f32.mrf.mxu3  ;;  %v1831_v54 = vpop.f32.mrf.mxu0  ;;  %v2182_v57 = vld [vmem:[#allocation2 + $0x80] sm:$0xff] }
 0x1a4   : > { %v1611_v17 = vadd.f32 %v1553_v16, %v1336_v11  ;;  %v5051_v16 = vld [vmem:[#allocation12_spill] sm:$0xff] }
 0x1a5   : > { %v1009_v22 = vpop.f32.mrf.mxu1  ;;  %3587 = vmatmul.msk.f32.gmra.mxu0 %vm432_vm0, %v4159_v9 }
 0x1a6   : > { %v4583_v47 = vadd.f32 %v1828_v40, %v1611_v17  ;;  %3521 = vmatmul.msk.f32.gmra.mxu2 %vm432_vm0, %v2179_v21  ;;  %v5050_v40 = vld [vmem:[#allocation4_spill] sm:$0xff] }
 0x1a7   : > { %3554 = vmatmul.msk.f32.gmra.mxu3 %vm432_vm0, %v4129_v61  ;;  %v5047_v61 = vld [vmem:[#allocation3_spill] sm:$0xff] }
 0x1a8   : > { %3489 = vmatmul.msk.f32.gmra.mxu1 %vm432_vm0, %v4145_v6  ;;  %v1063_v6 = vadd.f32 %v1009_v22, %v788_v26  ;;  %v5053_v22 = vld [vmem:[#allocation6_spill] sm:$0xff] }
 0x1a9   : > { %v1281_v63 = vpop.f32.mrf.mxu2 }
 0x1aa   : > { %v1337_v46 = vadd.f32 %v1281_v63, %v1062_v59  ;;  %v1556_v5 = vpop.f32.mrf.mxu3  ;;  %v1834_v49 = vpop.f32.mrf.mxu0 }
 0x1ac   : > { %v1612_v53 = vadd.f32 %v1556_v5, %v1337_v46  ;;  %v2183_v5 = vld [vmem:[#allocation2 + $0x90] sm:$0xff] }
 0x1ad   : > { %v1012_v56 = vpop.f32.mrf.mxu1  ;;  %3588 = vmatmul.msk.f32.gmra.mxu0 %vm432_vm0, %v4179_v14 }
 0x1ae   : > { %v4594_v10 = vadd.f32 %v1831_v54, %v1612_v53  ;;  %3522 = vmatmul.msk.f32.gmra.mxu2 %vm432_vm0, %v2180_v12  ;;  %v5052_v54 = vld [vmem:[#allocation26_spill] sm:$0xff]  ;;  %v5054_v53 = vld [vmem:[#allocation15_spill] sm:$0xff] }
 0x1af   : > { %3555 = vmatmul.msk.f32.gmra.mxu3 %vm432_vm0, %v5047_v61  ;;  %v790_v21 = vadd.f32 %v4320_v1, %v5052_v54 }
 0x1b0   : > { %3490 = vmatmul.msk.f32.gmra.mxu1 %vm432_vm0, %v4159_v9  ;;  %v1064_v9 = vadd.f32 %v1012_v56, %v789_v4  ;;  %v5055_v56 = vld [vmem:[#allocation5_spill] sm:$0xff]  ;;  %v5058_v4 = vld [vmem:[#allocation7_spill] sm:$0xff] }
 0x1b1   : > { %v1284_v50 = vpop.f32.mrf.mxu2  ;;  %v791_v26 = vadd.f32 %v4320_v1, %v5055_v56 }
 0x1b2   : > { %v1338_v2 = vadd.f32 %v1284_v50, %v1063_v6  ;;  %v1559_v32 = vpop.f32.mrf.mxu3  ;;  %v1837_v15 = vpop.f32.mrf.mxu0  ;;  %v5056_v6 = vld [vmem:[#allocation8_spill] sm:$0xff] }
 0x1b4   : > { %v1613_v45 = vadd.f32 %v1559_v32, %v1338_v2 }
 0x1b5   : > { %v1015_v55 = vpop.f32.mrf.mxu1  ;;  %3589 = vmatmul.msk.f32.gmra.mxu0 %vm432_vm0, %v5048_v58 }
 0x1b6   : > { %v4605_v44 = vadd.f32 %v1834_v49, %v1613_v45  ;;  %3523 = vmatmul.msk.f32.gmra.mxu2 %vm432_vm0, %v2181_v30  ;;  %v2184_v45 = vld [vmem:[#allocation2 + $0x98] sm:$0xff] }
 0x1b7   : > { %3556 = vmatmul.msk.f32.gmra.mxu3 %vm432_vm0, %v5050_v40  ;;  %v792_v40 = vadd.f32 %v4320_v1, %v5058_v4  ;;  %v2187_v4 = vld [vmem:[#allocation2 + $0xc0] sm:$0xff] }
 0x1b8   : > { %3491 = vmatmul.msk.f32.gmra.mxu1 %vm432_vm0, %v4179_v14  ;;  %v1065_v14 = vadd.f32 %v1015_v55, %v790_v21  ;;  %v5060_v21 = vld [vmem:[#allocation21_spill] sm:$0xff] }
 0x1b9   : > { %v1287_v3 = vpop.f32.mrf.mxu2 }
 0x1ba   : > { %v1339_v48 = vadd.f32 %v1287_v3, %v1064_v9  ;;  %v1562_v25 = vpop.f32.mrf.mxu3  ;;  %v1840_v8 = vpop.f32.mrf.mxu0  ;;  %v5059_v3 = vld [vmem:[#allocation11_spill] sm:$0xff] }
 0x1bc   : > { %v1614_v60 = vadd.f32 %v1562_v25, %v1339_v48 }
 0x1bd   : > { %v1018_v11 = vpop.f32.mrf.mxu1  ;;  %3590 = vmatmul.msk.f32.gmra.mxu0 %vm432_vm0, %v5051_v16 }
 0x1be   : > { %v4616_v17 = vadd.f32 %v1837_v15, %v1614_v60  ;;  %3524 = vmatmul.msk.f32.gmra.mxu2 %vm432_vm0, %v2182_v57  ;;  %v1066_v50 = vadd.f32 %v1018_v11, %v791_v26  ;;  %v2185_v11 = vld [vmem:[#allocation2 + $0xa8] sm:$0xff] }
 0x1bf   : > { %3557 = vmatmul.msk.f32.gmra.mxu3 %vm432_vm0, %v5053_v22  ;;  %v5061_v22 = vld [vmem:[#allocation10_spill] sm:$0xff] }
 0x1c0   : > { %3492 = vmatmul.msk.f32.gmra.mxu1 %vm432_vm0, %v5048_v58 }
 0x1c1   : > { %v1290_v23 = vpop.f32.mrf.mxu2 }
 0x1c2   : > { %v1340_v59 = vadd.f32 %v1290_v23, %v1065_v14  ;;  %v1565_v63 = vpop.f32.mrf.mxu3  ;;  %v1843_v46 = vpop.f32.mrf.mxu0  ;;  %v793_v14 = vadd.f32 %v4320_v1, %v5061_v22 }
 0x1c4   : > { %v1615_v49 = vadd.f32 %v1565_v63, %v1340_v59  ;;  %v5062_v59 = vld [vmem:[#allocation14_spill] sm:$0xff] }
 0x1c5   : > { %v1021_v12 = vpop.f32.mrf.mxu1  ;;  %3591 = vmatmul.msk.f32.gmra.mxu0 %vm432_vm0, %v5054_v53 }
 0x1c6   : > { %v4627_v61 = vadd.f32 %v1840_v8, %v1615_v49  ;;  %3525 = vmatmul.msk.f32.gmra.mxu2 %vm432_vm0, %v2183_v5  ;;  %v1067_v48 = vadd.f32 %v1021_v12, %v792_v40 }
 0x1c7   : > { %3558 = vmatmul.msk.f32.gmra.mxu3 %vm432_vm0, %v5056_v6  ;;  %v5063_v6 = vld [vmem:[#allocation25_spill] sm:$0xff] }
 0x1c8   : > { %3493 = vmatmul.msk.f32.gmra.mxu1 %vm432_vm0, %v5051_v16 }
 0x1c9   : > { %v1293_v2 = vpop.f32.mrf.mxu2 }
 0x1ca   : > { %v1341_v32 = vadd.f32 %v1293_v2, %v1066_v50  ;;  %v1568_v15 = vpop.f32.mrf.mxu3  ;;  %v1846_v30 = vpop.f32.mrf.mxu0  ;;  %v5064_v50 = vld [vmem:[#allocation13_spill] sm:$0xff] }
 0x1cb   : > { %v794_v2 = vadd.f32 %v4320_v1, %v5064_v50 }
 0x1cc   : > { %v1616_v55 = vadd.f32 %v1568_v15, %v1341_v32  ;;  %v5065_v15 = vld [vmem:[#allocation17_spill] sm:$0xff] }
 0x1cd   : > { %v1024_v58 = vpop.f32.mrf.mxu1  ;;  %3592 = vmatmul.msk.f32.gmra.mxu0 %vm432_vm0, %v5057_v35 }
 0x1ce   : > { %v4638_v9 = vadd.f32 %v1843_v46, %v1616_v55  ;;  %3526 = vmatmul.msk.f32.gmra.mxu2 %vm432_vm0, %v2184_v45  ;;  %v1068_v63 = vadd.f32 %v1024_v58, %v793_v14  ;;  %v2188_v14 = vld [vmem:[#allocation2 + $0xc8] sm:$0xff] }
 0x1cf   : > { %3559 = vmatmul.msk.f32.gmra.mxu3 %vm432_vm0, %v5059_v3 }
 0x1d0   : > { %3494 = vmatmul.msk.f32.gmra.mxu1 %vm432_vm0, %v5054_v53  ;;  %v2186_v53 = vld [vmem:[#allocation2 + $0xb0] sm:$0xff] }
 0x1d1   : > { %v1296_v25 = vpop.f32.mrf.mxu2 }
 0x1d2   : > { %v1342_v8 = vadd.f32 %v1296_v25, %v1067_v48  ;;  %v1571_v57 = vpop.f32.mrf.mxu3  ;;  %v1849_v60 = vpop.f32.mrf.mxu0  ;;  %v5066_v48 = vld [vmem:[#allocation28_spill] sm:$0xff] }
 0x1d3   : > { %v5067_v25 = vld [vmem:[#allocation16_spill] sm:$0xff] }
 0x1d4   : > { %v1617_v16 = vadd.f32 %v1571_v57, %v1342_v8  ;;  %v795_v8 = vadd.f32 %v4320_v1, %v5067_v25  ;;  %v2190_v25 = vld [vmem:[#allocation2 + $0xe0] sm:$0xff] }
 0x1d5   : > { %v1027_v54 = vpop.f32.mrf.mxu1  ;;  %3593 = vmatmul.msk.f32.gmra.mxu0 %vm432_vm0, %v5060_v21 }
 0x1d6   : > { %v4649_v23 = vadd.f32 %v1846_v30, %v1617_v16  ;;  %3527 = vmatmul.msk.f32.gmra.mxu2 %vm432_vm0, %v2185_v11  ;;  %v1069_v30 = vadd.f32 %v1027_v54, %v794_v2  ;;  %v2189_v2 = vld [vmem:[#allocation2 + $0xd8] sm:$0xff] }
 0x1d7   : > { %3560 = vmatmul.msk.f32.gmra.mxu3 %vm432_vm0, %v5062_v59 }
 0x1d8   : > { %3495 = vmatmul.msk.f32.gmra.mxu1 %vm432_vm0, %v5057_v35 }
 0x1d9   : > { %v1299_v46 = vpop.f32.mrf.mxu2 }
 0x1da   : > { %v1343_v5 = vadd.f32 %v1299_v46, %v1068_v63  ;;  %v1574_v49 = vpop.f32.mrf.mxu3  ;;  %v1852_v12 = vpop.f32.mrf.mxu0  ;;  %v5069_v46 = vld [vmem:[#allocation19_spill] sm:$0xff] }
 0x1dc   : > { %v1618_v56 = vadd.f32 %v1574_v49, %v1343_v5  ;;  %v796_v5 = vadd.f32 %v4320_v1, %v5069_v46 }
 0x1dd   : > { %v1030_v26 = vpop.f32.mrf.mxu1  ;;  %3594 = vmatmul.msk.f32.gmra.mxu0 %vm432_vm0, %v5063_v6 }
 0x1de   : > { %v4660_v32 = vadd.f32 %v1849_v60, %v1618_v56  ;;  %3528 = vmatmul.msk.f32.gmra.mxu2 %vm432_vm0, %v2186_v53  ;;  %v5068_v60 = vld [vmem:[#allocation20_spill] sm:$0xff]  ;;  %v1070_v11 = vadd.f32 %v1030_v26, %v795_v8 }
 0x1df   : > { %3561 = vmatmul.msk.f32.gmra.mxu3 %vm432_vm0, %v5065_v15 }
 0x1e0   : > { %3496 = vmatmul.msk.f32.gmra.mxu1 %vm432_vm0, %v5060_v21 }
 0x1e1   : > { %v1302_v45 = vpop.f32.mrf.mxu2 }
 0x1e2   : > { %v1344_v55 = vadd.f32 %v1302_v45, %v1069_v30  ;;  %v1577_v58 = vpop.f32.mrf.mxu3  ;;  %v1855_v35 = vpop.f32.mrf.mxu0  ;;  %v5071_v45 = vld [vmem:[#allocation23_spill] sm:$0xff] }
 0x1e4   : > { %v1619_v40 = vadd.f32 %v1577_v58, %v1344_v55  ;;  %v797_v55 = vadd.f32 %v4320_v1, %v5071_v45 }
 0x1e5   : > { %v1033_v3 = vpop.f32.mrf.mxu1  ;;  %3595 = vmatmul.msk.f32.gmra.mxu0 %vm432_vm0, %v5066_v48 }
 0x1e6   : > { %v4671_v57 = vadd.f32 %v1852_v12, %v1619_v40  ;;  %3529 = vmatmul.msk.f32.gmra.mxu2 %vm432_vm0, %v2187_v4  ;;  %v5070_v12 = vld [vmem:[#allocation24_spill] sm:$0xff]  ;;  %v1071_v53 = vadd.f32 %v1033_v3, %v796_v5 }
 0x1e7   : > { %3562 = vmatmul.msk.f32.gmra.mxu3 %vm432_vm0, %v5068_v60 }
 0x1e8   : > { %3497 = vmatmul.msk.f32.gmra.mxu1 %vm432_vm0, %v5063_v6 }
 0x1e9   : > { %v1305_v16 = vpop.f32.mrf.mxu2 }
 0x1ea   : > { %v1345_v54 = vadd.f32 %v1305_v16, %v1070_v11  ;;  %v1580_v21 = vpop.f32.mrf.mxu3  ;;  %v1858_v22 = vpop.f32.mrf.mxu0  ;;  %v5072_v11 = vld [vmem:[#allocation27_spill] sm:$0xff] }
 0x1eb   : > { %v798_v16 = vadd.f32 %v4320_v1, %v5072_v11 }
 0x1ec   : > { %v1620_v59 = vadd.f32 %v1580_v21, %v1345_v54 }
 0x1ed   : > { %v1036_v63 = vpop.f32.mrf.mxu1  ;;  %3596 = vmatmul.msk.f32.gmra.mxu0 %vm432_vm0, %v4334_v19 }
 0x1ee   : > { %v4682_v49 = vadd.f32 %v1855_v35, %v1620_v59  ;;  %3530 = vmatmul.msk.f32.gmra.mxu2 %vm432_vm0, %v2188_v14  ;;  %v1072_v35 = vadd.f32 %v1036_v63, %v797_v55  ;;  %v2191_v59 = vld [vmem:[#allocation2 + $0xf0] sm:$0xff] }
 0x1ef   : > { %3563 = vmatmul.msk.f32.gmra.mxu3 %vm432_vm0, %v5070_v12 }
 0x1f0   : > { %3498 = vmatmul.msk.f32.gmra.mxu1 %vm432_vm0, %v5066_v48 }
 0x1f1   : > { %v1308_v56 = vpop.f32.mrf.mxu2 }
 0x1f2   : > { %v1346_v26 = vadd.f32 %v1308_v56, %v1071_v53  ;;  %v1583_v6 = vpop.f32.mrf.mxu3  ;;  %v1861_v50 = vpop.f32.mrf.mxu0 }
 0x1f4   : > { %v1621_v15 = vadd.f32 %v1583_v6, %v1346_v26  ;;  %v2192_v26 = vld [vmem:[#allocation2 + $0xf8] sm:$0xff] }
 0x1f5   : > { %v1039_v30 = vpop.f32.mrf.mxu1  ;;  %3597 = vmatmul.msk.f32.gmra.mxu0 %vm432_vm0, %v4350_v43 }
 0x1f6   : > { %v4693_v58 = vadd.f32 %v1858_v22, %v1621_v15  ;;  %3531 = vmatmul.msk.f32.gmra.mxu2 %vm432_vm0, %v2189_v2 }
 0x1f7   : > { %3564 = vmatmul.msk.f32.gmra.mxu3 %vm432_vm0, %v4313_v27 }
 0x1f8   : > { %3499 = vmatmul.msk.f32.gmra.mxu1 %vm432_vm0, %v4334_v19  ;;  %v1073_v19 = vadd.f32 %v1039_v30, %v798_v16 }
 0x1f9   : > { %v1311_v4 = vpop.f32.mrf.mxu2 }
 0x1fa   : > { %v1347_v40 = vadd.f32 %v1311_v4, %v1072_v35  ;;  %v1586_v3 = vpop.f32.mrf.mxu3  ;;  %v1864_v48 = vpop.f32.mrf.mxu0  ;;  %v2193_v35 = vld [vmem:[#allocation2 + $0x108] sm:$0xff] }
 0x1fc   : > { %v1622_v8 = vadd.f32 %v1586_v3, %v1347_v40 }
 0x1fd   : > { %v2046_v60 = vpop.f32.mrf.mxu1  ;;  %3598 = vmatmul.msk.f32.gmra.mxu0 %vm432_vm0, %v4366_v34 }
 0x1fe   : > { %v4704_v54 = vadd.f32 %v1861_v50, %v1622_v8  ;;  %3532 = vmatmul.msk.f32.gmra.mxu2 %vm432_vm0, %v2190_v25 }
 0x1ff   : > { %3565 = vmatmul.msk.f32.gmra.mxu3 %vm432_vm0, %v4332_v42  ;;  %v5073_v42 = vld [vmem:[#allocation29_spill] sm:$0xff] }
 0x200   : > { %3500 = vmatmul.msk.f32.gmra.mxu1 %vm432_vm0, %v4350_v43  ;;  %v2142_v43 = vadd.f32 %v2046_v60, %v5073_v42 }
 0x201   : > { %v1314_v27 = vpop.f32.mrf.mxu2 }
 0x202   : > { %v1348_v21 = vadd.f32 %v1314_v27, %v1073_v19  ;;  %v1589_v22 = vpop.f32.mrf.mxu3  ;;  %v2872_v14 = vpop.f32.mrf.mxu0 }
 0x204   : > { %v1623_v63 = vadd.f32 %v1589_v22, %v1348_v21 }
 0x205   : > { %v2049_v46 = vpop.f32.mrf.mxu1  ;;  %3599 = vmatmul.msk.f32.gmra.mxu0 %vm432_vm0, %v4382_v18 }
 0x206   : > { %v4713_v1 = vadd.f32 %v1864_v48, %v1623_v63  ;;  %3533 = vmatmul.msk.f32.gmra.mxu2 %vm432_vm0, %v2191_v59  ;;  %v5075_v48 = vld [vmem:[#allocation32_spill] sm:$0xff] }
 0x207   : > { %3566 = vmatmul.msk.f32.gmra.mxu3 %vm432_vm0, %v4348_v51 }
 0x208   : > { %3501 = vmatmul.msk.f32.gmra.mxu1 %vm432_vm0, %v4366_v34  ;;  %v5074_v34 = vld [vmem:[#allocation30_spill] sm:$0xff] }
 0x209   : > { %v2322_v5 = vpop.f32.mrf.mxu2  ;;  %v2143_v2 = vadd.f32 %v2049_v46, %v5074_v34  ;;  %v2194_v46 = vld [vmem:[#allocation2 + $0x110] sm:$0xff] }
 0x20a   : > { %v2418_v12 = vadd.f32 %v2322_v5, %v2142_v43  ;;  %v2597_v53 = vpop.f32.mrf.mxu3  ;;  %v2875_v56 = vpop.f32.mrf.mxu0 }
 0x20c   : > { %v2693_v6 = vadd.f32 %v2597_v53, %v2418_v12 }
 0x20d   : > { %v2052_v50 = vpop.f32.mrf.mxu1  ;;  %3600 = vmatmul.msk.f32.gmra.mxu0 %vm432_vm0, %v4398_v7 }
 0x20e   : > { %v2968_v51 = vadd.f32 %v2872_v14, %v2693_v6  ;;  %3534 = vmatmul.msk.f32.gmra.mxu2 %vm432_vm0, %v2192_v26 }
 0x20f   : > { %3567 = vmatmul.msk.f32.gmra.mxu3 %vm432_vm0, %v4364_v28 }
 0x210   : > { %3000 = vst.msk [vmem:[%s4726_s17] sm:$0xff] %vm432_vm0, %v2968_v51  ;;  %3502 = vmatmul.msk.f32.gmra.mxu1 %vm432_vm0, %v4382_v18  ;;  %v3103_v3 = vmul.f32 %v2968_v51, %v2968_v51  ;;  %v3032_v25 = vsel %vm432_vm0, %v2968_v51, 0.0  ;;  %v5076_v18 = vld [vmem:[#allocation31_spill] sm:$0xff] }
 0x211   : > { %v2325_v15 = vpop.f32.mrf.mxu2  ;;  %v2144_v8 = vadd.f32 %v2052_v50, %v5076_v18 }
 0x212   : > { %v2419_v30 = vadd.f32 %v2325_v15, %v2143_v2  ;;  %v2600_v45 = vpop.f32.mrf.mxu3  ;;  %v2878_v55 = vpop.f32.mrf.mxu0  ;;  %v3135_v27 = vsel %vm432_vm0, %v3103_v3, 0.0 }
 0x214   : > { %v2694_v4 = vadd.f32 %v2600_v45, %v2419_v30  ;;  %v1920_v30 = vld [vmem:[#allocation2 + $0x112] sm:$0xff] }
 0x215   : > { %v2055_v40 = vpop.f32.mrf.mxu1  ;;  %3601 = vmatmul.msk.f32.gmra.mxu0 %vm432_vm0, %v4414_v13  ;;  %v5078_v45 = vld [vmem:[#allocation40_spill] sm:$0xff] }
 0x216   : > { %v2969_v28 = vadd.f32 %v2875_v56, %v2694_v4  ;;  %3535 = vmatmul.msk.f32.gmra.mxu2 %vm432_vm0, %v2193_v35  ;;  %v5079_v35 = vld [vmem:[#allocation36_spill] sm:$0xff]  ;;  %v5081_v4 = vld [vmem:[#allocation34_spill] sm:$0xff] }
 0x217   : > { %3568 = vmatmul.msk.f32.gmra.mxu3 %vm432_vm0, %v5075_v48 }
 0x218   : > { %3001 = vst.msk [vmem:[%s4726_s17 + $0x8] sm:$0xff] %vm432_vm0, %v2969_v28  ;;  %v3033_v60 = vsel %vm432_vm0, %v2969_v28, 0.0  ;;  %v3104_v11 = vmul.f32 %v2969_v28, %v2969_v28  ;;  %3503 = vmatmul.msk.f32.gmra.mxu1 %vm432_vm0, %v4398_v7  ;;  %v5077_v7 = vld [vmem:[#allocation33_spill] sm:$0xff] }
 0x219   : > { %v3034_v16 = vadd.f32 %v3033_v60, %v3032_v25  ;;  %v2328_v19 = vpop.f32.mrf.mxu2  ;;  %v2145_v12 = vadd.f32 %v2055_v40, %v5077_v7 }
 0x21a   : > { %v3136_v21 = vsel %vm432_vm0, %v3104_v11, 0.0  ;;  %v2420_v22 = vadd.f32 %v2328_v19, %v2144_v8  ;;  %v2603_v14 = vpop.f32.mrf.mxu3  ;;  %v2881_v59 = vpop.f32.mrf.mxu0 }
 0x21b   : > { %v3137_v63 = vadd.f32 %v3136_v21, %v3135_v27  ;;  %v2196_v27 = vld [vmem:[#allocation2 + $0x128] sm:$0xff] }
 0x21c   : > { %v2695_v42 = vadd.f32 %v2603_v14, %v2420_v22  ;;  %v1921_v14 = vld [vmem:[#allocation2 + $0x122] sm:$0xff] }
 0x21d   : > { %v2058_v43 = vpop.f32.mrf.mxu1  ;;  %3602 = vmatmul.msk.f32.gmra.mxu0 %vm432_vm0, %v4432_v29 }
 0x21e   : > { %v2970_v5 = vadd.f32 %v2878_v55, %v2695_v42  ;;  %3536 = vmatmul.msk.f32.gmra.mxu2 %vm432_vm0, %v2194_v46  ;;  %v2146_v40 = vadd.f32 %v2058_v43, %v5081_v4  ;;  %v5083_v46 = vld [vmem:[#allocation37_spill] sm:$0xff] }
 0x21f   : > { %3569 = vmatmul.msk.f32.gmra.mxu3 %vm432_vm0, %v4396_v62 }
 0x220   : > { %3002 = vst.msk [vmem:[%s4726_s17 + $0x10] sm:$0xff] %vm432_vm0, %v2970_v5  ;;  %v3035_v53 = vsel %vm432_vm0, %v2970_v5, 0.0  ;;  %v3105_v56 = vmul.f32 %v2970_v5, %v2970_v5  ;;  %3504 = vmatmul.msk.f32.gmra.mxu1 %vm432_vm0, %v4414_v13  ;;  %v5080_v13 = vld [vmem:[#allocation35_spill] sm:$0xff] }
 0x221   : > { %v3036_v26 = vadd.f32 %v3035_v53, %v3034_v16  ;;  %v2331_v6 = vpop.f32.mrf.mxu2  ;;  %v2746_v16 = vld [vmem:[#allocation2 + $0x12a] sm:$0xff] }
 0x222   : > { %v3138_v29 = vsel %vm432_vm0, %v3105_v56, 0.0  ;;  %v2421_v50 = vadd.f32 %v2331_v6, %v2145_v12  ;;  %v2606_v51 = vpop.f32.mrf.mxu3  ;;  %v2884_v34 = vpop.f32.mrf.mxu0 }
 0x223   : > { %v3139_v2 = vadd.f32 %v3138_v29, %v3137_v63  ;;  %v5082_v63 = vld [vmem:[#allocation38_spill] sm:$0xff]  ;;  %v2747_v29 = vld [vmem:[#allocation2 + $0x13a] sm:$0xff] }
 0x224   : > { %v2696_v62 = vadd.f32 %v2606_v51, %v2421_v50  ;;  %v2197_v51 = vld [vmem:[#allocation2 + $0x138] sm:$0xff] }
 0x225   : > { %v2061_v15 = vpop.f32.mrf.mxu1  ;;  %3603 = vmatmul.msk.f32.gmra.mxu0 %vm432_vm0, %v5078_v45 }
 0x226   : > { %v2971_v55 = vadd.f32 %v2881_v59, %v2696_v62  ;;  %3537 = vmatmul.msk.f32.gmra.mxu2 %vm432_vm0, %v5079_v35  ;;  %v2147_v42 = vadd.f32 %v2061_v15, %v5083_v46  ;;  %v5084_v15 = vld [vmem:[#allocation39_spill] sm:$0xff] }
 0x227   : > { %3570 = vmatmul.msk.f32.gmra.mxu3 %vm432_vm0, %v5080_v13 }
 0x228   : > { %3003 = vst.msk [vmem:[%s4726_s17 + $0x18] sm:$0xff] %vm432_vm0, %v2971_v55  ;;  %v3037_v3 = vsel %vm432_vm0, %v2971_v55, 0.0  ;;  %v3106_v28 = vmul.f32 %v2971_v55, %v2971_v55  ;;  %3505 = vmatmul.msk.f32.gmra.mxu1 %vm432_vm0, %v1920_v30 }
 0x229   : > { %v3038_v48 = vadd.f32 %v3037_v3, %v3036_v26  ;;  %v2334_v25 = vpop.f32.mrf.mxu2 }
 0x22a   : > { %v3140_v18 = vsel %vm432_vm0, %v3106_v28, 0.0  ;;  %v2422_v8 = vadd.f32 %v2334_v25, %v2146_v40  ;;  %v2609_v60 = vpop.f32.mrf.mxu3  ;;  %v2887_v11 = vpop.f32.mrf.mxu0 }
 0x22b   : > { %v3141_v19 = vadd.f32 %v3140_v18, %v3139_v2 }
 0x22c   : > { %v2697_v21 = vadd.f32 %v2609_v60, %v2422_v8  ;;  %v2473_v8 = vld [vmem:[#allocation2 + $0x141] sm:$0xff] }
 0x22d   : > { %v2064_v22 = vpop.f32.mrf.mxu1  ;;  %3604 = vmatmul.msk.f32.gmra.mxu0 %vm432_vm0, %v2746_v16 }
 0x22e   : > { %v2972_v59 = vadd.f32 %v2884_v34, %v2697_v21  ;;  %3538 = vmatmul.msk.f32.gmra.mxu2 %vm432_vm0, %v2196_v27  ;;  %v2148_v30 = vadd.f32 %v2064_v22, %v5084_v15 }
 0x22f   : > { %3571 = vmatmul.msk.f32.gmra.mxu3 %vm432_vm0, %v5082_v63 }
 0x230   : > { %3004 = vst.msk [vmem:[%s4726_s17 + $0x20] sm:$0xff] %vm432_vm0, %v2972_v59  ;;  %v3039_v43 = vsel %vm432_vm0, %v2972_v59, 0.0  ;;  %v3107_v5 = vmul.f32 %v2972_v59, %v2972_v59  ;;  %3506 = vmatmul.msk.f32.gmra.mxu1 %vm432_vm0, %v1921_v14 }
 0x231   : > { %v3040_v7 = vadd.f32 %v3039_v43, %v3038_v48  ;;  %v2337_v12 = vpop.f32.mrf.mxu2  ;;  %v2748_v48 = vld [vmem:[#allocation2 + $0x142] sm:$0xff]  ;;  %v2749_v43 = vld [vmem:[#allocation2 + $0x152] sm:$0xff] }
 0x232   : > { %v3142_v53 = vsel %vm432_vm0, %v3107_v5, 0.0  ;;  %v2423_v56 = vadd.f32 %v2337_v12, %v2147_v42  ;;  %v2612_v26 = vpop.f32.mrf.mxu3  ;;  %v2890_v6 = vpop.f32.mrf.mxu0 }
 0x233   : > { %v3143_v50 = vadd.f32 %v3142_v53, %v3141_v19  ;;  %v2474_v53 = vld [vmem:[#allocation2 + $0x151] sm:$0xff] }
 0x234   : > { %v2698_v34 = vadd.f32 %v2612_v26, %v2423_v56 }
 0x235   : > { %v2067_v2 = vpop.f32.mrf.mxu1  ;;  %3605 = vmatmul.msk.f32.gmra.mxu0 %vm432_vm0, %v2747_v29 }
 0x236   : > { %v2973_v62 = vadd.f32 %v2887_v11, %v2698_v34  ;;  %3539 = vmatmul.msk.f32.gmra.mxu2 %vm432_vm0, %v2197_v51 }
 0x237   : > { %3572 = vmatmul.msk.f32.gmra.mxu3 %vm432_vm0, %v4446_v37  ;;  %v2198_v37 = vld [vmem:[#allocation2 + $0x140] sm:$0xff] }
 0x238   : > { %3005 = vst.msk [vmem:[%s4726_s17 + $0x28] sm:$0xff] %vm432_vm0, %v2973_v62  ;;  %v3041_v45 = vsel %vm432_vm0, %v2973_v62, 0.0  ;;  %v3108_v55 = vmul.f32 %v2973_v62, %v2973_v62  ;;  %3507 = vmatmul.msk.f32.gmra.mxu1 %vm432_vm0, %v2746_v16  ;;  %v5085_v16 = vld [vmem:[#allocation41_spill] sm:$0xff] }
 0x239   : > { %v3042_v35 = vadd.f32 %v3041_v45, %v3040_v7  ;;  %v2340_v13 = vpop.f32.mrf.mxu2  ;;  %v2149_v19 = vadd.f32 %v2067_v2, %v5085_v16  ;;  %v2199_v7 = vld [vmem:[#allocation2 + $0x150] sm:$0xff] }
 0x23a   : > { %v3144_v4 = vsel %vm432_vm0, %v3108_v55, 0.0  ;;  %v2424_v40 = vadd.f32 %v2340_v13, %v2148_v30  ;;  %v2615_v3 = vpop.f32.mrf.mxu3  ;;  %v2893_v28 = vpop.f32.mrf.mxu0  ;;  %v2750_v55 = vld [vmem:[#allocation2 + $0x15a] sm:$0xff] }
 0x23b   : > { %v3145_v25 = vadd.f32 %v3144_v4, %v3143_v50  ;;  %v2200_v13 = vld [vmem:[#allocation2 + $0x158] sm:$0xff] }
 0x23c   : > { %v2699_v18 = vadd.f32 %v2615_v3, %v2424_v40  ;;  %v2475_v40 = vld [vmem:[#allocation2 + $0x159] sm:$0xff] }
 0x23d   : > { %v2070_v60 = vpop.f32.mrf.mxu1  ;;  %3606 = vmatmul.msk.f32.gmra.mxu0 %vm432_vm0, %v2748_v48 }
 0x23e   : > { %v2974_v11 = vadd.f32 %v2890_v6, %v2699_v18  ;;  %3540 = vmatmul.msk.f32.gmra.mxu2 %vm432_vm0, %v2198_v37  ;;  %v5086_v6 = vld [vmem:[#allocation42_spill] sm:$0xff] }
 0x23f   : > { %3573 = vmatmul.msk.f32.gmra.mxu3 %vm432_vm0, %v2473_v8 }
 0x240   : > { %3006 = vst.msk [vmem:[%s4726_s17 + $0x30] sm:$0xff] %vm432_vm0, %v2974_v11  ;;  %v3043_v27 = vsel %vm432_vm0, %v2974_v11, 0.0  ;;  %v3109_v21 = vmul.f32 %v2974_v11, %v2974_v11  ;;  %3508 = vmatmul.msk.f32.gmra.mxu1 %vm432_vm0, %v2747_v29  ;;  %v2150_v29 = vadd.f32 %v2070_v60, %v5086_v6  ;;  %v2752_v6 = vld [vmem:[#allocation2 + $0x172] sm:$0xff] }
 0x241   : > { %v3044_v22 = vadd.f32 %v3043_v27, %v3042_v35  ;;  %v2343_v14 = vpop.f32.mrf.mxu2  ;;  %v2751_v27 = vld [vmem:[#allocation2 + $0x16a] sm:$0xff] }
 0x242   : > { %v3146_v59 = vsel %vm432_vm0, %v3109_v21, 0.0  ;;  %v2425_v63 = vadd.f32 %v2343_v14, %v2149_v19  ;;  %v2618_v46 = vpop.f32.mrf.mxu3  ;;  %v2896_v42 = vpop.f32.mrf.mxu0 }
 0x243   : > { %v3147_v5 = vadd.f32 %v3146_v59, %v3145_v25 }
 0x244   : > { %v2700_v12 = vadd.f32 %v2618_v46, %v2425_v63 }
 0x245   : > { %v2073_v56 = vpop.f32.mrf.mxu1  ;;  %3607 = vmatmul.msk.f32.gmra.mxu0 %vm432_vm0, %v2749_v43 }
 0x246   : > { %v2975_v26 = vadd.f32 %v2893_v28, %v2700_v12  ;;  %3541 = vmatmul.msk.f32.gmra.mxu2 %vm432_vm0, %v2199_v7 }
 0x247   : > { %3574 = vmatmul.msk.f32.gmra.mxu3 %vm432_vm0, %v2474_v53 }
 0x248   : > { %3007 = vst.msk [vmem:[%s4726_s17 + $0x38] sm:$0xff] %vm432_vm0, %v2975_v26  ;;  %v3045_v50 = vsel %vm432_vm0, %v2975_v26, 0.0  ;;  %v3110_v51 = vmul.f32 %v2975_v26, %v2975_v26  ;;  %3509 = vmatmul.msk.f32.gmra.mxu1 %vm432_vm0, %v2748_v48  ;;  %v2151_v48 = vadd.f32 %v2073_v56, %v4484_v31  ;;  %v2476_v31 = vld [vmem:[#allocation2 + $0x169] sm:$0xff] }
 0x249   : > { %v3046_v34 = vadd.f32 %v3045_v50, %v3044_v22  ;;  %v2346_v2 = vpop.f32.mrf.mxu2  ;;  %v2201_v22 = vld [vmem:[#allocation2 + $0x168] sm:$0xff]  ;;  %v2202_v50 = vld [vmem:[#allocation2 + $0x170] sm:$0xff] }
 0x24a   : > { %v3148_v62 = vsel %vm432_vm0, %v3110_v51, 0.0  ;;  %v2426_v15 = vadd.f32 %v2346_v2, %v2150_v29  ;;  %v2621_v30 = vpop.f32.mrf.mxu3  ;;  %v2899_v45 = vpop.f32.mrf.mxu0 }
 0x24b   : > { %v3149_v35 = vadd.f32 %v3148_v62, %v3147_v5 }
 0x24c   : > { %v2701_v4 = vadd.f32 %v2621_v30, %v2426_v15 }
 0x24d   : > { %v2076_v3 = vpop.f32.mrf.mxu1  ;;  %3608 = vmatmul.msk.f32.gmra.mxu0 %vm432_vm0, %v2750_v55 }
 0x24e   : > { %v2976_v28 = vadd.f32 %v2896_v42, %v2701_v4  ;;  %3542 = vmatmul.msk.f32.gmra.mxu2 %vm432_vm0, %v2200_v13  ;;  %v2152_v46 = vadd.f32 %v2076_v3, %v4494_v24  ;;  %v2477_v24 = vld [vmem:[#allocation2 + $0x171] sm:$0xff]  ;;  %v2753_v3 = vld [vmem:[#allocation2 + $0x182] sm:$0xff] }
 0x24f   : > { %3575 = vmatmul.msk.f32.gmra.mxu3 %vm432_vm0, %v2475_v40 }
 0x250   : > { %3008 = vst.msk [vmem:[%s4726_s17 + $0x40] sm:$0xff] %vm432_vm0, %v2976_v28  ;;  %v3047_v25 = vsel %vm432_vm0, %v2976_v28, 0.0  ;;  %v3111_v37 = vmul.f32 %v2976_v28, %v2976_v28  ;;  %3510 = vmatmul.msk.f32.gmra.mxu1 %vm432_vm0, %v2749_v43 }
 0x251   : > { %v3048_v18 = vadd.f32 %v3047_v25, %v3046_v34  ;;  %v2349_v8 = vpop.f32.mrf.mxu2 }
 0x252   : > { %v3150_v60 = vsel %vm432_vm0, %v3111_v37, 0.0  ;;  %v2427_v11 = vadd.f32 %v2349_v8, %v2151_v48  ;;  %v2624_v16 = vpop.f32.mrf.mxu3  ;;  %v2902_v19 = vpop.f32.mrf.mxu0  ;;  %v2203_v48 = vld [vmem:[#allocation2 + $0x180] sm:$0xff] }
 0x253   : > { %v3151_v21 = vadd.f32 %v3150_v60, %v3149_v35 }
 0x254   : > { %v2702_v14 = vadd.f32 %v2624_v16, %v2427_v11 }
 0x255   : > { %v2079_v59 = vpop.f32.mrf.mxu1  ;;  %3609 = vmatmul.msk.f32.gmra.mxu0 %vm432_vm0, %v2751_v27 }
 0x256   : > { %v2977_v63 = vadd.f32 %v2899_v45, %v2702_v14  ;;  %3543 = vmatmul.msk.f32.gmra.mxu2 %vm432_vm0, %v2201_v22  ;;  %v2153_v62 = vadd.f32 %v2079_v59, %v4503_v38  ;;  %v2478_v38 = vld [vmem:[#allocation2 + $0x181] sm:$0xff] }
 0x257   : > { %3576 = vmatmul.msk.f32.gmra.mxu3 %vm432_vm0, %v2476_v31  ;;  %v2754_v31 = vld [vmem:[#allocation2 + $0x18a] sm:$0xff] }
 0x258   : > { %3009 = vst.msk [vmem:[%s4726_s17 + $0x48] sm:$0xff] %vm432_vm0, %v2977_v63  ;;  %v3049_v42 = vsel %vm432_vm0, %v2977_v63, 0.0  ;;  %v3112_v43 = vmul.f32 %v2977_v63, %v2977_v63  ;;  %3511 = vmatmul.msk.f32.gmra.mxu1 %vm432_vm0, %v2750_v55  ;;  %v2204_v63 = vld [vmem:[#allocation2 + $0x188] sm:$0xff] }
 0x259   : > { %v3050_v5 = vadd.f32 %v3049_v42, %v3048_v18  ;;  %v2352_v7 = vpop.f32.mrf.mxu2 }
 0x25a   : > { %v3152_v12 = vsel %vm432_vm0, %v3112_v43, 0.0  ;;  %v2428_v53 = vadd.f32 %v2352_v7, %v2152_v46  ;;  %v2627_v56 = vpop.f32.mrf.mxu3  ;;  %v2905_v26 = vpop.f32.mrf.mxu0 }
 0x25b   : > { %v3153_v29 = vadd.f32 %v3152_v12, %v3151_v21 }
 0x25c   : > { %v2703_v51 = vadd.f32 %v2627_v56, %v2428_v53 }
 0x25d   : > { %v2082_v34 = vpop.f32.mrf.mxu1  ;;  %3610 = vmatmul.msk.f32.gmra.mxu0 %vm432_vm0, %v2752_v6 }
 0x25e   : > { %v2978_v2 = vadd.f32 %v2902_v19, %v2703_v51  ;;  %3544 = vmatmul.msk.f32.gmra.mxu2 %vm432_vm0, %v2202_v50  ;;  %v2154_v8 = vadd.f32 %v2082_v34, %v4512_v39  ;;  %v2479_v39 = vld [vmem:[#allocation2 + $0x189] sm:$0xff]  ;;  %v2755_v51 = vld [vmem:[#allocation2 + $0x19a] sm:$0xff] }
 0x25f   : > { %3577 = vmatmul.msk.f32.gmra.mxu3 %vm432_vm0, %v2477_v24  ;;  %v2205_v34 = vld [vmem:[#allocation2 + $0x198] sm:$0xff] }
 0x260   : > { %3010 = vst.msk [vmem:[%s4726_s17 + $0x50] sm:$0xff] %vm432_vm0, %v2978_v2  ;;  %v3051_v15 = vsel %vm432_vm0, %v2978_v2, 0.0  ;;  %v3113_v30 = vmul.f32 %v2978_v2, %v2978_v2  ;;  %3512 = vmatmul.msk.f32.gmra.mxu1 %vm432_vm0, %v2751_v27 }
 0x261   : > { %v3052_v45 = vadd.f32 %v3051_v15, %v3050_v5  ;;  %v2355_v55 = vpop.f32.mrf.mxu2 }
 0x262   : > { %v3154_v35 = vsel %vm432_vm0, %v3113_v30, 0.0  ;;  %v2429_v13 = vadd.f32 %v2355_v55, %v2153_v62  ;;  %v2630_v4 = vpop.f32.mrf.mxu3  ;;  %v2908_v40 = vpop.f32.mrf.mxu0 }
 0x263   : > { %v3155_v28 = vadd.f32 %v3154_v35, %v3153_v29 }
 0x264   : > { %v2704_v25 = vadd.f32 %v2630_v4, %v2429_v13 }
 0x265   : > { %v2085_v37 = vpop.f32.mrf.mxu1  ;;  %3611 = vmatmul.msk.f32.gmra.mxu0 %vm432_vm0, %v2753_v3 }
 0x266   : > { %v2979_v18 = vadd.f32 %v2905_v26, %v2704_v25  ;;  %3545 = vmatmul.msk.f32.gmra.mxu2 %vm432_vm0, %v2203_v48  ;;  %v2155_v5 = vadd.f32 %v2085_v37, %v4521_v36  ;;  %v2480_v36 = vld [vmem:[#allocation2 + $0x199] sm:$0xff]  ;;  %v2756_v48 = vld [vmem:[#allocation2 + $0x1a2] sm:$0xff] }
 0x267   : > { %3578 = vmatmul.msk.f32.gmra.mxu3 %vm432_vm0, %v2478_v38  ;;  %v2206_v38 = vld [vmem:[#allocation2 + $0x1a0] sm:$0xff] }
 0x268   : > { %3011 = vst.msk [vmem:[%s4726_s17 + $0x58] sm:$0xff] %vm432_vm0, %v2979_v18  ;;  %v3053_v60 = vsel %vm432_vm0, %v2979_v18, 0.0  ;;  %v3114_v11 = vmul.f32 %v2979_v18, %v2979_v18  ;;  %3513 = vmatmul.msk.f32.gmra.mxu1 %vm432_vm0, %v2752_v6 }
 0x269   : > { %v3054_v16 = vadd.f32 %v3053_v60, %v3052_v45  ;;  %v2358_v19 = vpop.f32.mrf.mxu2 }
 0x26a   : > { %v3156_v27 = vsel %vm432_vm0, %v3114_v11, 0.0  ;;  %v2430_v21 = vadd.f32 %v2358_v19, %v2154_v8  ;;  %v2633_v22 = vpop.f32.mrf.mxu3  ;;  %v2911_v14 = vpop.f32.mrf.mxu0 }
 0x26b   : > { %v3157_v59 = vadd.f32 %v3156_v27, %v3155_v28 }
 0x26c   : > { %v2705_v46 = vadd.f32 %v2633_v22, %v2430_v21 }
 0x26d   : > { %v2088_v42 = vpop.f32.mrf.mxu1  ;;  %3612 = vmatmul.msk.f32.gmra.mxu0 %vm432_vm0, %v2754_v31 }
 0x26e   : > { %v2980_v43 = vadd.f32 %v2908_v40, %v2705_v46  ;;  %3546 = vmatmul.msk.f32.gmra.mxu2 %vm432_vm0, %v2204_v63  ;;  %v2156_v30 = vadd.f32 %v2088_v42, %v4529_v0  ;;  %v2481_v0 = vld [vmem:[#allocation2 + $0x1a1] sm:$0xff] }
 0x26f   : > { %3579 = vmatmul.msk.f32.gmra.mxu3 %vm432_vm0, %v2479_v39 }
 0x270   : > { %3012 = vst.msk [vmem:[%s4726_s17 + $0x60] sm:$0xff] %vm432_vm0, %v2980_v43  ;;  %v3055_v7 = vsel %vm432_vm0, %v2980_v43, 0.0  ;;  %v3115_v12 = vmul.f32 %v2980_v43, %v2980_v43  ;;  %3514 = vmatmul.msk.f32.gmra.mxu1 %vm432_vm0, %v2753_v3 }
 0x271   : > { %v3056_v53 = vadd.f32 %v3055_v7, %v3054_v16  ;;  %v2361_v56 = vpop.f32.mrf.mxu2 }
 0x272   : > { %v3158_v26 = vsel %vm432_vm0, %v3115_v12, 0.0  ;;  %v2431_v6 = vadd.f32 %v2361_v56, %v2155_v5  ;;  %v2636_v29 = vpop.f32.mrf.mxu3  ;;  %v2914_v50 = vpop.f32.mrf.mxu0 }
 0x273   : > { %v3159_v24 = vadd.f32 %v3158_v26, %v3157_v59 }
 0x274   : > { %v2706_v2 = vadd.f32 %v2636_v29, %v2431_v6 }
 0x275   : > { %v2091_v62 = vpop.f32.mrf.mxu1  ;;  %3613 = vmatmul.msk.f32.gmra.mxu0 %vm432_vm0, %v2755_v51 }
 0x276   : > { %v2981_v15 = vadd.f32 %v2911_v14, %v2706_v2  ;;  %3547 = vmatmul.msk.f32.gmra.mxu2 %vm432_vm0, %v2205_v34  ;;  %v2157_v60 = vadd.f32 %v2091_v62, %v4539_v20 }
 0x277   : > { %3580 = vmatmul.msk.f32.gmra.mxu3 %vm432_vm0, %v2480_v36 }
 0x278   : > { %3013 = vst.msk [vmem:[%s4726_s17 + $0x68] sm:$0xff] %vm432_vm0, %v2981_v15  ;;  %v3057_v45 = vsel %vm432_vm0, %v2981_v15, 0.0  ;;  %v3116_v55 = vmul.f32 %v2981_v15, %v2981_v15  ;;  %3515 = vmatmul.msk.f32.gmra.mxu1 %vm432_vm0, %v2754_v31 }
 0x279   : > { %v3058_v35 = vadd.f32 %v3057_v45, %v3056_v53  ;;  %v2364_v13 = vpop.f32.mrf.mxu2 }
 0x27a   : > { %v3160_v4 = vsel %vm432_vm0, %v3116_v55, 0.0  ;;  %v2432_v40 = vadd.f32 %v2364_v13, %v2156_v30  ;;  %v2639_v3 = vpop.f32.mrf.mxu3  ;;  %v2917_v28 = vpop.f32.mrf.mxu0 }
 0x27b   : > { %v3161_v25 = vadd.f32 %v3160_v4, %v3159_v24 }
 0x27c   : > { %v2707_v37 = vadd.f32 %v2639_v3, %v2432_v40 }
 0x27d   : > { %v2094_v18 = vpop.f32.mrf.mxu1  ;;  %3614 = vmatmul.msk.f32.gmra.mxu0 %vm432_vm0, %v2756_v48 }
 0x27e   : > { %v2982_v8 = vadd.f32 %v2914_v50, %v2707_v37  ;;  %3548 = vmatmul.msk.f32.gmra.mxu2 %vm432_vm0, %v2206_v38  ;;  %v2158_v42 = vadd.f32 %v2094_v18, %v4550_v33 }
 0x27f   : > { %3581 = vmatmul.msk.f32.gmra.mxu3 %vm432_vm0, %v2481_v0 }
 0x280   : > { %3014 = vst.msk [vmem:[%s4726_s17 + $0x70] sm:$0xff] %vm432_vm0, %v2982_v8  ;;  %v3059_v11 = vsel %vm432_vm0, %v2982_v8, 0.0  ;;  %v3117_v16 = vmul.f32 %v2982_v8, %v2982_v8 }
 0x281   : > { %v3060_v19 = vadd.f32 %v3059_v11, %v3058_v35  ;;  %v2367_v27 = vpop.f32.mrf.mxu2 }
 0x282   : > { %v3162_v21 = vsel %vm432_vm0, %v3117_v16, 0.0  ;;  %v2433_v22 = vadd.f32 %v2367_v27, %v2157_v60  ;;  %v2642_v14 = vpop.f32.mrf.mxu3  ;;  %v2920_v31 = vpop.f32.mrf.mxu0 }
 0x283   : > { %v3163_v59 = vadd.f32 %v3162_v21, %v3161_v25 }
 0x284   : > { %v2708_v63 = vadd.f32 %v2642_v14, %v2433_v22 }
 0x285   : > { %v2097_v46 = vpop.f32.mrf.mxu1 }
 0x286   : > { %v2983_v39 = vadd.f32 %v2917_v28, %v2708_v63  ;;  %v2159_v24 = vadd.f32 %v2097_v46, %v4561_v52 }
 0x288   : > { %3015 = vst.msk [vmem:[%s4726_s17 + $0x78] sm:$0xff] %vm432_vm0, %v2983_v39  ;;  %v3061_v20 = vsel %vm432_vm0, %v2983_v39, 0.0  ;;  %v3118_v43 = vmul.f32 %v2983_v39, %v2983_v39 }
 0x289   : > { %v3062_v5 = vadd.f32 %v3061_v20, %v3060_v19  ;;  %v2370_v7 = vpop.f32.mrf.mxu2 }
 0x28a   : > { %v3164_v12 = vsel %vm432_vm0, %v3118_v43, 0.0  ;;  %v2434_v53 = vadd.f32 %v2370_v7, %v2158_v42  ;;  %v2645_v56 = vpop.f32.mrf.mxu3  ;;  %v2923_v26 = vpop.f32.mrf.mxu0 }
 0x28b   : > { %v3165_v6 = vadd.f32 %v3164_v12, %v3163_v59 }
 0x28c   : > { %v2709_v29 = vadd.f32 %v2645_v56, %v2434_v53 }
 0x28d   : > { %v2100_v50 = vpop.f32.mrf.mxu1 }
 0x28e   : > { %v2984_v51 = vadd.f32 %v2920_v31, %v2709_v29  ;;  %v2160_v40 = vadd.f32 %v2100_v50, %v4572_v41 }
 0x290   : > { %3016 = vst.msk [vmem:[%s4726_s17 + $0x80] sm:$0xff] %vm432_vm0, %v2984_v51  ;;  %v3063_v33 = vsel %vm432_vm0, %v2984_v51, 0.0  ;;  %v3119_v34 = vmul.f32 %v2984_v51, %v2984_v51 }
 0x291   : > { %v3064_v2 = vadd.f32 %v3063_v33, %v3062_v5  ;;  %v2373_v36 = vpop.f32.mrf.mxu2 }
 0x292   : > { %v3166_v62 = vsel %vm432_vm0, %v3119_v34, 0.0  ;;  %v2435_v15 = vadd.f32 %v2373_v36, %v2159_v24  ;;  %v2648_v30 = vpop.f32.mrf.mxu3  ;;  %v2926_v45 = vpop.f32.mrf.mxu0 }
 0x293   : > { %v3167_v55 = vadd.f32 %v3166_v62, %v3165_v6 }
 0x294   : > { %v2710_v35 = vadd.f32 %v2648_v30, %v2435_v15 }
 0x295   : > { %v2103_v13 = vpop.f32.mrf.mxu1 }
 0x296   : > { %v2985_v4 = vadd.f32 %v2923_v26, %v2710_v35  ;;  %v2161_v16 = vadd.f32 %v2103_v13, %v4583_v47 }
 0x298   : > { %3017 = vst.msk [vmem:[%s4726_s17 + $0x88] sm:$0xff] %vm432_vm0, %v2985_v4  ;;  %v3065_v52 = vsel %vm432_vm0, %v2985_v4, 0.0  ;;  %v3120_v3 = vmul.f32 %v2985_v4, %v2985_v4 }
 0x299   : > { %v3066_v28 = vadd.f32 %v3065_v52, %v3064_v2  ;;  %v2376_v48 = vpop.f32.mrf.mxu2 }
 0x29a   : > { %v3168_v25 = vsel %vm432_vm0, %v3120_v3, 0.0  ;;  %v2436_v38 = vadd.f32 %v2376_v48, %v2160_v40  ;;  %v2651_v37 = vpop.f32.mrf.mxu3  ;;  %v2929_v0 = vpop.f32.mrf.mxu0 }
 0x29b   : > { %v3169_v18 = vadd.f32 %v3168_v25, %v3167_v55 }
 0x29c   : > { %v2711_v8 = vadd.f32 %v2651_v37, %v2436_v38 }
 0x29d   : > { %v2106_v60 = vpop.f32.mrf.mxu1 }
 0x29e   : > { %v2986_v11 = vadd.f32 %v2926_v45, %v2711_v8  ;;  %v2162_v20 = vadd.f32 %v2106_v60, %v4594_v10 }
 0x2a0   : > { %3018 = vst.msk [vmem:[%s4726_s17 + $0x90] sm:$0xff] %vm432_vm0, %v2986_v11  ;;  %v3067_v41 = vsel %vm432_vm0, %v2986_v11, 0.0  ;;  %v3121_v19 = vmul.f32 %v2986_v11, %v2986_v11 }
 0x2a1   : > { %v3068_v27 = vadd.f32 %v3067_v41, %v3066_v28  ;;  %v2379_v21 = vpop.f32.mrf.mxu2 }
 0x2a2   : > { %v3170_v22 = vsel %vm432_vm0, %v3121_v19, 0.0  ;;  %v2437_v14 = vadd.f32 %v2379_v21, %v2161_v16  ;;  %v2654_v31 = vpop.f32.mrf.mxu3  ;;  %v2932_v59 = vpop.f32.mrf.mxu0 }
 0x2a3   : > { %v3171_v63 = vadd.f32 %v3170_v22, %v3169_v18 }
 0x2a4   : > { %v2712_v46 = vadd.f32 %v2654_v31, %v2437_v14 }
 0x2a5   : > { %v2109_v39 = vpop.f32.mrf.mxu1 }
 0x2a6   : > { %v2987_v42 = vadd.f32 %v2929_v0, %v2712_v46  ;;  %v2163_v24 = vadd.f32 %v2109_v39, %v4605_v44 }
 0x2a8   : > { %3019 = vst.msk [vmem:[%s4726_s17 + $0x98] sm:$0xff] %vm432_vm0, %v2987_v42  ;;  %v3069_v47 = vsel %vm432_vm0, %v2987_v42, 0.0  ;;  %v3122_v43 = vmul.f32 %v2987_v42, %v2987_v42 }
 0x2a9   : > { %v3070_v5 = vadd.f32 %v3069_v47, %v3068_v27  ;;  %v2382_v7 = vpop.f32.mrf.mxu2 }
 0x2aa   : > { %v3172_v12 = vsel %vm432_vm0, %v3122_v43, 0.0  ;;  %v2438_v53 = vadd.f32 %v2382_v7, %v2162_v20  ;;  %v2657_v56 = vpop.f32.mrf.mxu3  ;;  %v2935_v26 = vpop.f32.mrf.mxu0 }
 0x2ab   : > { %v3173_v6 = vadd.f32 %v3172_v12, %v3171_v63 }
 0x2ac   : > { %v2713_v29 = vadd.f32 %v2657_v56, %v2438_v53 }
 0x2ad   : > { %v2112_v50 = vpop.f32.mrf.mxu1 }
 0x2ae   : > { %v2988_v51 = vadd.f32 %v2932_v59, %v2713_v29  ;;  %v2164_v4 = vadd.f32 %v2112_v50, %v4616_v17 }
 0x2b0   : > { %3020 = vst.msk [vmem:[%s4726_s17 + $0xa0] sm:$0xff] %vm432_vm0, %v2988_v51  ;;  %v3071_v10 = vsel %vm432_vm0, %v2988_v51, 0.0  ;;  %v3123_v33 = vmul.f32 %v2988_v51, %v2988_v51 }
 0x2b1   : > { %v3072_v34 = vadd.f32 %v3071_v10, %v3070_v5  ;;  %v2385_v2 = vpop.f32.mrf.mxu2 }
 0x2b2   : > { %v3174_v36 = vsel %vm432_vm0, %v3123_v33, 0.0  ;;  %v2439_v62 = vadd.f32 %v2385_v2, %v2163_v24  ;;  %v2660_v15 = vpop.f32.mrf.mxu3  ;;  %v2938_v30 = vpop.f32.mrf.mxu0 }
 0x2b3   : > { %v3175_v45 = vadd.f32 %v3174_v36, %v3173_v6 }
 0x2b4   : > { %v2714_v55 = vadd.f32 %v2660_v15, %v2439_v62 }
 0x2b5   : > { %v2115_v35 = vpop.f32.mrf.mxu1 }
 0x2b6   : > { %v2989_v13 = vadd.f32 %v2935_v26, %v2714_v55  ;;  %v2165_v60 = vadd.f32 %v2115_v35, %v4627_v61 }
 0x2b8   : > { %3021 = vst.msk [vmem:[%s4726_s17 + $0xa8] sm:$0xff] %vm432_vm0, %v2989_v13  ;;  %v3073_v44 = vsel %vm432_vm0, %v2989_v13, 0.0  ;;  %v3124_v40 = vmul.f32 %v2989_v13, %v2989_v13 }
 0x2b9   : > { %v3074_v52 = vadd.f32 %v3073_v44, %v3072_v34  ;;  %v2388_v3 = vpop.f32.mrf.mxu2 }
 0x2ba   : > { %v3176_v28 = vsel %vm432_vm0, %v3124_v40, 0.0  ;;  %v2440_v48 = vadd.f32 %v2388_v3, %v2164_v4  ;;  %v2663_v25 = vpop.f32.mrf.mxu3  ;;  %v2941_v38 = vpop.f32.mrf.mxu0 }
 0x2bb   : > { %v3177_v37 = vadd.f32 %v3176_v28, %v3175_v45 }
 0x2bc   : > { %v2715_v0 = vadd.f32 %v2663_v25, %v2440_v48 }
 0x2bd   : > { %v2118_v18 = vpop.f32.mrf.mxu1 }
 0x2be   : > { %v2990_v8 = vadd.f32 %v2938_v30, %v2715_v0  ;;  %v2166_v46 = vadd.f32 %v2118_v18, %v4638_v9 }
 0x2c0   : > { %3022 = vst.msk [vmem:[%s4726_s17 + $0xb0] sm:$0xff] %vm432_vm0, %v2990_v8  ;;  %v3075_v17 = vsel %vm432_vm0, %v2990_v8, 0.0  ;;  %v3125_v11 = vmul.f32 %v2990_v8, %v2990_v8 }
 0x2c1   : > { %v3076_v16 = vadd.f32 %v3075_v17, %v3074_v52  ;;  %v2391_v41 = vpop.f32.mrf.mxu2 }
 0x2c2   : > { %v3178_v19 = vsel %vm432_vm0, %v3125_v11, 0.0  ;;  %v2441_v27 = vadd.f32 %v2391_v41, %v2165_v60  ;;  %v2666_v21 = vpop.f32.mrf.mxu3  ;;  %v2944_v22 = vpop.f32.mrf.mxu0 }
 0x2c3   : > { %v3179_v14 = vadd.f32 %v3178_v19, %v3177_v37 }
 0x2c4   : > { %v2716_v31 = vadd.f32 %v2666_v21, %v2441_v27 }
 0x2c5   : > { %v2121_v59 = vpop.f32.mrf.mxu1 }
 0x2c6   : > { %v2991_v63 = vadd.f32 %v2941_v38, %v2716_v31  ;;  %v2167_v6 = vadd.f32 %v2121_v59, %v4649_v23 }
 0x2c8   : > { %3023 = vst.msk [vmem:[%s4726_s17 + $0xb8] sm:$0xff] %vm432_vm0, %v2991_v63  ;;  %v3077_v61 = vsel %vm432_vm0, %v2991_v63, 0.0  ;;  %v3126_v39 = vmul.f32 %v2991_v63, %v2991_v63 }
 0x2c9   : > { %v3078_v42 = vadd.f32 %v3077_v61, %v3076_v16  ;;  %v2394_v20 = vpop.f32.mrf.mxu2 }
 0x2ca   : > { %v3180_v47 = vsel %vm432_vm0, %v3126_v39, 0.0  ;;  %v2442_v43 = vadd.f32 %v2394_v20, %v2166_v46  ;;  %v2669_v5 = vpop.f32.mrf.mxu3  ;;  %v2947_v7 = vpop.f32.mrf.mxu0 }
 0x2cb   : > { %v3181_v12 = vadd.f32 %v3180_v47, %v3179_v14 }
 0x2cc   : > { %v2717_v53 = vadd.f32 %v2669_v5, %v2442_v43 }
 0x2cd   : > { %v2124_v56 = vpop.f32.mrf.mxu1 }
 0x2ce   : > { %v2992_v26 = vadd.f32 %v2944_v22, %v2717_v53  ;;  %v2168_v30 = vadd.f32 %v2124_v56, %v4660_v32 }
 0x2d0   : > { %3024 = vst.msk [vmem:[%s4726_s17 + $0xc0] sm:$0xff] %vm432_vm0, %v2992_v26  ;;  %v3079_v9 = vsel %vm432_vm0, %v2992_v26, 0.0  ;;  %v3127_v29 = vmul.f32 %v2992_v26, %v2992_v26 }
 0x2d1   : > { %v3080_v50 = vadd.f32 %v3079_v9, %v3078_v42  ;;  %v2397_v51 = vpop.f32.mrf.mxu2 }
 0x2d2   : > { %v3182_v24 = vsel %vm432_vm0, %v3127_v29, 0.0  ;;  %v2443_v10 = vadd.f32 %v2397_v51, %v2167_v6  ;;  %v2672_v33 = vpop.f32.mrf.mxu3  ;;  %v2950_v34 = vpop.f32.mrf.mxu0 }
 0x2d3   : > { %v3183_v2 = vadd.f32 %v3182_v24, %v3181_v12 }
 0x2d4   : > { %v2718_v36 = vadd.f32 %v2672_v33, %v2443_v10 }
 0x2d5   : > { %v2127_v62 = vpop.f32.mrf.mxu1 }
 0x2d6   : > { %v2993_v15 = vadd.f32 %v2947_v7, %v2718_v36  ;;  %v2169_v25 = vadd.f32 %v2127_v62, %v4671_v57 }
 0x2d8   : > { %3025 = vst.msk [vmem:[%s4726_s17 + $0xc8] sm:$0xff] %vm432_vm0, %v2993_v15  ;;  %v3081_v23 = vsel %vm432_vm0, %v2993_v15, 0.0  ;;  %v3128_v45 = vmul.f32 %v2993_v15, %v2993_v15 }
 0x2d9   : > { %v3082_v55 = vadd.f32 %v3081_v23, %v3080_v50  ;;  %v2400_v35 = vpop.f32.mrf.mxu2 }
 0x2da   : > { %v3184_v13 = vsel %vm432_vm0, %v3128_v45, 0.0  ;;  %v2444_v4 = vadd.f32 %v2400_v35, %v2168_v30  ;;  %v2675_v44 = vpop.f32.mrf.mxu3  ;;  %v2953_v52 = vpop.f32.mrf.mxu0 }
 0x2db   : > { %v3185_v40 = vadd.f32 %v3184_v13, %v3183_v2 }
 0x2dc   : > { %v2719_v3 = vadd.f32 %v2675_v44, %v2444_v4 }
 0x2dd   : > { %v2130_v48 = vpop.f32.mrf.mxu1 }
 0x2de   : > { %v2994_v28 = vadd.f32 %v2950_v34, %v2719_v3  ;;  %v2170_v19 = vadd.f32 %v2130_v48, %v4682_v49 }
 0x2e0   : > { %3026 = vst.msk [vmem:[%s4726_s17 + $0xd0] sm:$0xff] %vm432_vm0, %v2994_v28  ;;  %v3083_v32 = vsel %vm432_vm0, %v2994_v28, 0.0  ;;  %v3129_v38 = vmul.f32 %v2994_v28, %v2994_v28 }
 0x2e1   : > { %v3084_v37 = vadd.f32 %v3083_v32, %v3082_v55  ;;  %v2403_v0 = vpop.f32.mrf.mxu2 }
 0x2e2   : > { %v3186_v18 = vsel %vm432_vm0, %v3129_v38, 0.0  ;;  %v2445_v8 = vadd.f32 %v2403_v0, %v2169_v25  ;;  %v2678_v60 = vpop.f32.mrf.mxu3  ;;  %v2956_v16 = vpop.f32.mrf.mxu0 }
 0x2e3   : > { %v3187_v17 = vadd.f32 %v3186_v18, %v3185_v40 }
 0x2e4   : > { %v2720_v11 = vadd.f32 %v2678_v60, %v2445_v8 }
 0x2e5   : > { %v2133_v14 = vpop.f32.mrf.mxu1 }
 0x2e6   : > { %v2995_v41 = vadd.f32 %v2953_v52, %v2720_v11  ;;  %v2171_v20 = vadd.f32 %v2133_v14, %v4693_v58 }
 0x2e8   : > { %3027 = vst.msk [vmem:[%s4726_s17 + $0xd8] sm:$0xff] %vm432_vm0, %v2995_v41  ;;  %v3085_v57 = vsel %vm432_vm0, %v2995_v41, 0.0  ;;  %v3130_v27 = vmul.f32 %v2995_v41, %v2995_v41 }
 0x2e9   : > { %v3086_v21 = vadd.f32 %v3085_v57, %v3084_v37  ;;  %v2406_v22 = vpop.f32.mrf.mxu2 }
 0x2ea   : > { %v3188_v31 = vsel %vm432_vm0, %v3130_v27, 0.0  ;;  %v2446_v59 = vadd.f32 %v2406_v22, %v2170_v19  ;;  %v2681_v63 = vpop.f32.mrf.mxu3  ;;  %v2959_v42 = vpop.f32.mrf.mxu0 }
 0x2eb   : > { %v3189_v46 = vadd.f32 %v3188_v31, %v3187_v17 }
 0x2ec   : > { %v2721_v61 = vadd.f32 %v2681_v63, %v2446_v59 }
 0x2ed   : > { %v2136_v26 = vpop.f32.mrf.mxu1 }
 0x2ee   : > { %v2996_v39 = vadd.f32 %v2956_v16, %v2721_v61  ;;  %v2172_v29 = vadd.f32 %v2136_v26, %v4704_v54 }
 0x2f0   : > { %3028 = vst.msk [vmem:[%s4726_s17 + $0xe0] sm:$0xff] %vm432_vm0, %v2996_v39  ;;  %v3087_v49 = vsel %vm432_vm0, %v2996_v39, 0.0  ;;  %v3131_v47 = vmul.f32 %v2996_v39, %v2996_v39 }
 0x2f1   : > { %v3088_v43 = vadd.f32 %v3087_v49, %v3086_v21  ;;  %v2409_v5 = vpop.f32.mrf.mxu2 }
 0x2f2   : > { %v3190_v7 = vsel %vm432_vm0, %v3131_v47, 0.0  ;;  %v2447_v12 = vadd.f32 %v2409_v5, %v2171_v20  ;;  %v2684_v53 = vpop.f32.mrf.mxu3  ;;  %v2962_v10 = vpop.f32.mrf.mxu0 }
 0x2f3   : > { %v3191_v56 = vadd.f32 %v3190_v7, %v3189_v46 }
 0x2f4   : > { %v2722_v6 = vadd.f32 %v2684_v53, %v2447_v12 }
 0x2f5   : > { %v2139_v15 = vpop.f32.mrf.mxu1 }
 0x2f6   : > { %v2997_v9 = vadd.f32 %v2959_v42, %v2722_v6  ;;  %v2173_v23 = vadd.f32 %v2139_v15, %v4713_v1 }
 0x2f8   : > { %3029 = vst.msk [vmem:[%s4726_s17 + $0xe8] sm:$0xff] %vm432_vm0, %v2997_v9  ;;  %v3089_v58 = vsel %vm432_vm0, %v2997_v9, 0.0  ;;  %v3132_v50 = vmul.f32 %v2997_v9, %v2997_v9 }
 0x2f9   : > { %v3090_v51 = vadd.f32 %v3089_v58, %v3088_v43  ;;  %v2412_v24 = vpop.f32.mrf.mxu2 }
 0x2fa   : > { %v3192_v33 = vsel %vm432_vm0, %v3132_v50, 0.0  ;;  %v2448_v34 = vadd.f32 %v2412_v24, %v2172_v29  ;;  %v2687_v2 = vpop.f32.mrf.mxu3  ;;  %v2965_v52 = vpop.f32.mrf.mxu0 }
 0x2fb   : > { %v3193_v36 = vadd.f32 %v3192_v33, %v3191_v56 }
 0x2fc   : > { %v2723_v62 = vadd.f32 %v2687_v2, %v2448_v34 }
 0x2fe   : > { %v2998_v30 = vadd.f32 %v2962_v10, %v2723_v62 }
 0x300   : > { %3030 = vst.msk [vmem:[%s4726_s17 + $0xf0] sm:$0xff] %vm432_vm0, %v2998_v30  ;;  %v3091_v54 = vsel %vm432_vm0, %v2998_v30, 0.0  ;;  %v3133_v45 = vmul.f32 %v2998_v30, %v2998_v30 }
 0x301   : > { %v3092_v55 = vadd.f32 %v3091_v54, %v3090_v51  ;;  %v2415_v35 = vpop.f32.mrf.mxu2 }
 0x302   : > { %v3194_v13 = vsel %vm432_vm0, %v3133_v45, 0.0  ;;  %v2449_v4 = vadd.f32 %v2415_v35, %v2173_v23  ;;  %v2690_v44 = vpop.f32.mrf.mxu3 }
 0x303   : > { %v3195_v40 = vadd.f32 %v3194_v13, %v3193_v36 }
 0x304   : > { %v2724_v3 = vadd.f32 %v2690_v44, %v2449_v4 }
 0x306   : > { %v2999_v28 = vadd.f32 %v2965_v52, %v2724_v3 }
 0x308   : > { %3031 = vst.msk [vmem:[%s4726_s17 + $0xf8] sm:$0xff] %vm432_vm0, %v2999_v28  ;;  %v3093_v1 = vsel %vm432_vm0, %v2999_v28, 0.0  ;;  %v3134_v48 = vmul.f32 %v2999_v28, %v2999_v28 }
 0x309   : > { %v3094_v25 = vadd.f32 %v3093_v1, %v3092_v55 }
 0x30a   : > { %v3196_v32 = vsel %vm432_vm0, %v3134_v48, 0.0 }
 0x30b   : > { %v3095_v38 = vrot.slane %v3094_v25, 4  ;;  %v3197_v37 = vadd.f32 %v3196_v32, %v3195_v40 }
 0x30d   : > { %v3096_v0 = vadd.f32 %v3095_v38, %v3094_v25  ;;  %v3198_v18 = vrot.slane %v3197_v37, 4 }
 0x30f   : > { %v3097_v8 = vrot.slane %v3096_v0, 2  ;;  %v3199_v60 = vadd.f32 %v3198_v18, %v3197_v37 }
 0x311   : > { %v3098_v17 = vadd.f32 %v3097_v8, %v3096_v0  ;;  %v3200_v11 = vrot.slane %v3199_v60, 2 }
 0x313   : > { %v3099_v16 = vrot.slane %v3098_v17, 1  ;;  %v3201_v41 = vadd.f32 %v3200_v11, %v3199_v60 }
 0x315   : > { %v3100_v19 = vadd.f32 %v3099_v16, %v3098_v17  ;;  %v3202_v57 = vrot.slane %v3201_v41, 1 }
 0x317   : > { %3102 = vst.msk [vmem:[%s292_s19] sm:$0x1] %vm3101_vm2, %v3100_v19  ;;  %v3203_v27 = vadd.f32 %v3202_v57, %v3201_v41 }
 0x319   : > { %3204 = vst.msk [vmem:[%s295_s22] sm:$0x1] %vm3101_vm2, %v3203_v27 }
 0x31a PF: > { %s18_s24 = sadd.s32 1, %s3642_s24  }
 0x31b   : > { %p15_p4 = scmp.ge.s32.totalorder %s18_s24, 4  }
 0x31d   :  { %17 = sbr.rel (!%p15_p4) target bundleno = 1 (0x1), region = 104 }

</bundles_post_ra>
